<compile_context>
chip_gen: v7x
topology: tpu7x:2x2x1
jax: 0.10.0
libtpu: 0.0.40
codegen_flags: <defaults>
</compile_context>

<pallas_src>
import jax
import jax.numpy as jnp
from jax import lax
from jax.experimental import pallas as pl
from jax.experimental.pallas import tpu as pltpu


def _lstm_head_kernel(x_ref, gpt_ref, h0_ref, c0_ref,
                      wih0_ref, whh0_ref, b0_ref,
                      w1_ref, b1_ref,
                      whl_ref, whg_ref, bh_ref,
                      o_ref,
                      p0_scr, l1_scr, h_scr, c_scr):
    _, BP, HP = h_scr.shape           # (layers, sublane-padded batch, padded hidden)
    TS = x_ref.shape[0] // BP         # timesteps in this chunk

    # First chunk of this batch group: load the (padded) initial state into the
    # resident VMEM carry; later chunks reuse whatever the previous chunk left.
    @pl.when(pl.program_id(1) == 0)
    def _():
        h_scr[...] = h0_ref[...]
        c_scr[...] = c0_ref[...]

    # Hoisted layer-0 input projection (+bias) over the whole chunk: one big MXU
    # matmul instead of TS tiny ones.
    p0_scr[...] = (jnp.dot(x_ref[...], wih0_ref[...],
                           preferred_element_type=jnp.float32) + b0_ref[...])

    # vreg-resident recurrent state (f32 carries; padded lanes stay exactly 0).
    h0 = h_scr[0]
    c0 = c_scr[0]
    h1 = h_scr[1]
    c1 = c_scr[1]

    # Hoist the layer-1 bias broadcast out of the time loop (JAX does not CSE it).
    b1v = jnp.broadcast_to(b1_ref[...], (BP, 4 * HP))

    def gate_math(gates, c):
        # 128-lane-aligned gate slices (free vreg selects); gate math in f32.
        i = jax.nn.sigmoid(gates[:, 0 * HP:1 * HP])
        f = jax.nn.sigmoid(gates[:, 1 * HP:2 * HP])
        g = jnp.tanh(gates[:, 2 * HP:3 * HP])
        o = jax.nn.sigmoid(gates[:, 3 * HP:4 * HP])
        c = f * c + i * g
        return o * jnp.tanh(c), c

    def row(t):
        # whole-(8,128)-tile row offset for timestep t
        return t * BP if isinstance(t, int) else pl.multiple_of(t * BP, BP)

    def layer0_step(t, h, c):
        # W_hh0 stays in its VMEM ref (no 32-vreg weight hoist -> no spills).
        gates = (jnp.dot(h.astype(jnp.bfloat16), whh0_ref[...],
                         preferred_element_type=jnp.float32)
                 + p0_scr[pl.ds(row(t), BP), :])
        return gate_math(gates, c)

    def layer1_step(t, h0_t, h, c):
        # Fused input+recurrent projection: [h0_t | h1_{t-1}] @ [W_ih1 ; W_hh1],
        # K = 2*HP -> one full 256-wide MXU K pass per 256 output lanes.
        hcat = jnp.concatenate([h0_t, h], axis=-1).astype(jnp.bfloat16)
        gates = jnp.dot(hcat, w1_ref[...], preferred_element_type=jnp.float32) + b1v
        h, c = gate_math(gates, c)
        l1_scr[pl.ds(row(t), BP), :] = h
        return h, c

    # Wavefront schedule: within one iteration, layer-0 step t and layer-1 step
    # t-1 both consume h0_{t-1} and are mutually independent -> the scheduler can
    # interleave the two chains and hide MXU-pop / EUP latency at tiny batch.
    h0, c0 = layer0_step(0, h0, c0)

    def wave_body(t, carry):
        h0, c0, h1, c1 = carry
        h0n, c0n = layer0_step(t, h0, c0)
        h1n, c1n = layer1_step(t - 1, h0, h1, c1)
        return h0n, c0n, h1n, c1n

    if TS <= 5:   # short chunks: fully static unroll (all offsets static)
        carry = (h0, c0, h1, c1)
        for t in range(1, TS):
            carry = wave_body(t, carry)
        h0, c0, h1, c1 = carry
    else:         # long chunks: bounded unroll keeps vreg live ranges in check
        h0, c0, h1, c1 = lax.fori_loop(1, TS, wave_body, (h0, c0, h1, c1),
                                       unroll=min(8, TS - 1))
    h1, c1 = layer1_step(TS - 1, h0, h1, c1)

    # Carry the state to the next sequence chunk of this batch group.
    h_scr[0] = h0
    c_scr[0] = c0
    h_scr[1] = h1
    c_scr[1] = c1

    # h_head on concat([lstm_out, gpt_select], -1): two MXU matmuls (K = HP and
    # K = GP, both 128 multiples) into f32 logits; padded heatmap lanes carry a
    # -1e30 bias so they are exactly zero after the softmax.
    logits = (jnp.dot(l1_scr[...].astype(jnp.bfloat16), whl_ref[...],
                      preferred_element_type=jnp.float32)
              + jnp.dot(gpt_ref[...], whg_ref[...],
                        preferred_element_type=jnp.float32)
              + bh_ref[...])
    m = jnp.max(logits, axis=-1, keepdims=True)
    e = jnp.exp(logits - m)
    s = jnp.sum(e, axis=-1, keepdims=True)
    inv = pl.reciprocal(s, approx=True)
    inv = inv * (2.0 - s * inv)        # one Newton step -> rows sum to 1 (~1e-6)
    o_ref[...] = e * inv


def _round_up(v, m):
    return (v + m - 1) // m * m


def _pad_gate_cols(w, H, HP):
    """(K, 4H) -> (K, 4HP): gate g's H real columns land at [g*HP, g*HP + H)."""
    K = w.shape[0]
    out = jnp.zeros((K, 4 * HP), w.dtype)
    for g in range(4):
        out = out.at[:, g * HP:g * HP + H].set(w[:, g * H:(g + 1) * H])
    return out


def _pad_rows(w, KP):
    K = w.shape[0]
    return jnp.zeros((KP,) + w.shape[1:], w.dtype).at[:K].set(w)


def gpt_embedding_select(gpt_outs, align, w_ind):
    """Plain-JAX equivalent of the torch index_select gather."""
    align_inds = jnp.take_along_axis(align, w_ind, axis=1)                   # (B, S)
    return jnp.take_along_axis(gpt_outs, align_inds[:, :, None], axis=1)     # (B, S, G)


def mode_gpt_lstm_heatmap_forward(x, hidden, gpt_outs, align, w_ind, params,
                                  *, chunk=None, batch_groups=1):
    """x: (B,S,F) batch_first audio feats; hidden=(h0,c0) each (L,B,H);
    gpt_outs: (B,S_tok,G) GPT-2 last_hidden_state stand-in; align: (B,n_words);
    w_ind: (B,S).  Returns the softmaxed heatmap (B,S,T).

    `batch_groups` splits sequences over a leading "parallel" grid axis (use 2 on
    v7x to occupy both TensorCores); `chunk` is timesteps per grid step along the
    sequential ("arbitrary") axis (default: whole sequence = biggest tile)."""
    B, S, F = x.shape
    h0, c0 = hidden
    L, _, H = h0.shape
    assert L == 2, "kernel is specialized for the module's 2-layer LSTM"
    G = gpt_outs.shape[-1]
    T = params["wh"].shape[0]

    HP = _round_up(H, 128)   # per-gate lane padding (no-op for production H=256)
    TP = _round_up(T, 128)   # lane-dense head / output
    GP = _round_up(G, 128)   # GPT contraction padded for MXU K fill
    BP = 8                   # per-group batch padded to a full sublane tile
    NG = batch_groups
    Bg = -(-B // NG)         # real sequences per group
    assert Bg <= BP, "at most 8 sequences per batch group"

    if chunk is None:
        chunk = S            # biggest tile: amortizes per-grid-step overhead
    assert S % chunk == 0
    n_chunks = S // chunk
    tsb = chunk * BP         # rows per chunk (time-major, 8 sublanes per step)

    # ---- glue (plain JAX): GPT embedding selection via alignment + word indices
    gpt_select = gpt_embedding_select(gpt_outs, align, w_ind)                # (B,S,G)

    # ---- glue: group-split, sublane-padded, time-major activations (bf16)
    def to_groups(a, lane_pad):
        W = a.shape[-1]
        if NG * Bg > B:
            a = jnp.concatenate(
                [a, jnp.zeros((NG * Bg - B,) + a.shape[1:], a.dtype)], axis=0)
        a = a.reshape(NG, Bg, S, W)
        a = jnp.pad(a, ((0, 0), (0, BP - Bg), (0, 0), (0, lane_pad - W)))
        return jnp.transpose(a, (0, 2, 1, 3)).reshape(NG, S * BP, lane_pad)

    x_g = to_groups(x.astype(jnp.float32), F).astype(jnp.bfloat16)
    gpt_g = to_groups(gpt_select.astype(jnp.float32), GP).astype(jnp.bfloat16)

    def hid_groups(hc):
        hc = hc.astype(jnp.float32)
        if NG * Bg > B:
            hc = jnp.concatenate(
                [hc, jnp.zeros((L, NG * Bg - B, H), jnp.float32)], axis=1)
        hc = hc.reshape(L, NG, Bg, H)
        hc = jnp.pad(hc, ((0, 0), (0, 0), (0, BP - Bg), (0, HP - H)))
        return jnp.transpose(hc, (1, 0, 2, 3))                    # (NG, L, BP, HP)

    h0_g, c0_g = hid_groups(h0), hid_groups(c0)

    # ---- glue: gate-padded bf16 weights.  Zero padded rows/cols keep the padded
    #      hidden lanes of h/c exactly zero through the whole recurrence.
    wih0 = _pad_gate_cols(params["w_ih0"].T, H, HP).astype(jnp.bfloat16)      # (F,4HP)
    whh0 = _pad_gate_cols(_pad_rows(params["w_hh0"].T, HP), H, HP).astype(jnp.bfloat16)
    b0 = _pad_gate_cols((params["b_ih0"] + params["b_hh0"]).reshape(1, 4 * H), H, HP)

    # layer-1 fused input+recurrent weight: gates1 = [h0 | h1] @ [W_ih1 ; W_hh1] + b1
    w1 = jnp.zeros((2 * HP, 4 * HP), jnp.float32)
    w1 = w1.at[:HP].set(_pad_gate_cols(_pad_rows(params["w_ih1"].T, HP), H, HP))
    w1 = w1.at[HP:].set(_pad_gate_cols(_pad_rows(params["w_hh1"].T, HP), H, HP))
    w1 = w1.astype(jnp.bfloat16)
    b1 = _pad_gate_cols((params["b_ih1"] + params["b_hh1"]).reshape(1, 4 * H), H, HP)

    # head split into the LSTM and GPT halves; padded heatmap lanes get a -1e30
    # bias -> exactly zero after the (f32-logit) softmax.
    whl = jnp.zeros((HP, TP), jnp.float32).at[:H, :T].set(params["wh"][:, :H].T)
    whl = whl.astype(jnp.bfloat16)
    whg = jnp.zeros((GP, TP), jnp.float32).at[:G, :T].set(params["wh"][:, H:].T)
    whg = whg.astype(jnp.bfloat16)
    bh = jnp.full((1, TP), -1e30, jnp.float32).at[0, :T].set(params["bh"])

    # ---- specs.  NOTE: pl.Buffered(1) on the constant weight specs would halve
    #      their VMEM footprint on v7x; left at default buffering for portability.
    full = lambda a: pl.BlockSpec(a.shape, lambda g, s, n=a.ndim: (0,) * n)
    chunk_spec = lambda w: pl.BlockSpec((None, tsb, w), lambda g, s: (g, s, 0))
    hid_spec = pl.BlockSpec((None, L, BP, HP), lambda g, s: (g, 0, 0, 0))

    grid_spec = pltpu.PrefetchScalarGridSpec(
        num_scalar_prefetch=0,
        grid=(NG, n_chunks),
        in_specs=[chunk_spec(F), chunk_spec(GP),
                  hid_spec, hid_spec,
                  full(wih0), full(whh0), full(b0),
                  full(w1), full(b1),
                  full(whl), full(whg), full(bh)],
        out_specs=pl.BlockSpec((None, tsb, TP), lambda g, s: (g, s, 0)),
        scratch_shapes=[pltpu.VMEM((tsb, 4 * HP), jnp.float32),   # hoisted layer-0 proj
                        pltpu.VMEM((tsb, HP), jnp.float32),       # layer-1 outputs
                        pltpu.VMEM((L, BP, HP), jnp.float32),     # h carry (per group)
                        pltpu.VMEM((L, BP, HP), jnp.float32)],    # c carry (per group)
    )

    out = pl.pallas_call(
        _lstm_head_kernel,
        out_shape=jax.ShapeDtypeStruct((NG, S * BP, TP), jnp.float32),
        grid_spec=grid_spec,
        compiler_params=pltpu.CompilerParams(
            dimension_semantics=("parallel", "arbitrary"),
            vmem_limit_bytes=64 * 1024 * 1024),
    )(x_g, gpt_g, h0_g, c0_g, wih0, whh0, b0, w1, b1, whl, whg, bh)

    # (NG, S*BP, TP) -> (B, S, T)
    out = out.reshape(NG, S, BP, TP)[:, :, :Bg, :]
    out = jnp.transpose(out, (0, 2, 1, 3)).reshape(NG * Bg, S, TP)
    return out[:B, :, :T]


def _make_params(key, n_feat, n_hidden, gpt_embed, T):
    ks = jax.random.split(key, 10)
    s = 1.0 / jnp.sqrt(n_hidden)
    u = lambda k, shape: jax.random.uniform(k, shape, jnp.float32, -s, s)
    return {
        "w_ih0": u(ks[0], (4 * n_hidden, n_feat)),
        "w_hh0": u(ks[1], (4 * n_hidden, n_hidden)),
        "b_ih0": u(ks[2], (4 * n_hidden,)),
        "b_hh0": u(ks[3], (4 * n_hidden,)),
        "w_ih1": u(ks[4], (4 * n_hidden, n_hidden)),
        "w_hh1": u(ks[5], (4 * n_hidden, n_hidden)),
        "b_ih1": u(ks[6], (4 * n_hidden,)),
        "b_hh1": u(ks[7], (4 * n_hidden,)),
        # h_head: xavier-style uniform init, deterministic
        "wh": jax.random.uniform(ks[8], (T, n_hidden + gpt_embed), jnp.float32,
                                 -0.05, 0.05),
        "bh": jax.random.uniform(ks[9], (T,), jnp.float32, -0.05, 0.05),
    }


def _reference_forward(x, hidden, gpt_outs, align, w_ind, params):
    """Pure-JAX f32 reference (same math as the PyTorch mode=0 forward)."""
    h0, c0 = hidden

    def lstm_layer(inp, h, c, wih, whh, bih, bhh):
        def step(carry, x_t):
            h, c = carry
            gates = x_t @ wih.T + bih + h @ whh.T + bhh
            i, f, g, o = jnp.split(gates, 4, axis=-1)
            c = jax.nn.sigmoid(f) * c + jax.nn.sigmoid(i) * jnp.tanh(g)
            h = jax.nn.sigmoid(o) * jnp.tanh(c)
            return (h, c), h
        _, hs = lax.scan(step, (h, c), jnp.swapaxes(inp, 0, 1))
        return jnp.swapaxes(hs, 0, 1)                                      # (B, S, H)

    l0 = lstm_layer(x, h0[0], c0[0], params["w_ih0"], params["w_hh0"],
                    params["b_ih0"], params["b_hh0"])
    l1 = lstm_layer(l0, h0[1], c0[1], params["w_ih1"], params["w_hh1"],
                    params["b_ih1"], params["b_hh1"])
    gpt_select = gpt_embedding_select(gpt_outs, align, w_ind)
    feats = jnp.concatenate([l1, gpt_select], axis=-1)
    logits = feats @ params["wh"].T + params["bh"]
    return jax.nn.softmax(logits, axis=-1)


if __name__ == "__main__":
    # small shapes consistent with the module's forward
    B, S, F = 2, 8, 64         # batch, audio seq len, n_feat
    H, L = 32, 2               # n_hidden, n_layers
    G = 48                     # gpt_embed
    T = 16                     # heatmap bins
    S_TOK, N_WORDS = 10, 6

    key = jax.random.PRNGKey(0)
    k_x, k_gpt, k_align, k_wind, k_par = jax.random.split(key, 5)

    x = jax.random.normal(k_x, (B, S, F), jnp.float32)
    # init_hidden(batch_size): zeros
    hidden = (jnp.zeros((L, B, H), jnp.float32), jnp.zeros((L, B, H), jnp.float32))
    # synthetic GPT-2 last_hidden_state (stand-in for GPT2Model forward)
    gpt_outs = jax.random.normal(k_gpt, (B, S_TOK, G), jnp.float32)
    align = jax.random.randint(k_align, (B, N_WORDS), 0, S_TOK, jnp.int32)
    w_ind = jax.random.randint(k_wind, (B, S), 0, N_WORDS, jnp.int32)

    params = _make_params(k_par, F, H, G, T)
    ref = _reference_forward(x, hidden, gpt_outs, align, w_ind, params)

    def check(heat):
        assert heat.shape == (B, S, T)
        assert bool(jnp.all(jnp.isfinite(heat)))
        # Newton-refined reciprocal -> rows sum to 1 tightly
        assert bool(jnp.allclose(jnp.sum(heat, axis=-1), 1.0, atol=1e-3))
        max_err = float(jnp.max(jnp.abs(heat - ref)))
        assert max_err < 2e-2, f"mismatch vs reference: max |err| = {max_err}"

    # config 1: 2 sequence chunks (carried h/c scratch) x 2 batch groups (the
    # "parallel" axis that feeds v7x's second TensorCore), static-unroll path.
    heat = mode_gpt_lstm_heatmap_forward(x, hidden, gpt_outs, align, w_ind, params,
                                         chunk=4, batch_groups=2)
    check(jax.block_until_ready(heat))

    # config 2: whole-sequence chunk, single group, bounded-unroll fori_loop
    # recurrence path (dynamic pl.ds offsets with pl.multiple_of hints).
    heat2 = mode_gpt_lstm_heatmap_forward(x, hidden, gpt_outs, align, w_ind, params)
    check(jax.block_until_ready(heat2))

    print("KERNEL_OK")
</pallas_src>

<mosaic_0001>
module attributes {stable_mosaic.version = 11 : i64} {
  func.func @_lstm_head_kernel(%arg0: i32, %arg1: i32, %arg2: memref<1x32x64xbf16, #tpu.memory_space<vmem>>, %arg3: memref<1x32x128xbf16, #tpu.memory_space<vmem>>, %arg4: memref<1x2x8x128xf32, #tpu.memory_space<vmem>>, %arg5: memref<1x2x8x128xf32, #tpu.memory_space<vmem>>, %arg6: memref<64x512xbf16, #tpu.memory_space<vmem>>, %arg7: memref<128x512xbf16, #tpu.memory_space<vmem>>, %arg8: memref<1x512xf32, #tpu.memory_space<vmem>>, %arg9: memref<256x512xbf16, #tpu.memory_space<vmem>>, %arg10: memref<1x512xf32, #tpu.memory_space<vmem>>, %arg11: memref<128x128xbf16, #tpu.memory_space<vmem>>, %arg12: memref<128x128xbf16, #tpu.memory_space<vmem>>, %arg13: memref<1x128xf32, #tpu.memory_space<vmem>>, %arg14: memref<1x32x128xf32, #tpu.memory_space<vmem>>, %arg15: memref<32x512xf32, #tpu.memory_space<vmem>>, %arg16: memref<32x128xf32, #tpu.memory_space<vmem>>, %arg17: memref<2x8x128xf32, #tpu.memory_space<vmem>>, %arg18: memref<2x8x128xf32, #tpu.memory_space<vmem>>) attributes {dimension_semantics = [#tpu.dimension_semantics<parallel>, #tpu.dimension_semantics<arbitrary>], iteration_bounds = array<i64: 2, 2>, scalar_prefetch = 0 : i64, scratch_operands = 4 : i64, tpu.core_type = #tpu.core_type<tc>, window_params = [{transform_indices = @transform_0, window_bounds = array<i64: 1, 32, 64>}, {transform_indices = @transform_1, window_bounds = array<i64: 1, 32, 128>}, {transform_indices = @transform_2, window_bounds = array<i64: 1, 2, 8, 128>}, {transform_indices = @transform_3, window_bounds = array<i64: 1, 2, 8, 128>}, {pipeline_mode = #tpu.pipeline_mode<synchronous>, transform_indices = @transform_4, window_bounds = array<i64: 64, 512>}, {pipeline_mode = #tpu.pipeline_mode<synchronous>, transform_indices = @transform_5, window_bounds = array<i64: 128, 512>}, {pipeline_mode = #tpu.pipeline_mode<synchronous>, transform_indices = @transform_6, window_bounds = array<i64: 1, 512>}, {pipeline_mode = #tpu.pipeline_mode<synchronous>, transform_indices = @transform_7, window_bounds = array<i64: 256, 512>}, {pipeline_mode = #tpu.pipeline_mode<synchronous>, transform_indices = @transform_8, window_bounds = array<i64: 1, 512>}, {pipeline_mode = #tpu.pipeline_mode<synchronous>, transform_indices = @transform_9, window_bounds = array<i64: 128, 128>}, {pipeline_mode = #tpu.pipeline_mode<synchronous>, transform_indices = @transform_10, window_bounds = array<i64: 128, 128>}, {pipeline_mode = #tpu.pipeline_mode<synchronous>, transform_indices = @transform_11, window_bounds = array<i64: 1, 128>}, {transform_indices = @transform_12, window_bounds = array<i64: 1, 32, 128>}]} {
    %c0_i32 = arith.constant 0 : i32
    %0 = arith.cmpi eq, %arg1, %c0_i32 : i32
    %1 = arith.extui %0 : i1 to i32
    %c0_i32_0 = arith.constant 0 : i32
    %2 = arith.cmpi ne, %1, %c0_i32_0 : i32
    scf.if %2 {
      %c0_114 = arith.constant 0 : index
      %c0_115 = arith.constant 0 : index
      %c0_116 = arith.constant 0 : index
      %c0_117 = arith.constant 0 : index
      %307 = vector.load %arg4[%c0_114, %c0_115, %c0_116, %c0_117] : memref<1x2x8x128xf32, #tpu.memory_space<vmem>>, vector<1x2x8x128xf32>
      %308 = vector.shape_cast %307 : vector<1x2x8x128xf32> to vector<2x8x128xf32>
      %c0_118 = arith.constant 0 : index
      %c0_119 = arith.constant 0 : index
      %c0_120 = arith.constant 0 : index
      %309 = vector.load %arg17[%c0_118, %c0_119, %c0_120] : memref<2x8x128xf32, #tpu.memory_space<vmem>>, vector<2x8x128xf32>
      tpu.vector_store %arg17[%c0_118, %c0_119, %c0_120], %308 {strides = array<i32>} : memref<2x8x128xf32, #tpu.memory_space<vmem>>, vector<2x8x128xf32>,
      %c0_121 = arith.constant 0 : index
      %c0_122 = arith.constant 0 : index
      %c0_123 = arith.constant 0 : index
      %c0_124 = arith.constant 0 : index
      %310 = vector.load %arg5[%c0_121, %c0_122, %c0_123, %c0_124] : memref<1x2x8x128xf32, #tpu.memory_space<vmem>>, vector<1x2x8x128xf32>
      %311 = vector.shape_cast %310 : vector<1x2x8x128xf32> to vector<2x8x128xf32>
      %c0_125 = arith.constant 0 : index
      %c0_126 = arith.constant 0 : index
      %c0_127 = arith.constant 0 : index
      %312 = vector.load %arg18[%c0_125, %c0_126, %c0_127] : memref<2x8x128xf32, #tpu.memory_space<vmem>>, vector<2x8x128xf32>
      tpu.vector_store %arg18[%c0_125, %c0_126, %c0_127], %311 {strides = array<i32>} : memref<2x8x128xf32, #tpu.memory_space<vmem>>, vector<2x8x128xf32>,
    } else {
    }
    %c0 = arith.constant 0 : index
    %c0_1 = arith.constant 0 : index
    %c0_2 = arith.constant 0 : index
    %3 = vector.load %arg2[%c0, %c0_1, %c0_2] : memref<1x32x64xbf16, #tpu.memory_space<vmem>>, vector<1x32x64xbf16>
    %4 = vector.shape_cast %3 : vector<1x32x64xbf16> to vector<32x64xbf16>
    %c0_3 = arith.constant 0 : index
    %c0_4 = arith.constant 0 : index
    %5 = vector.load %arg6[%c0_3, %c0_4] : memref<64x512xbf16, #tpu.memory_space<vmem>>, vector<64x512xbf16>
    %cst = arith.constant dense<0.000000e+00> : vector<32x512xf32>
    %6 = tpu.matmul %4, %5, %cst {dimension_numbers = #tpu.dot_dimension_numbers<[1], [0], [0], [1], [0, 0, 1, 1], [], []>} : vector<32x64xbf16>, vector<64x512xbf16>, vector<32x512xf32> -> vector<32x512xf32>
    %c0_5 = arith.constant 0 : index
    %c0_6 = arith.constant 0 : index
    %7 = vector.load %arg8[%c0_5, %c0_6] : memref<1x512xf32, #tpu.memory_space<vmem>>, vector<1x512xf32>
    %8 = vector.broadcast %7 : vector<1x512xf32> to vector<32x512xf32>
    %9 = arith.addf %6, %8 : vector<32x512xf32>
    %c0_7 = arith.constant 0 : index
    %c0_8 = arith.constant 0 : index
    %10 = vector.load %arg15[%c0_7, %c0_8] : memref<32x512xf32, #tpu.memory_space<vmem>>, vector<32x512xf32>
    tpu.vector_store %arg15[%c0_7, %c0_8], %9 {strides = array<i32>} : memref<32x512xf32, #tpu.memory_space<vmem>>, vector<32x512xf32>,
    %c0_9 = arith.constant 0 : index
    %c0_10 = arith.constant 0 : index
    %c0_11 = arith.constant 0 : index
    %11 = vector.load %arg17[%c0_9, %c0_10, %c0_11] : memref<2x8x128xf32, #tpu.memory_space<vmem>>, vector<1x8x128xf32>
    %12 = vector.shape_cast %11 : vector<1x8x128xf32> to vector<8x128xf32>
    %c0_12 = arith.constant 0 : index
    %c0_13 = arith.constant 0 : index
    %c0_14 = arith.constant 0 : index
    %13 = vector.load %arg18[%c0_12, %c0_13, %c0_14] : memref<2x8x128xf32, #tpu.memory_space<vmem>>, vector<1x8x128xf32>
    %14 = vector.shape_cast %13 : vector<1x8x128xf32> to vector<8x128xf32>
    %c1 = arith.constant 1 : index
    %c0_15 = arith.constant 0 : index
    %c0_16 = arith.constant 0 : index
    %15 = vector.load %arg17[%c1, %c0_15, %c0_16] : memref<2x8x128xf32, #tpu.memory_space<vmem>>, vector<1x8x128xf32>
    %16 = vector.shape_cast %15 : vector<1x8x128xf32> to vector<8x128xf32>
    %c1_17 = arith.constant 1 : index
    %c0_18 = arith.constant 0 : index
    %c0_19 = arith.constant 0 : index
    %17 = vector.load %arg18[%c1_17, %c0_18, %c0_19] : memref<2x8x128xf32, #tpu.memory_space<vmem>>, vector<1x8x128xf32>
    %18 = vector.shape_cast %17 : vector<1x8x128xf32> to vector<8x128xf32>
    %c0_20 = arith.constant 0 : index
    %c0_21 = arith.constant 0 : index
    %19 = vector.load %arg10[%c0_20, %c0_21] : memref<1x512xf32, #tpu.memory_space<vmem>>, vector<1x512xf32>
    %20 = vector.shape_cast %19 : vector<1x512xf32> to vector<1x512xf32>
    %21 = vector.broadcast %20 : vector<1x512xf32> to vector<8x512xf32>
    %22 = arith.truncf %12 : vector<8x128xf32> to vector<8x128xbf16>
    %c0_22 = arith.constant 0 : index
    %c0_23 = arith.constant 0 : index
    %23 = vector.load %arg7[%c0_22, %c0_23] : memref<128x512xbf16, #tpu.memory_space<vmem>>, vector<128x512xbf16>
    %cst_24 = arith.constant dense<0.000000e+00> : vector<8x512xf32>
    %24 = tpu.matmul %22, %23, %cst_24 {dimension_numbers = #tpu.dot_dimension_numbers<[1], [0], [0], [1], [0, 0, 1, 1], [], []>} : vector<8x128xbf16>, vector<128x512xbf16>, vector<8x512xf32> -> vector<8x512xf32>
    %c0_25 = arith.constant 0 : index
    %c0_26 = arith.constant 0 : index
    %25 = vector.load %arg15[%c0_25, %c0_26] : memref<32x512xf32, #tpu.memory_space<vmem>>, vector<8x512xf32>
    %26 = arith.addf %24, %25 : vector<8x512xf32>
    %27 = vector.extract_strided_slice %26 {offsets = [0, 0], sizes = [8, 128], strides = [1, 1]} : vector<8x512xf32> to vector<8x128xf32>
    %28 = arith.negf %27 : vector<8x128xf32>
    %29 = math.exp %28 : vector<8x128xf32>
    %cst_27 = arith.constant 1.000000e+00 : f32
    %30 = vector.broadcast %cst_27 : f32 to vector<8x128xf32>
    %31 = arith.addf %30, %29 : vector<8x128xf32>
    %32 = arith.divf %30, %31 : vector<8x128xf32>
    %33 = vector.extract_strided_slice %26 {offsets = [0, 128], sizes = [8, 128], strides = [1, 1]} : vector<8x512xf32> to vector<8x128xf32>
    %34 = arith.negf %33 : vector<8x128xf32>
    %35 = math.exp %34 : vector<8x128xf32>
    %cst_28 = arith.constant 1.000000e+00 : f32
    %36 = vector.broadcast %cst_28 : f32 to vector<8x128xf32>
    %37 = arith.addf %36, %35 : vector<8x128xf32>
    %38 = arith.divf %36, %37 : vector<8x128xf32>
    %39 = vector.extract_strided_slice %26 {offsets = [0, 256], sizes = [8, 128], strides = [1, 1]} : vector<8x512xf32> to vector<8x128xf32>
    %40 = math.tanh %39 : vector<8x128xf32>
    %41 = vector.extract_strided_slice %26 {offsets = [0, 384], sizes = [8, 128], strides = [1, 1]} : vector<8x512xf32> to vector<8x128xf32>
    %42 = arith.negf %41 : vector<8x128xf32>
    %43 = math.exp %42 : vector<8x128xf32>
    %cst_29 = arith.constant 1.000000e+00 : f32
    %44 = vector.broadcast %cst_29 : f32 to vector<8x128xf32>
    %45 = arith.addf %44, %43 : vector<8x128xf32>
    %46 = arith.divf %44, %45 : vector<8x128xf32>
    %47 = arith.mulf %38, %14 : vector<8x128xf32>
    %48 = arith.mulf %32, %40 : vector<8x128xf32>
    %49 = arith.addf %47, %48 : vector<8x128xf32>
    %50 = math.tanh %49 : vector<8x128xf32>
    %51 = arith.mulf %46, %50 : vector<8x128xf32>
    %52 = arith.truncf %51 : vector<8x128xf32> to vector<8x128xbf16>
    %c0_30 = arith.constant 0 : index
    %c0_31 = arith.constant 0 : index
    %53 = vector.load %arg7[%c0_30, %c0_31] : memref<128x512xbf16, #tpu.memory_space<vmem>>, vector<128x512xbf16>
    %cst_32 = arith.constant dense<0.000000e+00> : vector<8x512xf32>
    %54 = tpu.matmul %52, %53, %cst_32 {dimension_numbers = #tpu.dot_dimension_numbers<[1], [0], [0], [1], [0, 0, 1, 1], [], []>} : vector<8x128xbf16>, vector<128x512xbf16>, vector<8x512xf32> -> vector<8x512xf32>
    %c8 = arith.constant 8 : index
    %c0_33 = arith.constant 0 : index
    %55 = vector.load %arg15[%c8, %c0_33] : memref<32x512xf32, #tpu.memory_space<vmem>>, vector<8x512xf32>
    %56 = arith.addf %54, %55 : vector<8x512xf32>
    %57 = vector.extract_strided_slice %56 {offsets = [0, 0], sizes = [8, 128], strides = [1, 1]} : vector<8x512xf32> to vector<8x128xf32>
    %58 = arith.negf %57 : vector<8x128xf32>
    %59 = math.exp %58 : vector<8x128xf32>
    %cst_34 = arith.constant 1.000000e+00 : f32
    %60 = vector.broadcast %cst_34 : f32 to vector<8x128xf32>
    %61 = arith.addf %60, %59 : vector<8x128xf32>
    %62 = arith.divf %60, %61 : vector<8x128xf32>
    %63 = vector.extract_strided_slice %56 {offsets = [0, 128], sizes = [8, 128], strides = [1, 1]} : vector<8x512xf32> to vector<8x128xf32>
    %64 = arith.negf %63 : vector<8x128xf32>
    %65 = math.exp %64 : vector<8x128xf32>
    %cst_35 = arith.constant 1.000000e+00 : f32
    %66 = vector.broadcast %cst_35 : f32 to vector<8x128xf32>
    %67 = arith.addf %66, %65 : vector<8x128xf32>
    %68 = arith.divf %66, %67 : vector<8x128xf32>
    %69 = vector.extract_strided_slice %56 {offsets = [0, 256], sizes = [8, 128], strides = [1, 1]} : vector<8x512xf32> to vector<8x128xf32>
    %70 = math.tanh %69 : vector<8x128xf32>
    %71 = vector.extract_strided_slice %56 {offsets = [0, 384], sizes = [8, 128], strides = [1, 1]} : vector<8x512xf32> to vector<8x128xf32>
    %72 = arith.negf %71 : vector<8x128xf32>
    %73 = math.exp %72 : vector<8x128xf32>
    %cst_36 = arith.constant 1.000000e+00 : f32
    %74 = vector.broadcast %cst_36 : f32 to vector<8x128xf32>
    %75 = arith.addf %74, %73 : vector<8x128xf32>
    %76 = arith.divf %74, %75 : vector<8x128xf32>
    %77 = arith.mulf %68, %49 : vector<8x128xf32>
    %78 = arith.mulf %62, %70 : vector<8x128xf32>
    %79 = arith.addf %77, %78 : vector<8x128xf32>
    %80 = math.tanh %79 : vector<8x128xf32>
    %81 = arith.mulf %76, %80 : vector<8x128xf32>
    %82 = tpu.concatenate %51, %16 in 1 : vector<8x128xf32>, vector<8x128xf32> -> vector<8x256xf32>
    %83 = arith.truncf %82 : vector<8x256xf32> to vector<8x256xbf16>
    %c0_37 = arith.constant 0 : index
    %c0_38 = arith.constant 0 : index
    %84 = vector.load %arg9[%c0_37, %c0_38] : memref<256x512xbf16, #tpu.memory_space<vmem>>, vector<256x512xbf16>
    %cst_39 = arith.constant dense<0.000000e+00> : vector<8x512xf32>
    %85 = tpu.matmul %83, %84, %cst_39 {dimension_numbers = #tpu.dot_dimension_numbers<[1], [0], [0], [1], [0, 0, 1, 1], [], []>} : vector<8x256xbf16>, vector<256x512xbf16>, vector<8x512xf32> -> vector<8x512xf32>
    %86 = arith.addf %85, %21 : vector<8x512xf32>
    %87 = vector.extract_strided_slice %86 {offsets = [0, 0], sizes = [8, 128], strides = [1, 1]} : vector<8x512xf32> to vector<8x128xf32>
    %88 = arith.negf %87 : vector<8x128xf32>
    %89 = math.exp %88 : vector<8x128xf32>
    %cst_40 = arith.constant 1.000000e+00 : f32
    %90 = vector.broadcast %cst_40 : f32 to vector<8x128xf32>
    %91 = arith.addf %90, %89 : vector<8x128xf32>
    %92 = arith.divf %90, %91 : vector<8x128xf32>
    %93 = vector.extract_strided_slice %86 {offsets = [0, 128], sizes = [8, 128], strides = [1, 1]} : vector<8x512xf32> to vector<8x128xf32>
    %94 = arith.negf %93 : vector<8x128xf32>
    %95 = math.exp %94 : vector<8x128xf32>
    %cst_41 = arith.constant 1.000000e+00 : f32
    %96 = vector.broadcast %cst_41 : f32 to vector<8x128xf32>
    %97 = arith.addf %96, %95 : vector<8x128xf32>
    %98 = arith.divf %96, %97 : vector<8x128xf32>
    %99 = vector.extract_strided_slice %86 {offsets = [0, 256], sizes = [8, 128], strides = [1, 1]} : vector<8x512xf32> to vector<8x128xf32>
    %100 = math.tanh %99 : vector<8x128xf32>
    %101 = vector.extract_strided_slice %86 {offsets = [0, 384], sizes = [8, 128], strides = [1, 1]} : vector<8x512xf32> to vector<8x128xf32>
    %102 = arith.negf %101 : vector<8x128xf32>
    %103 = math.exp %102 : vector<8x128xf32>
    %cst_42 = arith.constant 1.000000e+00 : f32
    %104 = vector.broadcast %cst_42 : f32 to vector<8x128xf32>
    %105 = arith.addf %104, %103 : vector<8x128xf32>
    %106 = arith.divf %104, %105 : vector<8x128xf32>
    %107 = arith.mulf %98, %18 : vector<8x128xf32>
    %108 = arith.mulf %92, %100 : vector<8x128xf32>
    %109 = arith.addf %107, %108 : vector<8x128xf32>
    %110 = math.tanh %109 : vector<8x128xf32>
    %111 = arith.mulf %106, %110 : vector<8x128xf32>
    %c0_43 = arith.constant 0 : index
    %c0_44 = arith.constant 0 : index
    %112 = vector.load %arg16[%c0_43, %c0_44] : memref<32x128xf32, #tpu.memory_space<vmem>>, vector<8x128xf32>
    tpu.vector_store %arg16[%c0_43, %c0_44], %111 {strides = array<i32>} : memref<32x128xf32, #tpu.memory_space<vmem>>, vector<8x128xf32>,
    %113 = arith.truncf %81 : vector<8x128xf32> to vector<8x128xbf16>
    %c0_45 = arith.constant 0 : index
    %c0_46 = arith.constant 0 : index
    %114 = vector.load %arg7[%c0_45, %c0_46] : memref<128x512xbf16, #tpu.memory_space<vmem>>, vector<128x512xbf16>
    %cst_47 = arith.constant dense<0.000000e+00> : vector<8x512xf32>
    %115 = tpu.matmul %113, %114, %cst_47 {dimension_numbers = #tpu.dot_dimension_numbers<[1], [0], [0], [1], [0, 0, 1, 1], [], []>} : vector<8x128xbf16>, vector<128x512xbf16>, vector<8x512xf32> -> vector<8x512xf32>
    %c16 = arith.constant 16 : index
    %c0_48 = arith.constant 0 : index
    %116 = vector.load %arg15[%c16, %c0_48] : memref<32x512xf32, #tpu.memory_space<vmem>>, vector<8x512xf32>
    %117 = arith.addf %115, %116 : vector<8x512xf32>
    %118 = vector.extract_strided_slice %117 {offsets = [0, 0], sizes = [8, 128], strides = [1, 1]} : vector<8x512xf32> to vector<8x128xf32>
    %119 = arith.negf %118 : vector<8x128xf32>
    %120 = math.exp %119 : vector<8x128xf32>
    %cst_49 = arith.constant 1.000000e+00 : f32
    %121 = vector.broadcast %cst_49 : f32 to vector<8x128xf32>
    %122 = arith.addf %121, %120 : vector<8x128xf32>
    %123 = arith.divf %121, %122 : vector<8x128xf32>
    %124 = vector.extract_strided_slice %117 {offsets = [0, 128], sizes = [8, 128], strides = [1, 1]} : vector<8x512xf32> to vector<8x128xf32>
    %125 = arith.negf %124 : vector<8x128xf32>
    %126 = math.exp %125 : vector<8x128xf32>
    %cst_50 = arith.constant 1.000000e+00 : f32
    %127 = vector.broadcast %cst_50 : f32 to vector<8x128xf32>
    %128 = arith.addf %127, %126 : vector<8x128xf32>
    %129 = arith.divf %127, %128 : vector<8x128xf32>
    %130 = vector.extract_strided_slice %117 {offsets = [0, 256], sizes = [8, 128], strides = [1, 1]} : vector<8x512xf32> to vector<8x128xf32>
    %131 = math.tanh %130 : vector<8x128xf32>
    %132 = vector.extract_strided_slice %117 {offsets = [0, 384], sizes = [8, 128], strides = [1, 1]} : vector<8x512xf32> to vector<8x128xf32>
    %133 = arith.negf %132 : vector<8x128xf32>
    %134 = math.exp %133 : vector<8x128xf32>
    %cst_51 = arith.constant 1.000000e+00 : f32
    %135 = vector.broadcast %cst_51 : f32 to vector<8x128xf32>
    %136 = arith.addf %135, %134 : vector<8x128xf32>
    %137 = arith.divf %135, %136 : vector<8x128xf32>
    %138 = arith.mulf %129, %79 : vector<8x128xf32>
    %139 = arith.mulf %123, %131 : vector<8x128xf32>
    %140 = arith.addf %138, %139 : vector<8x128xf32>
    %141 = math.tanh %140 : vector<8x128xf32>
    %142 = arith.mulf %137, %141 : vector<8x128xf32>
    %143 = tpu.concatenate %81, %111 in 1 : vector<8x128xf32>, vector<8x128xf32> -> vector<8x256xf32>
    %144 = arith.truncf %143 : vector<8x256xf32> to vector<8x256xbf16>
    %c0_52 = arith.constant 0 : index
    %c0_53 = arith.constant 0 : index
    %145 = vector.load %arg9[%c0_52, %c0_53] : memref<256x512xbf16, #tpu.memory_space<vmem>>, vector<256x512xbf16>
    %cst_54 = arith.constant dense<0.000000e+00> : vector<8x512xf32>
    %146 = tpu.matmul %144, %145, %cst_54 {dimension_numbers = #tpu.dot_dimension_numbers<[1], [0], [0], [1], [0, 0, 1, 1], [], []>} : vector<8x256xbf16>, vector<256x512xbf16>, vector<8x512xf32> -> vector<8x512xf32>
    %147 = arith.addf %146, %21 : vector<8x512xf32>
    %148 = vector.extract_strided_slice %147 {offsets = [0, 0], sizes = [8, 128], strides = [1, 1]} : vector<8x512xf32> to vector<8x128xf32>
    %149 = arith.negf %148 : vector<8x128xf32>
    %150 = math.exp %149 : vector<8x128xf32>
    %cst_55 = arith.constant 1.000000e+00 : f32
    %151 = vector.broadcast %cst_55 : f32 to vector<8x128xf32>
    %152 = arith.addf %151, %150 : vector<8x128xf32>
    %153 = arith.divf %151, %152 : vector<8x128xf32>
    %154 = vector.extract_strided_slice %147 {offsets = [0, 128], sizes = [8, 128], strides = [1, 1]} : vector<8x512xf32> to vector<8x128xf32>
    %155 = arith.negf %154 : vector<8x128xf32>
    %156 = math.exp %155 : vector<8x128xf32>
    %cst_56 = arith.constant 1.000000e+00 : f32
    %157 = vector.broadcast %cst_56 : f32 to vector<8x128xf32>
    %158 = arith.addf %157, %156 : vector<8x128xf32>
    %159 = arith.divf %157, %158 : vector<8x128xf32>
    %160 = vector.extract_strided_slice %147 {offsets = [0, 256], sizes = [8, 128], strides = [1, 1]} : vector<8x512xf32> to vector<8x128xf32>
    %161 = math.tanh %160 : vector<8x128xf32>
    %162 = vector.extract_strided_slice %147 {offsets = [0, 384], sizes = [8, 128], strides = [1, 1]} : vector<8x512xf32> to vector<8x128xf32>
    %163 = arith.negf %162 : vector<8x128xf32>
    %164 = math.exp %163 : vector<8x128xf32>
    %cst_57 = arith.constant 1.000000e+00 : f32
    %165 = vector.broadcast %cst_57 : f32 to vector<8x128xf32>
    %166 = arith.addf %165, %164 : vector<8x128xf32>
    %167 = arith.divf %165, %166 : vector<8x128xf32>
    %168 = arith.mulf %159, %109 : vector<8x128xf32>
    %169 = arith.mulf %153, %161 : vector<8x128xf32>
    %170 = arith.addf %168, %169 : vector<8x128xf32>
    %171 = math.tanh %170 : vector<8x128xf32>
    %172 = arith.mulf %167, %171 : vector<8x128xf32>
    %c8_58 = arith.constant 8 : index
    %c0_59 = arith.constant 0 : index
    %173 = vector.load %arg16[%c8_58, %c0_59] : memref<32x128xf32, #tpu.memory_space<vmem>>, vector<8x128xf32>
    tpu.vector_store %arg16[%c8_58, %c0_59], %172 {strides = array<i32>} : memref<32x128xf32, #tpu.memory_space<vmem>>, vector<8x128xf32>,
    %174 = arith.truncf %142 : vector<8x128xf32> to vector<8x128xbf16>
    %c0_60 = arith.constant 0 : index
    %c0_61 = arith.constant 0 : index
    %175 = vector.load %arg7[%c0_60, %c0_61] : memref<128x512xbf16, #tpu.memory_space<vmem>>, vector<128x512xbf16>
    %cst_62 = arith.constant dense<0.000000e+00> : vector<8x512xf32>
    %176 = tpu.matmul %174, %175, %cst_62 {dimension_numbers = #tpu.dot_dimension_numbers<[1], [0], [0], [1], [0, 0, 1, 1], [], []>} : vector<8x128xbf16>, vector<128x512xbf16>, vector<8x512xf32> -> vector<8x512xf32>
    %c24 = arith.constant 24 : index
    %c0_63 = arith.constant 0 : index
    %177 = vector.load %arg15[%c24, %c0_63] : memref<32x512xf32, #tpu.memory_space<vmem>>, vector<8x512xf32>
    %178 = arith.addf %176, %177 : vector<8x512xf32>
    %179 = vector.extract_strided_slice %178 {offsets = [0, 0], sizes = [8, 128], strides = [1, 1]} : vector<8x512xf32> to vector<8x128xf32>
    %180 = arith.negf %179 : vector<8x128xf32>
    %181 = math.exp %180 : vector<8x128xf32>
    %cst_64 = arith.constant 1.000000e+00 : f32
    %182 = vector.broadcast %cst_64 : f32 to vector<8x128xf32>
    %183 = arith.addf %182, %181 : vector<8x128xf32>
    %184 = arith.divf %182, %183 : vector<8x128xf32>
    %185 = vector.extract_strided_slice %178 {offsets = [0, 128], sizes = [8, 128], strides = [1, 1]} : vector<8x512xf32> to vector<8x128xf32>
    %186 = arith.negf %185 : vector<8x128xf32>
    %187 = math.exp %186 : vector<8x128xf32>
    %cst_65 = arith.constant 1.000000e+00 : f32
    %188 = vector.broadcast %cst_65 : f32 to vector<8x128xf32>
    %189 = arith.addf %188, %187 : vector<8x128xf32>
    %190 = arith.divf %188, %189 : vector<8x128xf32>
    %191 = vector.extract_strided_slice %178 {offsets = [0, 256], sizes = [8, 128], strides = [1, 1]} : vector<8x512xf32> to vector<8x128xf32>
    %192 = math.tanh %191 : vector<8x128xf32>
    %193 = vector.extract_strided_slice %178 {offsets = [0, 384], sizes = [8, 128], strides = [1, 1]} : vector<8x512xf32> to vector<8x128xf32>
    %194 = arith.negf %193 : vector<8x128xf32>
    %195 = math.exp %194 : vector<8x128xf32>
    %cst_66 = arith.constant 1.000000e+00 : f32
    %196 = vector.broadcast %cst_66 : f32 to vector<8x128xf32>
    %197 = arith.addf %196, %195 : vector<8x128xf32>
    %198 = arith.divf %196, %197 : vector<8x128xf32>
    %199 = arith.mulf %190, %140 : vector<8x128xf32>
    %200 = arith.mulf %184, %192 : vector<8x128xf32>
    %201 = arith.addf %199, %200 : vector<8x128xf32>
    %202 = math.tanh %201 : vector<8x128xf32>
    %203 = arith.mulf %198, %202 : vector<8x128xf32>
    %204 = tpu.concatenate %142, %172 in 1 : vector<8x128xf32>, vector<8x128xf32> -> vector<8x256xf32>
    %205 = arith.truncf %204 : vector<8x256xf32> to vector<8x256xbf16>
    %c0_67 = arith.constant 0 : index
    %c0_68 = arith.constant 0 : index
    %206 = vector.load %arg9[%c0_67, %c0_68] : memref<256x512xbf16, #tpu.memory_space<vmem>>, vector<256x512xbf16>
    %cst_69 = arith.constant dense<0.000000e+00> : vector<8x512xf32>
    %207 = tpu.matmul %205, %206, %cst_69 {dimension_numbers = #tpu.dot_dimension_numbers<[1], [0], [0], [1], [0, 0, 1, 1], [], []>} : vector<8x256xbf16>, vector<256x512xbf16>, vector<8x512xf32> -> vector<8x512xf32>
    %208 = arith.addf %207, %21 : vector<8x512xf32>
    %209 = vector.extract_strided_slice %208 {offsets = [0, 0], sizes = [8, 128], strides = [1, 1]} : vector<8x512xf32> to vector<8x128xf32>
    %210 = arith.negf %209 : vector<8x128xf32>
    %211 = math.exp %210 : vector<8x128xf32>
    %cst_70 = arith.constant 1.000000e+00 : f32
    %212 = vector.broadcast %cst_70 : f32 to vector<8x128xf32>
    %213 = arith.addf %212, %211 : vector<8x128xf32>
    %214 = arith.divf %212, %213 : vector<8x128xf32>
    %215 = vector.extract_strided_slice %208 {offsets = [0, 128], sizes = [8, 128], strides = [1, 1]} : vector<8x512xf32> to vector<8x128xf32>
    %216 = arith.negf %215 : vector<8x128xf32>
    %217 = math.exp %216 : vector<8x128xf32>
    %cst_71 = arith.constant 1.000000e+00 : f32
    %218 = vector.broadcast %cst_71 : f32 to vector<8x128xf32>
    %219 = arith.addf %218, %217 : vector<8x128xf32>
    %220 = arith.divf %218, %219 : vector<8x128xf32>
    %221 = vector.extract_strided_slice %208 {offsets = [0, 256], sizes = [8, 128], strides = [1, 1]} : vector<8x512xf32> to vector<8x128xf32>
    %222 = math.tanh %221 : vector<8x128xf32>
    %223 = vector.extract_strided_slice %208 {offsets = [0, 384], sizes = [8, 128], strides = [1, 1]} : vector<8x512xf32> to vector<8x128xf32>
    %224 = arith.negf %223 : vector<8x128xf32>
    %225 = math.exp %224 : vector<8x128xf32>
    %cst_72 = arith.constant 1.000000e+00 : f32
    %226 = vector.broadcast %cst_72 : f32 to vector<8x128xf32>
    %227 = arith.addf %226, %225 : vector<8x128xf32>
    %228 = arith.divf %226, %227 : vector<8x128xf32>
    %229 = arith.mulf %220, %170 : vector<8x128xf32>
    %230 = arith.mulf %214, %222 : vector<8x128xf32>
    %231 = arith.addf %229, %230 : vector<8x128xf32>
    %232 = math.tanh %231 : vector<8x128xf32>
    %233 = arith.mulf %228, %232 : vector<8x128xf32>
    %c16_73 = arith.constant 16 : index
    %c0_74 = arith.constant 0 : index
    %234 = vector.load %arg16[%c16_73, %c0_74] : memref<32x128xf32, #tpu.memory_space<vmem>>, vector<8x128xf32>
    tpu.vector_store %arg16[%c16_73, %c0_74], %233 {strides = array<i32>} : memref<32x128xf32, #tpu.memory_space<vmem>>, vector<8x128xf32>,
    %235 = tpu.concatenate %203, %233 in 1 : vector<8x128xf32>, vector<8x128xf32> -> vector<8x256xf32>
    %236 = arith.truncf %235 : vector<8x256xf32> to vector<8x256xbf16>
    %c0_75 = arith.constant 0 : index
    %c0_76 = arith.constant 0 : index
    %237 = vector.load %arg9[%c0_75, %c0_76] : memref<256x512xbf16, #tpu.memory_space<vmem>>, vector<256x512xbf16>
    %cst_77 = arith.constant dense<0.000000e+00> : vector<8x512xf32>
    %238 = tpu.matmul %236, %237, %cst_77 {dimension_numbers = #tpu.dot_dimension_numbers<[1], [0], [0], [1], [0, 0, 1, 1], [], []>} : vector<8x256xbf16>, vector<256x512xbf16>, vector<8x512xf32> -> vector<8x512xf32>
    %239 = arith.addf %238, %21 : vector<8x512xf32>
    %240 = vector.extract_strided_slice %239 {offsets = [0, 0], sizes = [8, 128], strides = [1, 1]} : vector<8x512xf32> to vector<8x128xf32>
    %241 = arith.negf %240 : vector<8x128xf32>
    %242 = math.exp %241 : vector<8x128xf32>
    %cst_78 = arith.constant 1.000000e+00 : f32
    %243 = vector.broadcast %cst_78 : f32 to vector<8x128xf32>
    %244 = arith.addf %243, %242 : vector<8x128xf32>
    %245 = arith.divf %243, %244 : vector<8x128xf32>
    %246 = vector.extract_strided_slice %239 {offsets = [0, 128], sizes = [8, 128], strides = [1, 1]} : vector<8x512xf32> to vector<8x128xf32>
    %247 = arith.negf %246 : vector<8x128xf32>
    %248 = math.exp %247 : vector<8x128xf32>
    %cst_79 = arith.constant 1.000000e+00 : f32
    %249 = vector.broadcast %cst_79 : f32 to vector<8x128xf32>
    %250 = arith.addf %249, %248 : vector<8x128xf32>
    %251 = arith.divf %249, %250 : vector<8x128xf32>
    %252 = vector.extract_strided_slice %239 {offsets = [0, 256], sizes = [8, 128], strides = [1, 1]} : vector<8x512xf32> to vector<8x128xf32>
    %253 = math.tanh %252 : vector<8x128xf32>
    %254 = vector.extract_strided_slice %239 {offsets = [0, 384], sizes = [8, 128], strides = [1, 1]} : vector<8x512xf32> to vector<8x128xf32>
    %255 = arith.negf %254 : vector<8x128xf32>
    %256 = math.exp %255 : vector<8x128xf32>
    %cst_80 = arith.constant 1.000000e+00 : f32
    %257 = vector.broadcast %cst_80 : f32 to vector<8x128xf32>
    %258 = arith.addf %257, %256 : vector<8x128xf32>
    %259 = arith.divf %257, %258 : vector<8x128xf32>
    %260 = arith.mulf %251, %231 : vector<8x128xf32>
    %261 = arith.mulf %245, %253 : vector<8x128xf32>
    %262 = arith.addf %260, %261 : vector<8x128xf32>
    %263 = math.tanh %262 : vector<8x128xf32>
    %264 = arith.mulf %259, %263 : vector<8x128xf32>
    %c24_81 = arith.constant 24 : index
    %c0_82 = arith.constant 0 : index
    %265 = vector.load %arg16[%c24_81, %c0_82] : memref<32x128xf32, #tpu.memory_space<vmem>>, vector<8x128xf32>
    tpu.vector_store %arg16[%c24_81, %c0_82], %264 {strides = array<i32>} : memref<32x128xf32, #tpu.memory_space<vmem>>, vector<8x128xf32>,
    %c0_83 = arith.constant 0 : index
    %c0_84 = arith.constant 0 : index
    %c0_85 = arith.constant 0 : index
    %266 = vector.load %arg17[%c0_83, %c0_84, %c0_85] : memref<2x8x128xf32, #tpu.memory_space<vmem>>, vector<1x8x128xf32>
    %267 = vector.shape_cast %266 : vector<1x8x128xf32> to vector<8x128xf32>
    %268 = vector.shape_cast %203 : vector<8x128xf32> to vector<1x8x128xf32>
    tpu.vector_store %arg17[%c0_83, %c0_84, %c0_85], %268 {strides = array<i32>} : memref<2x8x128xf32, #tpu.memory_space<vmem>>, vector<1x8x128xf32>,
    %c0_86 = arith.constant 0 : index
    %c0_87 = arith.constant 0 : index
    %c0_88 = arith.constant 0 : index
    %269 = vector.load %arg18[%c0_86, %c0_87, %c0_88] : memref<2x8x128xf32, #tpu.memory_space<vmem>>, vector<1x8x128xf32>
    %270 = vector.shape_cast %269 : vector<1x8x128xf32> to vector<8x128xf32>
    %271 = vector.shape_cast %201 : vector<8x128xf32> to vector<1x8x128xf32>
    tpu.vector_store %arg18[%c0_86, %c0_87, %c0_88], %271 {strides = array<i32>} : memref<2x8x128xf32, #tpu.memory_space<vmem>>, vector<1x8x128xf32>,
    %c1_89 = arith.constant 1 : index
    %c0_90 = arith.constant 0 : index
    %c0_91 = arith.constant 0 : index
    %272 = vector.load %arg17[%c1_89, %c0_90, %c0_91] : memref<2x8x128xf32, #tpu.memory_space<vmem>>, vector<1x8x128xf32>
    %273 = vector.shape_cast %272 : vector<1x8x128xf32> to vector<8x128xf32>
    %274 = vector.shape_cast %264 : vector<8x128xf32> to vector<1x8x128xf32>
    tpu.vector_store %arg17[%c1_89, %c0_90, %c0_91], %274 {strides = array<i32>} : memref<2x8x128xf32, #tpu.memory_space<vmem>>, vector<1x8x128xf32>,
    %c1_92 = arith.constant 1 : index
    %c0_93 = arith.constant 0 : index
    %c0_94 = arith.constant 0 : index
    %275 = vector.load %arg18[%c1_92, %c0_93, %c0_94] : memref<2x8x128xf32, #tpu.memory_space<vmem>>, vector<1x8x128xf32>
    %276 = vector.shape_cast %275 : vector<1x8x128xf32> to vector<8x128xf32>
    %277 = vector.shape_cast %262 : vector<8x128xf32> to vector<1x8x128xf32>
    tpu.vector_store %arg18[%c1_92, %c0_93, %c0_94], %277 {strides = array<i32>} : memref<2x8x128xf32, #tpu.memory_space<vmem>>, vector<1x8x128xf32>,
    %c0_95 = arith.constant 0 : index
    %c0_96 = arith.constant 0 : index
    %278 = vector.load %arg16[%c0_95, %c0_96] : memref<32x128xf32, #tpu.memory_space<vmem>>, vector<32x128xf32>
    %279 = arith.truncf %278 : vector<32x128xf32> to vector<32x128xbf16>
    %c0_97 = arith.constant 0 : index
    %c0_98 = arith.constant 0 : index
    %280 = vector.load %arg11[%c0_97, %c0_98] : memref<128x128xbf16, #tpu.memory_space<vmem>>, vector<128x128xbf16>
    %cst_99 = arith.constant dense<0.000000e+00> : vector<32x128xf32>
    %281 = tpu.matmul %279, %280, %cst_99 {dimension_numbers = #tpu.dot_dimension_numbers<[1], [0], [0], [1], [0, 0, 1, 1], [], []>} : vector<32x128xbf16>, vector<128x128xbf16>, vector<32x128xf32> -> vector<32x128xf32>
    %c0_100 = arith.constant 0 : index
    %c0_101 = arith.constant 0 : index
    %c0_102 = arith.constant 0 : index
    %282 = vector.load %arg3[%c0_100, %c0_101, %c0_102] : memref<1x32x128xbf16, #tpu.memory_space<vmem>>, vector<1x32x128xbf16>
    %283 = vector.shape_cast %282 : vector<1x32x128xbf16> to vector<32x128xbf16>
    %c0_103 = arith.constant 0 : index
    %c0_104 = arith.constant 0 : index
    %284 = vector.load %arg12[%c0_103, %c0_104] : memref<128x128xbf16, #tpu.memory_space<vmem>>, vector<128x128xbf16>
    %cst_105 = arith.constant dense<0.000000e+00> : vector<32x128xf32>
    %285 = tpu.matmul %283, %284, %cst_105 {dimension_numbers = #tpu.dot_dimension_numbers<[1], [0], [0], [1], [0, 0, 1, 1], [], []>} : vector<32x128xbf16>, vector<128x128xbf16>, vector<32x128xf32> -> vector<32x128xf32>
    %286 = arith.addf %281, %285 : vector<32x128xf32>
    %c0_106 = arith.constant 0 : index
    %c0_107 = arith.constant 0 : index
    %287 = vector.load %arg13[%c0_106, %c0_107] : memref<1x128xf32, #tpu.memory_space<vmem>>, vector<1x128xf32>
    %288 = vector.broadcast %287 : vector<1x128xf32> to vector<32x128xf32>
    %289 = arith.addf %286, %288 : vector<32x128xf32>
    %cst_108 = arith.constant dense<0xFF800000> : vector<32xf32>
    %290 = vector.multi_reduction <maximumf>, %289, %cst_108 [1] : vector<32x128xf32> to vector<32xf32>
    %291 = vector.shape_cast %290 : vector<32xf32> to vector<32x1xf32>
    %292 = vector.broadcast %291 : vector<32x1xf32> to vector<32x128xf32>
    %293 = arith.subf %289, %292 : vector<32x128xf32>
    %294 = math.exp %293 : vector<32x128xf32>
    %cst_109 = arith.constant dense<0.000000e+00> : vector<32xf32>
    %295 = vector.multi_reduction <add>, %294, %cst_109 [1] : vector<32x128xf32> to vector<32xf32>
    %296 = vector.shape_cast %295 : vector<32xf32> to vector<32x1xf32>
    %297 = tpu.reciprocal %296 {approx = true} : vector<32x1xf32> -> vector<32x1xf32>
    %298 = arith.mulf %296, %297 : vector<32x1xf32>
    %cst_110 = arith.constant 2.000000e+00 : f32
    %299 = vector.broadcast %cst_110 : f32 to vector<32x1xf32>
    %300 = arith.subf %299, %298 : vector<32x1xf32>
    %301 = arith.mulf %297, %300 : vector<32x1xf32>
    %302 = vector.broadcast %301 : vector<32x1xf32> to vector<32x128xf32>
    %303 = arith.mulf %294, %302 : vector<32x128xf32>
    %c0_111 = arith.constant 0 : index
    %c0_112 = arith.constant 0 : index
    %c0_113 = arith.constant 0 : index
    %304 = vector.load %arg14[%c0_111, %c0_112, %c0_113] : memref<1x32x128xf32, #tpu.memory_space<vmem>>, vector<1x32x128xf32>
    %305 = vector.shape_cast %304 : vector<1x32x128xf32> to vector<32x128xf32>
    %306 = vector.shape_cast %303 : vector<32x128xf32> to vector<1x32x128xf32>
    tpu.vector_store %arg14[%c0_111, %c0_112, %c0_113], %306 {strides = array<i32>} : memref<1x32x128xf32, #tpu.memory_space<vmem>>, vector<1x32x128xf32>,
    return
  }
  func.func @transform_0(%arg0: i32, %arg1: i32) -> (i32, i32, i32) {
    %c0_i32 = arith.constant 0 : i32
    %c0_i32_0 = arith.constant 0 : i32
    return %arg0, %arg1, %c0_i32 : i32, i32, i32
  }
  func.func @transform_1(%arg0: i32, %arg1: i32) -> (i32, i32, i32) {
    %c0_i32 = arith.constant 0 : i32
    %c0_i32_0 = arith.constant 0 : i32
    return %arg0, %arg1, %c0_i32 : i32, i32, i32
  }
  func.func @transform_2(%arg0: i32, %arg1: i32) -> (i32, i32, i32, i32) {
    %c0_i32 = arith.constant 0 : i32
    %c0_i32_0 = arith.constant 0 : i32
    %c0_i32_1 = arith.constant 0 : i32
    %c0_i32_2 = arith.constant 0 : i32
    return %arg0, %c0_i32, %c0_i32_0, %c0_i32_1 : i32, i32, i32, i32
  }
  func.func @transform_3(%arg0: i32, %arg1: i32) -> (i32, i32, i32, i32) {
    %c0_i32 = arith.constant 0 : i32
    %c0_i32_0 = arith.constant 0 : i32
    %c0_i32_1 = arith.constant 0 : i32
    %c0_i32_2 = arith.constant 0 : i32
    return %arg0, %c0_i32, %c0_i32_0, %c0_i32_1 : i32, i32, i32, i32
  }
  func.func @transform_4(%arg0: i32, %arg1: i32) -> (i32, i32) {
    %c0_i32 = arith.constant 0 : i32
    %c0_i32_0 = arith.constant 0 : i32
    %c0_i32_1 = arith.constant 0 : i32
    return %c0_i32, %c0_i32_0 : i32, i32
  }
  func.func @transform_5(%arg0: i32, %arg1: i32) -> (i32, i32) {
    %c0_i32 = arith.constant 0 : i32
    %c0_i32_0 = arith.constant 0 : i32
    %c0_i32_1 = arith.constant 0 : i32
    return %c0_i32, %c0_i32_0 : i32, i32
  }
  func.func @transform_6(%arg0: i32, %arg1: i32) -> (i32, i32) {
    %c0_i32 = arith.constant 0 : i32
    %c0_i32_0 = arith.constant 0 : i32
    %c0_i32_1 = arith.constant 0 : i32
    return %c0_i32, %c0_i32_0 : i32, i32
  }
  func.func @transform_7(%arg0: i32, %arg1: i32) -> (i32, i32) {
    %c0_i32 = arith.constant 0 : i32
    %c0_i32_0 = arith.constant 0 : i32
    %c0_i32_1 = arith.constant 0 : i32
    return %c0_i32, %c0_i32_0 : i32, i32
  }
  func.func @transform_8(%arg0: i32, %arg1: i32) -> (i32, i32) {
    %c0_i32 = arith.constant 0 : i32
    %c0_i32_0 = arith.constant 0 : i32
    %c0_i32_1 = arith.constant 0 : i32
    return %c0_i32, %c0_i32_0 : i32, i32
  }
  func.func @transform_9(%arg0: i32, %arg1: i32) -> (i32, i32) {
    %c0_i32 = arith.constant 0 : i32
    %c0_i32_0 = arith.constant 0 : i32
    %c0_i32_1 = arith.constant 0 : i32
    return %c0_i32, %c0_i32_0 : i32, i32
  }
  func.func @transform_10(%arg0: i32, %arg1: i32) -> (i32, i32) {
    %c0_i32 = arith.constant 0 : i32
    %c0_i32_0 = arith.constant 0 : i32
    %c0_i32_1 = arith.constant 0 : i32
    return %c0_i32, %c0_i32_0 : i32, i32
  }
  func.func @transform_11(%arg0: i32, %arg1: i32) -> (i32, i32) {
    %c0_i32 = arith.constant 0 : i32
    %c0_i32_0 = arith.constant 0 : i32
    %c0_i32_1 = arith.constant 0 : i32
    return %c0_i32, %c0_i32_0 : i32, i32
  }
  func.func @transform_12(%arg0: i32, %arg1: i32) -> (i32, i32, i32) {
    %c0_i32 = arith.constant 0 : i32
    %c0_i32_0 = arith.constant 0 : i32
    return %arg0, %arg1, %c0_i32 : i32, i32, i32
  }
}

</mosaic_0001>

<bundles_post_ra>
// kernel: tpu_custom_call.1
= control target key start
LH: loop header
LB: loop body
LE: loop exit
PB: predicated region body
PF: predicated region fallthrough
CT: control target
= control target key end

     0   :  { %s7780_s0 = inlined_call_operand.hbm [shape: bf16[2,64,64], index: 0, kind: input, shape index: {}]   ;;  %s7781_s1 = inlined_call_operand.hbm [shape: bf16[2,64,128], index: 1, kind: input, shape index: {}]   ;;  %s7782_s2 = inlined_call_operand.hbm [shape: f32[2,2,8,128], index: 2, kind: input, shape index: {}]   ;;  %s7783_s3 = inlined_call_operand.hbm [shape: f32[2,2,8,128], index: 3, kind: input, shape index: {}]   ;;  %s7784_s4 = inlined_call_operand.hbm [shape: bf16[64,512], index: 4, kind: input, shape index: {}]   ;;  %s7785_s5 = inlined_call_operand.hbm [shape: bf16[128,512], index: 5, kind: input, shape index: {}]   ;;  %s7786_s6 = inlined_call_operand.hbm [shape: f32[1,512], index: 6, kind: input, shape index: {}]   ;;  %s7787_s7 = inlined_call_operand.hbm [shape: bf16[256,512], index: 7, kind: input, shape index: {}]   ;;  %s7788_s8 = inlined_call_operand.hbm [shape: f32[1,512], index: 8, kind: input, shape index: {}]   ;;  %s7789_s9 = inlined_call_operand.hbm [shape: bf16[128,128], index: 9, kind: input, shape index: {}]   ;;  %s7790_s10 = inlined_call_operand.hbm [shape: bf16[128,128], index: 10, kind: input, shape index: {}]   ;;  %s7791_s11 = inlined_call_operand.hbm [shape: f32[1,128], index: 11, kind: input, shape index: {}]   ;;  %s7792_s12 = inlined_call_operand.hbm [shape: f32[2,64,128], index: 12, kind: output, shape index: {}]  }
   0x1   :  { %7877 = sst [smem:[#allocation92_spill]] %s7780_s0 }
   0x2   :  { %7878 = sst [smem:[#allocation93_spill]] %s7781_s1 }
   0x3   :  { %7879 = sst [smem:[#allocation94_spill]] %s7782_s2 }
   0x4   :  { %7880 = sst [smem:[#allocation95_spill]] %s7783_s3 }
   0x5   :  { %7881 = sst [smem:[#allocation96_spill]] %s7784_s4 }
   0x6   :  { %7882 = sst [smem:[#allocation97_spill]] %s7785_s5 }
   0x7   :  { %7883 = sst [smem:[#allocation98_spill]] %s7786_s6 }
   0x8   :  { %7884 = sst [smem:[#allocation99_spill]] %s7787_s7 }
   0x9   :  { %7885 = sst [smem:[#allocation100_spill]] %s7789_s9 }
   0xa   :  { %7886 = sst [smem:[#allocation101_spill]] %s7791_s11 }
   0xb   :  { %7887 = sst [smem:[#allocation102_spill]] %s7792_s12 }
   0xc   :  { %17 = vsyncpa [#allocation7], 0 }
   0xd   :  { %19 = vsyncpa [#allocation7 + $0x1], 0 }
   0xe   :  { %20 = vsyncpa [#allocation10], 0 }
   0xf   :  { %22 = vsyncpa [#allocation10 + $0x1], 0 }
  0x10   :  { %23 = vsyncpa [#allocation13], 0 }
  0x11   :  { %25 = vsyncpa [#allocation13 + $0x1], 0 }
  0x12   :  { %26 = vsyncpa [#allocation16], 0 }
  0x13   :  { %27 = vsyncpa [#allocation19], 0 }
  0x14   :  { %28 = vsyncpa [#allocation22], 0 }
  0x15   :  { %29 = vsyncpa [#allocation25], 0 }
  0x16   :  { %30 = vsyncpa [#allocation8], 0 }
  0x17   :  { %32 = vsyncpa [#allocation8 + $0x1], 0  ;;  %s6354_s21 = smov 0   ;;  %s6356_s22 = smov 0  }
  0x18   :  { %s6358_s23 = smov 0   ;;  %s6360_s24 = smov 0  }
  0x19   :  { %s6362_s25 = smov 0   ;;  %s6364_s26 = smov 0  }
  0x1a   :  { %s6366_s27 = smov 0   ;;  %s6368_s28 = smov 0  }
  0x1b   :  { %s6370_s29 = smov 0   ;;  %s6372_s30 = smov 0  }
  0x1c   :  { %s6374_s13 = smov 0  }
  0x1d LB: > { %7888 = sst [smem:[#allocation37_spill]] %s6225_s21  ;;  %s6410_s14 = sadd.s32 4294967295, %s6265_s13   ;;  %s6265_s13 = sphi %s6374_s13, %s38_s13   ;;  %s6261_s30 = sphi %s6372_s30, %s8080_s30   ;;  %s6257_s29 = sphi %s6370_s29, %s8073_s29   ;;  %s6253_s28 = sphi %s6368_s28, %s8079_s28   ;;  %s6249_s27 = sphi %s6366_s27, %s8072_s27   ;;  %s6245_s26 = sphi %s6364_s26, %s8078_s26   ;;  %s6241_s25 = sphi %s6362_s25, %s8077_s25   ;;  %s6237_s24 = sphi %s6360_s24, %s8076_s24   ;;  %s6233_s23 = sphi %s6358_s23, %s8075_s23   ;;  %s6229_s22 = sphi %s6356_s22, %s8070_s22   ;;  %s6225_s21 = sphi %s6354_s21, %s8069_s21  }
  0x1e   : > { %7889 = sst [smem:[#allocation38_spill]] %s6229_s22  ;;  %p4543_p0 = scmp.ge.s32.totalorder %s6265_s13, 1 }
  0x1f   : > { %7890 = sst [smem:[#allocation39_spill]] %s6233_s23  ;;  %p7801_p1 = scmp.eq.s32.totalorder %s6410_s14, 0 }
  0x20   : > { %7891 = sst [smem:[#allocation40_spill]] %s6237_s24  ;;  %p359_p2 = scmp.lt.s32.totalorder %s6265_s13, 5 }
  0x21   : > { %7892 = sst [smem:[#allocation41_spill]] %s6249_s27  ;;  %s6267_s16 = smov [#allocation14]  }
  0x22   : > { %7893 = sst [smem:[#allocation42_spill]] %s6253_s28  ;;  %p6415_p3 = pnand %p4543_p0, %p359_p2 }
  0x23   : > { %7894 = sst [smem:[#allocation43_spill]] %s6257_s29  ;;  %s371_s17 = sshll.u32 %s6267_s16, 4  ;;  %s6419_s17 = int_to_ptr.vmem [resolvable:$true] %s371_s17 }
  0x24   : > { %s7895_s15 = scalar_select %p6415_p3, 1, 0 }
  0x25   : > { %p5113_p4 = pneg %p6415_p3  ;;  %s6268_s19 = smov [#allocation15]  }
  0x26   : > { %7896 = sst [smem:[#allocation44_spill]] %s7895_s15  ;;  %s384_s20 = sshll.u32 %s6268_s19, 4  ;;  %s6429_s20 = int_to_ptr.vmem [resolvable:$true] %s384_s20 }
  0x27   : > { %p6425_p5 = pnand %p5113_p4, %p7801_p1  ;;  %s6269_s12 = smov [#allocation18]  }
  0x28   : > { %s6431_s28 = sshll.u32 %s6269_s12, 4  ;;  %s7898_s4 = sld [smem:[#allocation96_spill]]  ;;  %s409_s28 = int_to_ptr.vmem [resolvable:$true] %s6431_s28 }
  0x29   : > { %s7897_s18 = scalar_select %p6425_p5, 1, 0 }
  0x2a   : > { %p6441_p7 = pneg %p6425_p5 }
  0x2e   : > { %s5767_s16 = scalar_lea.hbm %s7898_s4, 2048 }
  0x2f   : > { %p5768_p6 = scmp.ne.s32.totalorder %s7898_s4, %s5767_s16  ;;  %p5774_p10 = scmp.lt.u32.totalorder %s5767_s16, %s7898_s4 }
  0x31   : > { %p5770_p8 = pnand %p6441_p7, %p5768_p6 }
  0x33   : > { %p5771_p9 = pneg %p5770_p8 }
  0x35   : > { %p5776_p11 = pnand %p5774_p10, %p5771_p9 }
  0x37   : > { %5779 = shalt.err (!%p5776_p11)
}
  0x38   : > { %s5780_s2 = scalar_lea.vmem %s6419_s17, 2048  ;;  %p5788_p2 = scmp.lt.s32.totalorder %s6419_s17, %s6419_s17 }
  0x39   : > { %p5781_p12 = scmp.ne.s32.totalorder %s6419_s17, %s5780_s2  ;;  %p5789_p4 = scmp.lt.s32.totalorder %s5780_s2, %s5780_s2 }
  0x3b   : > { %p5783_p13 = pnand %p5781_p12, %p6441_p7  ;;  %p5790_p6 = por %p5789_p4, %p5788_p2 }
  0x3d   : > { %p5784_p0 = pneg %p5783_p13 }
  0x3f   : > { %p5791_p8 = pnand %p5790_p6, %p5784_p0 }
  0x41   : > { %5794 = shalt.err (!%p5791_p8)
}
  0x42   : > { %s6270_s3 = smov 256   ;;  %s6271_s27 = smov 16  }
  0x43   : > { %5116 = dma.hbm_to_vmem [thread:$0]  (!%p6425_p5), %s7898_s4, 2048, %s6419_s17, [#allocation13], %s6270_s3, %s6270_s3, %s6271_s27  }
  0x44   : > { %s7900_s5 = sld [smem:[#allocation97_spill]] }
  0x4a   : > { %s5795_s2 = scalar_lea.hbm %s7900_s5, 4096 }
  0x4b   : > { %p5796_p9 = scmp.ne.s32.totalorder %s7900_s5, %s5795_s2  ;;  %p5802_p12 = scmp.lt.u32.totalorder %s5795_s2, %s7900_s5 }
  0x4d   : > { %p5798_p10 = pnand %p5796_p9, %p6441_p7 }
  0x4f   : > { %p5799_p11 = pneg %p5798_p10 }
  0x51   : > { %p5804_p13 = pnand %p5802_p12, %p5799_p11 }
  0x53   : > { %5807 = shalt.err (!%p5804_p13)
}
  0x54   : > { %s5808_s17 = scalar_lea.vmem %s6429_s20, 4096  ;;  %p5816_p6 = scmp.lt.s32.totalorder %s6429_s20, %s6429_s20 }
  0x55   : > { %p5809_p0 = scmp.ne.s32.totalorder %s6429_s20, %s5808_s17  ;;  %p5817_p8 = scmp.lt.s32.totalorder %s5808_s17, %s5808_s17 }
  0x57   : > { %p5811_p2 = pnand %p5809_p0, %p6441_p7  ;;  %p5818_p9 = por %p5817_p8, %p5816_p6 }
  0x59   : > { %p5812_p4 = pneg %p5811_p2 }
  0x5b   : > { %p5819_p10 = pnand %p5818_p9, %p5812_p4 }
  0x5d   : > { %5822 = shalt.err (!%p5819_p10)
}
  0x5e   : > { %5119 = dma.hbm_to_vmem [thread:$0]  (!%p6425_p5), %s7900_s5, 4096, %s6429_s20, [#allocation16], %s6270_s3, %s6270_s3, %s6271_s27  }
  0x5f   : > { %s7901_s7 = sld [smem:[#allocation99_spill]] }
  0x65   : > { %s5823_s15 = scalar_lea.hbm %s7901_s7, 8192 }
  0x66   : > { %p5824_p11 = scmp.ne.s32.totalorder %s7901_s7, %s5823_s15  ;;  %p5830_p0 = scmp.lt.u32.totalorder %s5823_s15, %s7901_s7 }
  0x68   : > { %p5826_p12 = pnand %p5824_p11, %p6441_p7 }
  0x6a   : > { %p5827_p13 = pneg %p5826_p12 }
  0x6c   : > { %p5832_p2 = pnand %p5830_p0, %p5827_p13 }
  0x6e   : > { %5835 = shalt.err (!%p5832_p2)
}
  0x6f   : > { %s5836_s17 = scalar_lea.vmem %s409_s28, 8192  ;;  %p5844_p9 = scmp.lt.s32.totalorder %s409_s28, %s409_s28 }
  0x70   : > { %p5837_p4 = scmp.ne.s32.totalorder %s409_s28, %s5836_s17  ;;  %p5845_p10 = scmp.lt.s32.totalorder %s5836_s17, %s5836_s17 }
  0x72   : > { %p5839_p6 = pnand %p5837_p4, %p6441_p7  ;;  %p5846_p1 = por %p5845_p10, %p5844_p9 }
  0x74   : > { %p5840_p8 = pneg %p5839_p6 }
  0x76   : > { %p5847_p3 = pnand %p5846_p1, %p5840_p8 }
  0x78   : > { %5850 = shalt.err (!%p5847_p3)
}
  0x79   : > { %5125 = dma.hbm_to_vmem [thread:$0]  (!%p6425_p5), %s7901_s7, 8192, %s409_s28, [#allocation19], %s6270_s3, %s6270_s3, %s6271_s27  }
  0x7a   : > { %s6272_s11 = smov [#allocation21]   ;;  %s7902_s9 = sld [smem:[#allocation100_spill]] }
  0x7b   : > { %s432_s22 = sshll.u32 %s6272_s11, 4  ;;  %s433_s22 = int_to_ptr.vmem [resolvable:$true] %s432_s22 }
  0x80   : > { %s5851_s16 = scalar_lea.hbm %s7902_s9, 1024 }
  0x81   : > { %p5852_p1 = scmp.ne.s32.totalorder %s7902_s9, %s5851_s16  ;;  %p5858_p12 = scmp.lt.u32.totalorder %s5851_s16, %s7902_s9 }
  0x83   : > { %p5854_p3 = pnand %p5852_p1, %p6441_p7 }
  0x85   : > { %p5855_p11 = pneg %p5854_p3 }
  0x87   : > { %p5860_p13 = pnand %p5858_p12, %p5855_p11 }
  0x89   : > { %5863 = shalt.err (!%p5860_p13)
}
  0x8a   : > { %s5864_s28 = scalar_lea.vmem %s433_s22, 1024  ;;  %p5872_p6 = scmp.lt.s32.totalorder %s433_s22, %s433_s22 }
  0x8b   : > { %p5865_p0 = scmp.ne.s32.totalorder %s433_s22, %s5864_s28  ;;  %p5873_p8 = scmp.lt.s32.totalorder %s5864_s28, %s5864_s28 }
  0x8d   : > { %p5867_p2 = pnand %p5865_p0, %p6441_p7  ;;  %p5874_p9 = por %p5873_p8, %p5872_p6 }
  0x8f   : > { %p5868_p4 = pneg %p5867_p2 }
  0x91   : > { %p5875_p10 = pnand %p5874_p9, %p5868_p4 }
  0x93   : > { %5878 = shalt.err (!%p5875_p10)
}
  0x94   : > { %s7803_s3 = smov 64   ;;  %s7805_s27 = smov 4  }
  0x95   : > { %5131 = dma.hbm_to_vmem [thread:$0]  (!%p6425_p5), %s7902_s9, 1024, %s433_s22, [#allocation22], %s7803_s3, %s7803_s3, %s7805_s27  }
  0x96   : > { %s4542_s11 = sadd.s32 4294967294, %s6265_s13   ;;  %s47_s23 = sadd.s32 1, %s6257_s29 }
  0x97   : > { %p48_p1 = scmp.ge.s32.totalorder %s47_s23, 2  ;;  %s50_s15 = sadd.s32 1, %s6261_s30 }
  0x98   : > { %s59_s16 = sadd.s32 1, %s6245_s26  ;;  %p66_p3 = scmp.ne.s32.totalorder %s6245_s26, %s6241_s25 }
  0x99   : > { %s8082_s23 = smov (%p48_p1, %s47_s23), 0  ;;  %s8084_s15 = smov (!%p48_p1, %s50_s15), %s6261_s30 }
  0x9a   : > { %7903 = sst [smem:[#allocation45_spill]] %s8082_s23  ;;  %s55_s19 = ssub.s32 %s6257_s29, %s8082_s23 }
  0x9b   : > { %p7813_p11 = scmp.eq.s32.totalorder %s6265_s13, 0  ;;  %p52_p12 = scmp.ge.s32.totalorder %s8084_s15, 2 }
  0x9c   : > { %p72_p13 = scmp.ne.s32.totalorder %s6241_s25, %s6237_s24  ;;  %p346_p2 = scmp.eq.s32.totalorder %s6410_s14, 3 }
  0x9d   : > { %p6550_p0 = por %p7813_p11, %p66_p3  ;;  %s8086_s15 = smov (%p52_p12, %s8084_s15), 0 }
  0x9e   : > { %7905 = sst [smem:[#allocation46_spill]] %s8086_s15  ;;  %p7906_p4 = scmp.eq.s32.totalorder %s6410_s14, 0 }
  0x9f   : > { %p6563_p8 = por %p346_p2, %p66_p3  ;;  %s6569_s17 = ssub.s32 %s6261_s30, %s8086_s15 }
  0xa0   : > { %p6559_p6 = por %p7906_p4, %p72_p13  ;;  %p352_p9 = scmp.eq.s32.totalorder %s4542_s11, 3 }
  0xa1   : > { %s7908_s2 = scalar_select %p6563_p8, 1, 0 }
  0xa2   : > { %s7907_s12 = scalar_select %p6559_p6, 1, 0 }
  0xa3   : > { %s56_s28 = sor.u32 %s55_s19, %s6569_s17  ;;  %p6573_p12 = por %p352_p9, %p72_p13 }
  0xa4   : > { %p57_p1 = scmp.eq.s32.totalorder %s56_s28, 0  ;;  %p7812_p4 = scmp.lt.s32.totalorder %s6265_s13, 4 }
  0xa5   : > { %s7909_s20 = scalar_select %p6573_p12, 1, 0 }
  0xa6   : > { %s7807_s0 = sand.u32 1, %s6245_s26   ;;  %s4554_s4 = sshll.u32 %s6257_s29, 2 }
  0xa7   : > { %7910 = sst [smem:[#allocation47_spill]] %s7909_s20  ;;  %s6584_s27 = sshll.u32 %s7807_s0, 4 }
  0xa8   : > { %s6580_s3 = scalar_select %p57_p1, %s6245_s26, %s59_s16  }
  0xa9   : > { %s4555_s5 = sshll.u32 %s6261_s30, 3  ;;  %p6592_p3 = pnand %p7812_p4, %p6550_p0 }
  0xaa   : > { %7911 = sst [smem:[#allocation48_spill]] %s6580_s3  ;;  %s6596_s19 = sadd.s32 %s4555_s5, %s4554_s4 }
  0xab   : > { %s7912_s11 = scalar_select %p6592_p3, 1, 0 }
  0xac   : > { %s7818_s16 = sand.u32 1, %s6265_s13   ;;  %s7809_s28 = sshll.u32 %s6596_s19, 6 }
  0xad   : > { %s7913_s1 = sld [smem:[#allocation93_spill]]  ;;  %s497_s22 = scalar_lea.vmem [#allocation9], %s6584_s27 }
  0xae   : > { %s506_s15 = sshll.u32 %s497_s22, 4  ;;  %s6612_s4 = scalar_lea.sflag [#allocation10], %s7818_s16  ;;  %s6608_s15 = int_to_ptr.vmem [resolvable:$true] %s506_s15 }
  0xaf   : > { %p7821_p0 = pneg %p6592_p3 }
  0xb3   : > { %s6605_s9 = scalar_lea.hbm %s7913_s1, %s7809_s28  ;;  %s5884_s28 = scalar_lea.hbm %s7913_s1, 1024 }
  0xb4   : > { %s5879_s5 = scalar_lea.hbm %s6605_s9, 256  ;;  %p5885_p1 = scmp.lt.u32.totalorder %s6605_s9, %s7913_s1 }
  0xb5   : > { %p5880_p13 = scmp.ne.s32.totalorder %s6605_s9, %s5879_s5  ;;  %p5886_p4 = scmp.lt.u32.totalorder %s5884_s28, %s5879_s5 }
  0xb6   : > { %p5888_p10 = scmp.lt.u32.totalorder %s5879_s5, %s6605_s9 }
  0xb7   : > { %p5882_p2 = pnand %p7821_p0, %p5880_p13  ;;  %p5887_p11 = por %p5886_p4, %p5885_p1 }
  0xb9   : > { %p5883_p9 = pneg %p5882_p2  ;;  %p5889_p12 = por %p5888_p10, %p5887_p11 }
  0xbb   : > { %p5890_p8 = pnand %p5889_p12, %p5883_p9 }
  0xbd   : > { %5893 = shalt.err (!%p5890_p8)
}
  0xbe   : > { %s5894_s22 = scalar_lea.vmem %s6608_s15, 256  ;;  %s6275_s7 = smov [#allocation9]  }
  0xbf   : > { %p5895_p13 = scmp.ne.s32.totalorder %s6608_s15, %s5894_s22  ;;  %s5899_s0 = sshll.u32 %s6275_s7, 4  ;;  %s5900_s0 = int_to_ptr.vmem [resolvable:$false] %s5899_s0 }
  0xc0   : > { %s5901_s29 = scalar_lea.vmem %s5900_s0, 512  ;;  %p5902_p5 = scmp.lt.s32.totalorder %s6608_s15, %s5900_s0 }
  0xc1   : > { %p5897_p2 = pnand %p5895_p13, %p7821_p0  ;;  %p5903_p4 = scmp.lt.s32.totalorder %s5901_s29, %s5894_s22 }
  0xc3   : > { %p5898_p6 = pneg %p5897_p2  ;;  %p5904_p1 = por %p5903_p4, %p5902_p5 }
  0xc5   : > { %p5905_p11 = pnand %p5904_p1, %p5898_p6 }
  0xc7   : > { %5908 = shalt.err (!%p5905_p11)
}
  0xc8   : > { %s7914_s23 = smov 4   ;;  %s7915_s28 = smov 64  }
  0xc9   : > { %5144 = dma.hbm_to_vmem [thread:$0]  (!%p6592_p3), %s6605_s9, 256, %s6608_s15, %s6612_s4, %s7915_s28, %s7915_s28, %s7914_s23  }
  0xca   : > { %s6276_s5 = smov [#allocation17]   ;;  %s6277_s7 = smov [#allocation20]  }
  0xcb   : > { %s398_s16 = sshll.u32 %s6276_s5, 4  ;;  %s422_s1 = sshll.u32 %s6277_s7, 4  ;;  %s399_s16 = int_to_ptr.vmem [resolvable:$true] %s398_s16  ;;  %s6643_s1 = int_to_ptr.vmem [resolvable:$true] %s422_s1 }
  0xcc   : > { %s7916_s6 = sld [smem:[#allocation98_spill]] }
  0xd2   : > { %s5909_s29 = scalar_lea.hbm %s7916_s6, 64 }
  0xd3   : > { %p5910_p5 = scmp.ne.s32.totalorder %s7916_s6, %s5909_s29  ;;  %p5916_p10 = scmp.lt.u32.totalorder %s5909_s29, %s7916_s6 }
  0xd5   : > { %p5912_p6 = pnand %p5910_p5, %p6441_p7 }
  0xd7   : > { %p5913_p8 = pneg %p5912_p6 }
  0xd9   : > { %p5918_p12 = pnand %p5916_p10, %p5913_p8 }
  0xdb   : > { %5921 = shalt.err (!%p5918_p12)
}
  0xdc   : > { %s5922_s15 = scalar_lea.vmem %s399_s16, 64  ;;  %p5930_p4 = scmp.lt.s32.totalorder %s399_s16, %s399_s16 }
  0xdd   : > { %p5923_p9 = scmp.ne.s32.totalorder %s399_s16, %s5922_s15  ;;  %p5931_p1 = scmp.lt.s32.totalorder %s5922_s15, %s5922_s15 }
  0xdf   : > { %p5925_p13 = pnand %p5923_p9, %p6441_p7  ;;  %p5932_p11 = por %p5931_p1, %p5930_p4 }
  0xe1   : > { %p5926_p2 = pneg %p5925_p13 }
  0xe3   : > { %p5933_p0 = pnand %p5932_p11, %p5926_p2 }
  0xe5   : > { %5936 = shalt.err (!%p5933_p0)
}
  0xe6   : > { %p7917_p5 = scmp.ne.s32.totalorder %s7897_s18, 0  ;;  %s5937_s7 = scalar_lea.hbm %s7788_s8, 64 }
  0xe7   : > { %p5938_p6 = scmp.ne.s32.totalorder %s7788_s8, %s5937_s7  ;;  %p5944_p0 = scmp.lt.u32.totalorder %s5937_s7, %s7788_s8 }
  0xe8   : > { %5122 = dma.hbm_to_vmem [thread:$0]  (!%p7917_p5), %s7916_s6, 64, %s399_s16, [#allocation16]  }
  0xe9   : > { %p5940_p8 = pnand %p5938_p6, %p6441_p7 }
  0xeb   : > { %p5941_p10 = pneg %p5940_p8 }
  0xed   : > { %p5946_p12 = pnand %p5944_p0, %p5941_p10 }
  0xef   : > { %5949 = shalt.err (!%p5946_p12)
}
  0xf0   : > { %s5950_s16 = scalar_lea.vmem %s6643_s1, 64  ;;  %p5958_p4 = scmp.lt.s32.totalorder %s6643_s1, %s6643_s1 }
  0xf1   : > { %p5951_p9 = scmp.ne.s32.totalorder %s6643_s1, %s5950_s16  ;;  %p5959_p1 = scmp.lt.s32.totalorder %s5950_s16, %s5950_s16 }
  0xf3   : > { %p5953_p13 = pnand %p5951_p9, %p6441_p7  ;;  %p5960_p11 = por %p5959_p1, %p5958_p4 }
  0xf5   : > { %p5954_p2 = pneg %p5953_p13 }
  0xf7   : > { %p5961_p6 = pnand %p5960_p11, %p5954_p2 }
  0xf9   : > { %5964 = shalt.err (!%p5961_p6)
}
  0xfa   : > { %5128 = dma.hbm_to_vmem [thread:$0]  (!%p7917_p5), %s7788_s8, 64, %s6643_s1, [#allocation19]  }
  0xfb   : > { %s6278_s20 = smov [#allocation23]   ;;  %s6279_s5 = smov [#allocation24]  }
  0xfc   : > { %s445_s24 = sshll.u32 %s6278_s20, 4  ;;  %s459_s7 = sshll.u32 %s6279_s5, 4  ;;  %s446_s24 = int_to_ptr.vmem [resolvable:$true] %s445_s24  ;;  %s6686_s7 = int_to_ptr.vmem [resolvable:$true] %s459_s7 }
  0xfd   : > { %s5965_s29 = scalar_lea.hbm %s7790_s10, 1024 }
  0xfe   : > { %p5966_p8 = scmp.ne.s32.totalorder %s7790_s10, %s5965_s29  ;;  %p5972_p12 = scmp.lt.u32.totalorder %s5965_s29, %s7790_s10 }
 0x100   : > { %p5968_p10 = pnand %p5966_p8, %p6441_p7 }
 0x102   : > { %p5969_p0 = pneg %p5968_p10 }
 0x104   : > { %p5974_p9 = pnand %p5972_p12, %p5969_p0 }
 0x106   : > { %5977 = shalt.err (!%p5974_p9)
}
 0x107   : > { %s5978_s3 = scalar_lea.vmem %s446_s24, 1024  ;;  %p5986_p1 = scmp.lt.s32.totalorder %s446_s24, %s446_s24 }
 0x108   : > { %p5979_p13 = scmp.ne.s32.totalorder %s446_s24, %s5978_s3  ;;  %p5987_p11 = scmp.lt.s32.totalorder %s5978_s3, %s5978_s3 }
 0x10a   : > { %p5981_p2 = pnand %p5979_p13, %p6441_p7  ;;  %p5988_p6 = por %p5987_p11, %p5986_p1 }
 0x10c   : > { %p5982_p4 = pneg %p5981_p2 }
 0x10e   : > { %p5989_p3 = pnand %p5988_p6, %p5982_p4 }
 0x110   : > { %5992 = shalt.err (!%p5989_p3)
}
 0x111   : > { %5134 = dma.hbm_to_vmem [thread:$0]  (!%p7917_p5), %s7790_s10, 1024, %s446_s24, [#allocation22], %s7915_s28, %s7915_s28, %s7914_s23  }
 0x112   : > { %s7918_s29 = sld [smem:[#allocation101_spill]] }
 0x118   : > { %s7919_s9 = smov %s7918_s29  ;;  %s5993_s16 = scalar_lea.hbm %s7918_s29, 16 }
 0x119   : > { %p5994_p8 = scmp.ne.s32.totalorder %s7919_s9, %s5993_s16  ;;  %p6000_p0 = scmp.lt.u32.totalorder %s5993_s16, %s7919_s9 }
 0x11b   : > { %p5996_p3 = pnand %p5994_p8, %p6441_p7 }
 0x11d   : > { %p5997_p10 = pneg %p5996_p3 }
 0x11f   : > { %p6002_p12 = pnand %p6000_p0, %p5997_p10 }
 0x121   : > { %6005 = shalt.err (!%p6002_p12)
}
 0x122   : > { %s6006_s24 = scalar_lea.vmem %s6686_s7, 16  ;;  %s6013_s20 = scalar_lea.vmem %s6686_s7, 32 }
 0x123   : > { %p6007_p9 = scmp.ne.s32.totalorder %s6686_s7, %s6006_s24  ;;  %p6014_p4 = scmp.lt.s32.totalorder %s6686_s7, %s6686_s7 }
 0x124   : > { %p6015_p1 = scmp.lt.s32.totalorder %s6013_s20, %s6006_s24 }
 0x125   : > { %p6009_p13 = pnand %p6007_p9, %p6441_p7 }
 0x126   : > { %p6016_p11 = por %p6015_p1, %p6014_p4 }
 0x127   : > { %p6010_p2 = pneg %p6009_p13 }
 0x129   : > { %p6017_p6 = pnand %p6016_p11, %p6010_p2 }
 0x12b   : > { %6020 = shalt.err (!%p6017_p6)
}
 0x12c   : > { %5137 = dma.hbm_to_vmem [thread:$0]  (!%p7917_p5), %s7919_s9, 16, %s6686_s7, [#allocation25]  }
 0x12d   : > { %s7920_s21 = sshll.u32 %s6596_s19, 6  ;;  %s7921_s29 = sld [smem:[#allocation92_spill]] }
 0x12e   : > { %s474_s18 = scalar_lea.vmem [#allocation6], %s6584_s27  ;;  %s7923_s3 = sand.u32 1, %s6245_s26  }
 0x12f   : > { %s483_s1 = sshll.u32 %s474_s18, 4  ;;  %s6745_s24 = scalar_lea.sflag [#allocation7], %s7923_s3  ;;  %s6741_s1 = int_to_ptr.vmem [resolvable:$true] %s483_s1 }
 0x130   : > { %p7924_p5 = scmp.ne.s32.totalorder %s7912_s11, 0 }
 0x132   : > { %p7925_p8 = pneg %p7924_p5 }
 0x133   : > { %s7922_s16 = smov %s7921_s29  ;;  %s6738_s15 = scalar_lea.hbm %s7921_s29, %s7920_s21 }
 0x134   : > { %s6021_s20 = scalar_lea.hbm %s6738_s15, 256  ;;  %s6026_s6 = scalar_lea.hbm %s7922_s16, 1024 }
 0x135   : > { %p6022_p7 = scmp.ne.s32.totalorder %s6738_s15, %s6021_s20  ;;  %p6027_p0 = scmp.lt.u32.totalorder %s6738_s15, %s7922_s16 }
 0x136   : > { %p6028_p12 = scmp.lt.u32.totalorder %s6026_s6, %s6021_s20  ;;  %p6030_p13 = scmp.lt.u32.totalorder %s6021_s20, %s6738_s15 }
 0x137   : > { %p6024_p3 = pnand %p6022_p7, %p7925_p8 }
 0x138   : > { %p6029_p9 = por %p6028_p12, %p6027_p0 }
 0x139   : > { %p6025_p10 = pneg %p6024_p3 }
 0x13a   : > { %p6031_p2 = por %p6030_p13, %p6029_p9 }
 0x13c   : > { %p6032_p4 = pnand %p6031_p2, %p6025_p10 }
 0x13e   : > { %6035 = shalt.err (!%p6032_p4)
}
 0x13f   : > { %s6036_s27 = scalar_lea.vmem %s6741_s1, 256  ;;  %p7926_p11 = pmov %p7925_p8 }
 0x140   : > { %p6037_p1 = scmp.ne.s32.totalorder %s6741_s1, %s6036_s27  ;;  %s6280_s22 = smov [#allocation6]  }
 0x141   : > { %s6041_s0 = sshll.u32 %s6280_s22, 4  ;;  %s6042_s0 = int_to_ptr.vmem [resolvable:$false] %s6041_s0 }
 0x142   : > { %p6039_p6 = pnand %p6037_p1, %p7926_p11  ;;  %s6043_s29 = scalar_lea.vmem %s6042_s0, 512 }
 0x143   : > { %p6044_p8 = scmp.lt.s32.totalorder %s6741_s1, %s6042_s0  ;;  %p6045_p3 = scmp.lt.s32.totalorder %s6043_s29, %s6036_s27 }
 0x144   : > { %p6040_p7 = pneg %p6039_p6 }
 0x145   : > { %p6046_p0 = por %p6045_p3, %p6044_p8 }
 0x147   : > { %p6047_p12 = pnand %p6046_p0, %p6040_p7 }
 0x149   : > { %6050 = shalt.err (!%p6047_p12)
}
 0x14a   : > { %s7927_s18 = sld [smem:[#allocation39_spill]]  ;;  %s7928_s3 = sld [smem:[#allocation38_spill]] }
 0x14b   : > { %s7929_s20 = sld [smem:[#allocation37_spill]]  ;;  %p7930_p10 = scmp.eq.s32.totalorder %s6569_s17, 0 }
 0x14c   : > { %5141 = dma.hbm_to_vmem [thread:$0]  (!%p7924_p5), %s6738_s15, 256, %s6741_s1, %s6745_s24, %s7915_s28, %s7915_s28, %s7914_s23  }
 0x14d   : > { %s5005_s6 = sshll.u32 %s6261_s30, 8  ;;  %p7931_p2 = scmp.eq.s32.totalorder %s6265_s13, 0 }
 0x14e   : > { %p7932_p1 = scmp.eq.s32.totalorder %s6410_s14, 0  ;;  %s7934_s28 = sld [smem:[#allocation94_spill]] }
 0x14f   : > { %p7936_p5 = scmp.lt.s32.totalorder %s6265_s13, 4 }
 0x150   : > { %s113_s11 = sadd.s32 1, %s7927_s18  ;;  %p120_p9 = scmp.ne.s32.totalorder %s7927_s18, %s7928_s3 }
 0x151   : > { %s6778_s19 = scalar_select %p7930_p10, %s7927_s18, %s113_s11  }
 0x152   : > { %p126_p13 = scmp.ne.s32.totalorder %s7928_s3, %s7929_s20  ;;  %s518_s7 = sand.u32 1, %s7927_s18  }
 0x153   : > { %p122_p4 = por %p120_p9, %p7931_p2  ;;  %s6794_s21 = sshll.u32 %s518_s7, 4 }
 0x154   : > { %p6790_p11 = por %p126_p13, %p7932_p1  ;;  %s7935_s15 = smov %s7934_s28 }
 0x155   : > { %s6801_s17 = scalar_lea.hbm %s7934_s28, %s5005_s6  ;;  %p6805_p6 = pnand %p7936_p5, %p122_p4 }
 0x156   : > { %s520_s24 = scalar_lea.vmem [#allocation11], %s6794_s21  ;;  %s6051_s0 = scalar_lea.hbm %s6801_s17, 256 }
 0x157   : > { %s527_s22 = sshll.u32 %s520_s24, 4  ;;  %p6052_p7 = scmp.ne.s32.totalorder %s6801_s17, %s6051_s0  ;;  %s6810_s22 = int_to_ptr.vmem [resolvable:$true] %s527_s22 }
 0x158   : > { %p6053_p8 = pneg %p6805_p6  ;;  %s6056_s3 = scalar_lea.hbm %s7935_s15, 512 }
 0x159   : > { %p6057_p12 = scmp.lt.u32.totalorder %s6801_s17, %s7935_s15  ;;  %p6058_p10 = scmp.lt.u32.totalorder %s6056_s3, %s6051_s0 }
 0x15a   : > { %p6054_p3 = pnand %p6053_p8, %p6052_p7  ;;  %p6060_p13 = scmp.lt.u32.totalorder %s6051_s0, %s6801_s17 }
 0x15b   : > { %p6059_p9 = por %p6058_p10, %p6057_p12 }
 0x15c   : > { %p6055_p0 = pneg %p6054_p3 }
 0x15d   : > { %p6061_p2 = por %p6060_p13, %p6059_p9 }
 0x15f   : > { %p6062_p4 = pnand %p6061_p2, %p6055_p0 }
 0x161   : > { %6065 = shalt.err (!%p6062_p4)
}
 0x162   : > { %s6066_s7 = scalar_lea.vmem %s6810_s22, 256  ;;  %s6281_s27 = smov [#allocation11]  }
 0x163   : > { %p6067_p1 = scmp.ne.s32.totalorder %s6810_s22, %s6066_s7  ;;  %s6071_s23 = sshll.u32 %s6281_s27, 4  ;;  %s6072_s23 = int_to_ptr.vmem [resolvable:$false] %s6071_s23 }
 0x164   : > { %s6073_s28 = scalar_lea.vmem %s6072_s23, 512  ;;  %p6074_p3 = scmp.lt.s32.totalorder %s6810_s22, %s6072_s23 }
 0x165   : > { %p6069_p5 = pnand %p6067_p1, %p6053_p8  ;;  %p6075_p12 = scmp.lt.s32.totalorder %s6073_s28, %s6066_s7 }
 0x167   : > { %p6070_p7 = pneg %p6069_p5  ;;  %p6076_p10 = por %p6075_p12, %p6074_p3 }
 0x169   : > { %p6077_p9 = pnand %p6076_p10, %p6070_p7 }
 0x16b   : > { %6080 = shalt.err (!%p6077_p9)
}
 0x16c   : > { %s6282_s24 = smov 128   ;;  %s6283_s0 = smov 8  }
 0x16d   : > { %5147 = dma.hbm_to_vmem [thread:$0]  (!%p6805_p6), %s6801_s17, 256, %s6810_s22, %s6612_s4, %s6282_s24, %s6282_s24, %s6283_s0  }
 0x16e   : > { %s7938_s3 = sld [smem:[#allocation95_spill]]  ;;  %s541_s11 = scalar_lea.vmem [#allocation12], %s6794_s21 }
 0x16f   : > { %s548_s7 = sshll.u32 %s541_s11, 4  ;;  %s7939_s27 = sand.u32 1, %s6265_s13   ;;  %s6849_s7 = int_to_ptr.vmem [resolvable:$true] %s548_s7 }
 0x170   : > { %s6853_s23 = scalar_lea.sflag [#allocation13], %s7939_s27 }
 0x174   : > { %s6846_s20 = scalar_lea.hbm %s7938_s3, %s5005_s6  ;;  %s6086_s17 = scalar_lea.hbm %s7938_s3, 512 }
 0x175   : > { %s6081_s28 = scalar_lea.hbm %s6846_s20, 256  ;;  %p6087_p4 = scmp.lt.u32.totalorder %s6846_s20, %s7938_s3 }
 0x176   : > { %p6082_p0 = scmp.ne.s32.totalorder %s6846_s20, %s6081_s28  ;;  %p6088_p1 = scmp.lt.u32.totalorder %s6086_s17, %s6081_s28 }
 0x177   : > { %p6090_p7 = scmp.lt.u32.totalorder %s6081_s28, %s6846_s20 }
 0x178   : > { %p6084_p13 = pnand %p6082_p0, %p6053_p8  ;;  %p6089_p5 = por %p6088_p1, %p6087_p4 }
 0x17a   : > { %p6085_p2 = pneg %p6084_p13  ;;  %p6091_p3 = por %p6090_p7, %p6089_p5 }
 0x17c   : > { %p6092_p12 = pnand %p6091_p3, %p6085_p2 }
 0x17e   : > { %6095 = shalt.err (!%p6092_p12)
}
 0x17f   : > { %s6096_s21 = scalar_lea.vmem %s6849_s7, 256  ;;  %s6284_s18 = smov [#allocation12]  }
 0x180   : > { %p6097_p10 = scmp.ne.s32.totalorder %s6849_s7, %s6096_s21  ;;  %s6101_s11 = sshll.u32 %s6284_s18, 4  ;;  %s6102_s11 = int_to_ptr.vmem [resolvable:$false] %s6101_s11 }
 0x181   : > { %s6103_s27 = scalar_lea.vmem %s6102_s11, 512  ;;  %p6104_p13 = scmp.lt.s32.totalorder %s6849_s7, %s6102_s11 }
 0x182   : > { %p6099_p9 = pnand %p6097_p10, %p6053_p8  ;;  %p6105_p4 = scmp.lt.s32.totalorder %s6103_s27, %s6096_s21 }
 0x184   : > { %p6100_p0 = pneg %p6099_p9  ;;  %p6106_p1 = por %p6105_p4, %p6104_p13 }
 0x186   : > { %p6107_p5 = pnand %p6106_p1, %p6100_p0 }
 0x188   : > { %6110 = shalt.err (!%p6107_p5)
}
 0x189   : > { %5150 = dma.hbm_to_vmem [thread:$0]  (!%p6805_p6), %s6846_s20, 256, %s6849_s7, %s6853_s23, %s6282_s24, %s6282_s24, %s6283_s0  }
 0x18a   : > { %s7940_s28 = sld [smem:[#allocation44_spill]] }
 0x190   : > { %p7941_p8 = scmp.ne.s32.totalorder %s7940_s28, 0 }
 0x192   : > { %560 = sbr.rel (%p7941_p8) target bundleno = 2449 (0x991), region = 68 }
 0x199   : > { %s6885_s4 = sand.u32 1, %s6241_s25   ;;  %p7942_p2 = scmp.ne.s32.totalorder %s7907_s12, 0 }
 0x19a   : > { %s4568_s6 = sshll.u32 %s6885_s4, 4  ;;  %s563_s17 = scalar_lea.sflag [#allocation7], %s6885_s4 }
 0x19b   : > { %s6889_s22 = scalar_lea.vmem [#allocation6], %s4568_s6 }
 0x19c   : > { %6184 = dma.done.wait (%p7942_p2), %s563_s17, 256  }
 0x19d   : > { %6186 = vsyncadd (%p7942_p2), %s563_s17, 4294967040  ;;  %s571_s1 = sand.u32 1, %s6410_s14   ;;  %s6896_s0 = scalar_lea.vmem [#allocation9], %s4568_s6 }
 0x19e   : > { %s572_s24 = scalar_lea.sflag [#allocation10], %s571_s1 }
 0x19f   : > { %6188 = dma.done.wait (%p7942_p2), %s572_s24, 256  }
 0x1a0   : > { %6190 = vsyncadd (%p7942_p2), %s572_s24, 4294967040  ;;  %s7943_s20 = sld [smem:[#allocation38_spill]] }
 0x1a6   : > { %s582_s7 = sand.u32 1, %s7943_s20  }
 0x1a7   : > { %s4570_s23 = sshll.u32 %s582_s7, 4 }
 0x1a8   : > { %s584_s29 = scalar_lea.vmem [#allocation11], %s4570_s23 }
 0x1a9   : > { %6192 = dma.done.wait (%p6790_p11), %s572_s24, 256  }
 0x1aa   : > { %6194 = vsyncadd (%p6790_p11), %s572_s24, 4294967040  ;;  %s590_s21 = scalar_lea.sflag [#allocation13], %s571_s1  ;;  %s593_s18 = scalar_lea.vmem [#allocation12], %s4570_s23 }
 0x1ab   : > { %6196 = dma.done.wait (%p6790_p11), %s590_s21, 256  }
 0x1ac   : > { %6198 = vsyncadd (%p6790_p11), %s590_s21, 4294967040  ;;  %p7944_p6 = scmp.eq.s32.totalorder %s6410_s14, 0 }
 0x1ae   : > { %6200 = dma.done.wait (%p7944_p6), [#allocation13], 2048   ;;  %p7945_p7 = pmov %p7944_p6 }
 0x1af   : > { %p7946_p3 = pmov %p7944_p6 }
 0x1b0   : > { %6202 = vsyncadd (%p7945_p7), [#allocation13], 4294965248 }
 0x1b1   : > { %6204 = dma.done.wait (%p7946_p3), [#allocation16], 4160   ;;  %p7947_p12 = pmov %p7946_p3 }
 0x1b2   : > { %p7948_p10 = pmov %p7946_p3 }
 0x1b3   : > { %6206 = vsyncadd (%p7947_p12), [#allocation16], 4294963136 }
 0x1b4   : > { %6208 = dma.done.wait (%p7948_p10), [#allocation19], 8256   ;;  %p7949_p9 = pmov %p7946_p3 }
 0x1b5   : > { %p7950_p11 = pmov %p7946_p3 }
 0x1b6   : > { %6210 = vsyncadd (%p7949_p9), [#allocation19], 4294959040 }
 0x1b7   : > { %6212 = dma.done.wait (%p7950_p11), [#allocation22], 2048   ;;  %p7951_p0 = pmov %p7946_p3 }
 0x1b9   : > { %6214 = vsyncadd (%p7951_p0), [#allocation22], 4294965248  ;;  %p7952_p13 = pmov %p7951_p0 }
 0x1ba   : > { %p7953_p4 = pmov %p7951_p0 }
 0x1bb   : > { %6216 = dma.done.wait (%p7952_p13), [#allocation25], 16  }
 0x1bc   : > { %6218 = vsyncadd (%p7953_p4), [#allocation25], 4294967280  ;;  %s4580_s12 = sshll.u32 %s6885_s4, 5  ;;  %s7954_s11 = sld [smem:[#allocation41_spill]] }
 0x1bd   : > { %s6932_s5 = scalar_lea.vmem [#allocation26], %s4580_s12 }
 0x1c2   : > { %p4581_p1 = scmp.ne.s32.totalorder %s7954_s11, 0 }
 0x1c3   : > { %v689_v0 = vld [vmem:[%s584_s29] sm:$0xff] (!%p4581_p1)  ;;  %v690_v1 = vld [vmem:[%s584_s29 + $0x8] sm:$0xff] (!%p4581_p1) }
 0x1c4   : > { %688 = sbr.rel (%p4581_p1) target bundleno = 459 (0x1cb), region = 120  ;;  %v693_v2 = vld [vmem:[%s593_s18] sm:$0xff] (!%p4581_p1)  ;;  %691 = vst [vmem:[#allocation4] sm:$0xff] (!%p4581_p1), %v689_v0  ;;  %692 = vst [vmem:[#allocation4 + $0x8] sm:$0xff] (!%p4581_p1), %v690_v1  ;;  %v694_v3 = vld [vmem:[%s593_s18 + $0x8] sm:$0xff] (!%p4581_p1) }
 0x1c5   : > { %695 = vst [vmem:[#allocation5] sm:$0xff] (!%p4581_p1), %v693_v2  ;;  %696 = vst [vmem:[#allocation5 + $0x8] sm:$0xff] (!%p4581_p1), %v694_v3 }
 0x1cb PF: > { %v5278_v4 = vld [vmem:[#allocation14 + $0xc] ss:$16 sps:$4 sm:$0xff]   ;;  %v5280_v5 = vld [vmem:[#allocation14 + $0x8] ss:$16 sps:$4 sm:$0xff]   ;;  %v7828_v6 = vmov 0   ;;  %v5290_v16 = vld [vmem:[%s6889_s22] sm:$0xff]   ;;  %v719_v59 = vlaneseq }
 0x1cc   : > { %921 = vmatprep.mubr.bf16.mxu1 %v7828_v6  ;;  %868 = vmatprep.mubr.bf16.mxu0 %v7828_v6  ;;  %v5281_v7 = vld [vmem:[#allocation14 + $0x2c] ss:$16 sps:$4 sm:$0xff]   ;;  %v5283_v8 = vld [vmem:[#allocation14 + $0x28] ss:$16 sps:$4 sm:$0xff]   ;;  %v5293_v13 = vld [vmem:[#allocation15 + $0x4] ss:$16 sps:$4 sm:$0xff]  }
 0x1cd   : > { %889 = vmatprep.subr.bf16.mxu1 %v5278_v4  ;;  %v5284_v9 = vld [vmem:[#allocation14 + $0x4c] ss:$16 sps:$4 sm:$0xff]   ;;  %v5286_v10 = vld [vmem:[#allocation14 + $0x48] ss:$16 sps:$4 sm:$0xff]   ;;  %v5303_v14 = vld [vmem:[#allocation14 + $0x4] ss:$16 sps:$4 sm:$0xff]  }
 0x1ce   : > { %890 = vmatpush1.bf16.msra.mxu1 %v5280_v5  ;;  %v5287_v11 = vld [vmem:[#allocation14 + $0x6c] ss:$16 sps:$4 sm:$0xff]   ;;  %v5289_v12 = vld [vmem:[#allocation14 + $0x68] ss:$16 sps:$4 sm:$0xff]   ;;  %v5305_v15 = vld [vmem:[#allocation14] ss:$16 sps:$4 sm:$0xff]   ;;  %836 = vmatprep.subr.bf16.mxu0 %v5303_v14 }
 0x1cf   : > { %891 = vmatprep.subr.bf16.mxu1 %v5281_v7  ;;  %v5291_v17 = vld [vmem:[#allocation15] ss:$16 sps:$4 sm:$0xff]   ;;  %vm829_vm0 = vcmask 523264   ;;  %837 = vmatpush1.bf16.msra.mxu0 %v5305_v15  ;;  %v5309_v18 = vld [vmem:[#allocation14 + $0x24] ss:$16 sps:$4 sm:$0xff]   ;;  %v5317_v26 = vld [vmem:[%s6889_s22 + $0x8] sm:$0xff]  }
 0x1d0   : > { %v5311_v19 = vld [vmem:[#allocation14 + $0x20] ss:$16 sps:$4 sm:$0xff]   ;;  %v5296_v20 = vld [vmem:[#allocation15 + $0x24] ss:$16 sps:$4 sm:$0xff]   ;;  %838 = vmatprep.subr.bf16.mxu0 %v5309_v18  ;;  %v6953_v40 = vld [vmem:[#allocation15 + $0xc] ss:$16 sps:$4 sm:$0xff]  }
 0x1d1   : > { %v5315_v21 = vld [vmem:[#allocation14 + $0x44] ss:$16 sps:$4 sm:$0xff]   ;;  %v5294_v22 = vld [vmem:[#allocation15 + $0x20] ss:$16 sps:$4 sm:$0xff]   ;;  %v6957_v41 = vld [vmem:[#allocation15 + $0x8] ss:$16 sps:$4 sm:$0xff]  }
 0x1d2   : > { %892 = vmatpush1.bf16.msra.mxu1 %v5283_v8  ;;  %v5318_v23 = vld [vmem:[#allocation14 + $0x40] ss:$16 sps:$4 sm:$0xff]   ;;  %v5299_v24 = vld [vmem:[#allocation15 + $0x44] ss:$16 sps:$4 sm:$0xff]   ;;  %v6959_v43 = vld [vmem:[#allocation15 + $0x2c] ss:$16 sps:$4 sm:$0xff]  }
 0x1d3   : > { %893 = vmatprep.subr.bf16.mxu1 %v5284_v9  ;;  %839 = vmatpush1.bf16.msra.mxu0 %v5311_v19  ;;  %v5322_v25 = vld [vmem:[#allocation14 + $0x64] ss:$16 sps:$4 sm:$0xff]   ;;  %v5297_v27 = vld [vmem:[#allocation15 + $0x40] ss:$16 sps:$4 sm:$0xff]   ;;  %v6963_v44 = vld [vmem:[#allocation15 + $0x28] ss:$16 sps:$4 sm:$0xff]  }
 0x1d4   : > { %840 = vmatprep.subr.bf16.mxu0 %v5315_v21  ;;  %v5324_v28 = vld [vmem:[#allocation14 + $0x60] ss:$16 sps:$4 sm:$0xff]   ;;  %v5302_v29 = vld [vmem:[#allocation15 + $0x64] ss:$16 sps:$4 sm:$0xff]   ;;  %v6965_v45 = vld [vmem:[#allocation15 + $0x4c] ss:$16 sps:$4 sm:$0xff]  }
 0x1d5   : > { %v5300_v30 = vld [vmem:[#allocation15 + $0x60] ss:$16 sps:$4 sm:$0xff]   ;;  %v5308_v31 = vld [vmem:[#allocation15 + $0x84] ss:$16 sps:$4 sm:$0xff]   ;;  %v6970_v46 = vld [vmem:[#allocation15 + $0x48] ss:$16 sps:$4 sm:$0xff]  }
 0x1d6   : > { %894 = vmatpush1.bf16.msra.mxu1 %v5286_v10  ;;  %v5306_v32 = vld [vmem:[#allocation15 + $0x80] ss:$16 sps:$4 sm:$0xff]   ;;  %v5314_v33 = vld [vmem:[#allocation15 + $0xa4] ss:$16 sps:$4 sm:$0xff]   ;;  %v6972_v47 = vld [vmem:[#allocation15 + $0x6c] ss:$16 sps:$4 sm:$0xff]  }
 0x1d7   : > { %895 = vmatprep.subr.bf16.mxu1 %v5287_v11  ;;  %841 = vmatpush1.bf16.msra.mxu0 %v5318_v23  ;;  %v5312_v34 = vld [vmem:[#allocation15 + $0xa0] ss:$16 sps:$4 sm:$0xff]   ;;  %v5321_v35 = vld [vmem:[#allocation15 + $0xc4] ss:$16 sps:$4 sm:$0xff]   ;;  %v6977_v48 = vld [vmem:[#allocation15 + $0x68] ss:$16 sps:$4 sm:$0xff]  }
 0x1d8   : > { %842 = vmatprep.subr.bf16.mxu0 %v5322_v25  ;;  %v6945_v36 = vld [vmem:[#allocation15 + $0xc0] ss:$16 sps:$4 sm:$0xff]   ;;  %v6947_v37 = vld [vmem:[#allocation15 + $0xe4] ss:$16 sps:$4 sm:$0xff]   ;;  %v6980_v49 = vld [vmem:[#allocation15 + $0x8c] ss:$16 sps:$4 sm:$0xff]  }
 0x1d9   : > { %v6950_v38 = vld [vmem:[#allocation15 + $0xe0] ss:$16 sps:$4 sm:$0xff]   ;;  %v6985_v50 = vld [vmem:[#allocation15 + $0x88] ss:$16 sps:$4 sm:$0xff]   ;;  %v6987_v51 = vld [vmem:[#allocation15 + $0xac] ss:$16 sps:$4 sm:$0xff]  }
 0x1da   : > { %896 = vmatpush1.bf16.msra.mxu1 %v5289_v12  ;;  %v958_v39 = vld [vmem:[#allocation4] sm:$0xff]  ;;  %v6991_v52 = vld [vmem:[#allocation15 + $0xa8] ss:$16 sps:$4 sm:$0xff]   ;;  %v6993_v53 = vld [vmem:[#allocation15 + $0xcc] ss:$16 sps:$4 sm:$0xff]   ;;  %v7031_v60 = vshrl.u32 %v719_v59, 7 }
 0x1db   : > { %1183 = vmatprep.subr.bf16.mxu1 %v5293_v13  ;;  %843 = vmatpush1.bf16.msra.mxu0 %v5324_v28  ;;  %v986_v42 = vpack.c.bf16 %v958_v39, %v958_v39  ;;  %v6997_v54 = vld [vmem:[#allocation15 + $0xc8] ss:$16 sps:$4 sm:$0xff]   ;;  %v6999_v55 = vld [vmem:[#allocation15 + $0xec] ss:$16 sps:$4 sm:$0xff]   ;;  %v7027_v58 = vld [vmem:[#allocation18 + $0xc] ss:$16 sps:$4 sm:$0xff]  }
 0x1dc   : > { %1294 = vmatprep.subr.bf16.mxu0 %v5293_v13  ;;  %v7003_v56 = vld [vmem:[#allocation15 + $0xe8] ss:$16 sps:$4 sm:$0xff]   ;;  %v7824_v61 = vsub.s32 2, %v7031_v60  ;;  %v717_v62 = vld [vmem:[#allocation17] sm:$0xf]  ;;  %v7825_v63 = vsub.s32 3, %v7031_v60 }
 0x1dd   : > { %4602 = vmatmul.mubr.msk.bf16.vlgmr.msra.gmra.mrb[0].mxu1 %vm829_vm0, %v5290_v16  ;;  %v7025_v57 = vld [vmem:[#allocation18 + $0x4] ss:$16 sps:$4 sm:$0xff]   ;;  %v7827_v12 = vsub.s32 0, %v7031_v60  ;;  %v7826_v15 = vsub.s32 1, %v7031_v60  ;;  %s8062_s14 = sld [smem:[#allocation41_spill]]  ;;  %s8063_s27 = sld [smem:[#allocation42_spill]] }
 0x1de   : > { %1184 = vmatpush1.bf16.msra.mxu1 %v5291_v17  ;;  %931 = vmatprep.mubr.bf16.mxu1 %v7828_v6  ;;  %v730_v0 = vrot.slane %v717_v62, %v7824_v61  ;;  %v734_v3 = vrot.slane %v717_v62, %v7825_v63  ;;  %v7142_v61 = vld [vmem:[#allocation18 + $0xcc] ss:$16 sps:$4 sm:$0xff]   ;;  %v7146_v63 = vld [vmem:[#allocation18 + $0xc0] ss:$16 sps:$4 sm:$0xff]   ;;  %s4306_s1 = sshll.u32 %s6932_s5, 4  ;;  %s8064_s20 = sld [smem:[#allocation102_spill]]  ;;  %s7716_s1 = int_to_ptr.vmem [resolvable:$true] %s4306_s1 }
 0x1df   : > { %1185 = vmatprep.subr.bf16.mxu1 %v5296_v20  ;;  %4600 = vmatmul.mubr.msk.bf16.vlgmr.msra.gmra.mrb[0].mxu0 %vm829_vm0, %v5290_v16  ;;  %s4291_s23 = scalar_lea.sflag [#allocation8], %s6885_s4  ;;  %s6111_s29 = scalar_lea.vmem %s7716_s1, 512 }
 0x1e0   : > { %1295 = vmatpush1.bf16.msra.mxu0 %v5291_v17  ;;  %878 = vmatprep.mubr.bf16.mxu0 %v7828_v6  ;;  %p6112_p5 = scmp.ne.s32.totalorder %s7716_s1, %s6111_s29  ;;  %p8065_p8 = scmp.ne.s32.totalorder %s7908_s2, 0 }
 0x1e1   : > { %1296 = vmatprep.subr.bf16.mxu0 %v5296_v20  ;;  %v722_v20 = vrot.slane %v717_v62, %v7827_v12  ;;  %v7152_v12 = vld [vmem:[#allocation18 + $0xe4] ss:$16 sps:$4 sm:$0xff]   ;;  %s6286_s21 = smov [#allocation26]  }
 0x1e2   : > { %1186 = vmatpush1.bf16.msra.mxu1 %v5294_v22  ;;  %p6113_p2 = pnand %p6112_p5, %p8065_p8  ;;  %s6115_s18 = sshll.u32 %s6286_s21, 4  ;;  %s6116_s18 = int_to_ptr.vmem [resolvable:$false] %s6115_s18 }
 0x1e3   : > { %1187 = vmatprep.subr.bf16.mxu1 %v5299_v24  ;;  %s5000_s28 = sshll.u32 %s8062_s14, 2  ;;  %s5001_s6 = sshll.u32 %s8063_s27, 3 }
 0x1e4   : > { %1297 = vmatpush1.bf16.msra.mxu0 %v5294_v22  ;;  %v726_v22 = vrot.slane %v717_v62, %v7826_v15  ;;  %v7148_v15 = vld [vmem:[#allocation18 + $0xc8] ss:$16 sps:$4 sm:$0xff]   ;;  %s4303_s17 = sadd.s32 %s5001_s6, %s5000_s28  ;;  %p6114_p6 = pneg %p6113_p2 }
 0x1e5   : > { %4603 = vmatmul.mubr.msk.bf16.gmra.mrb[4].mxu1 %vm829_vm0, %v5317_v26  ;;  %1298 = vmatprep.subr.bf16.mxu0 %v5299_v24  ;;  %s5002_s22 = sshll.u32 %s4303_s17, 7  ;;  %s6117_s12 = scalar_lea.vmem %s6116_s18, 1024 }
 0x1e6   : > { %1188 = vmatpush1.bf16.msra.mxu1 %v5297_v27  ;;  %1215 = vmatprep.mubr.bf16.mxu1 %v7828_v6  ;;  %s7714_s7 = scalar_lea.hbm %s8064_s20, %s5002_s22  ;;  %p6118_p7 = scmp.lt.s32.totalorder %s7716_s1, %s6116_s18 }
 0x1e7   : > { %1189 = vmatprep.subr.bf16.mxu1 %v5302_v29  ;;  %4601 = vmatmul.mubr.msk.bf16.gmra.mrb[4].mxu0 %vm829_vm0, %v5317_v26  ;;  %p6119_p3 = scmp.lt.s32.totalorder %s6117_s12, %s6111_s29 }
 0x1e8   : > { %1299 = vmatpush1.bf16.msra.mxu0 %v5297_v27  ;;  %1326 = vmatprep.mubr.bf16.mxu0 %v7828_v6 }
 0x1e9   : > { %1300 = vmatprep.subr.bf16.mxu0 %v5302_v29  ;;  %p6120_p12 = por %p6119_p3, %p6118_p7 }
 0x1ea   : > { %1190 = vmatpush1.bf16.msra.mxu1 %v5300_v30 }
 0x1eb   : > { %1191 = vmatprep.subr.bf16.mxu1 %v5308_v31  ;;  %p6121_p10 = pnand %p6120_p12, %p6114_p6 }
 0x1ec   : > { %1301 = vmatpush1.bf16.msra.mxu0 %v5300_v30 }
 0x1ed   : > { %1302 = vmatprep.subr.bf16.mxu0 %v5308_v31 }
 0x1ee   : > { %1192 = vmatpush1.bf16.msra.mxu1 %v5306_v32 }
 0x1ef   : > { %1193 = vmatprep.subr.bf16.mxu1 %v5314_v33 }
 0x1f0   : > { %1303 = vmatpush1.bf16.msra.mxu0 %v5306_v32 }
 0x1f1   : > { %1304 = vmatprep.subr.bf16.mxu0 %v5314_v33 }
 0x1f2   : > { %1194 = vmatpush1.bf16.msra.mxu1 %v5312_v34 }
 0x1f3   : > { %1195 = vmatprep.subr.bf16.mxu1 %v5321_v35 }
 0x1f4   : > { %1305 = vmatpush1.bf16.msra.mxu0 %v5312_v34 }
 0x1f5   : > { %1306 = vmatprep.subr.bf16.mxu0 %v5321_v35 }
 0x1f6   : > { %1196 = vmatpush1.bf16.msra.mxu1 %v6945_v36 }
 0x1f7   : > { %1197 = vmatprep.subr.bf16.mxu1 %v6947_v37 }
 0x1f8   : > { %1307 = vmatpush1.bf16.msra.mxu0 %v6945_v36 }
 0x1f9   : > { %1308 = vmatprep.subr.bf16.mxu0 %v6947_v37 }
 0x1fa   : > { %1198 = vmatpush1.bf16.msra.mxu1 %v6950_v38 }
 0x1fb   : > { %1224 = vmatprep.subr.bf16.mxu1 %v6953_v40 }
 0x1fc   : > { %1309 = vmatpush1.bf16.msra.mxu0 %v6950_v38 }
 0x1fd   : > { %1216 = vmatmul.mubr.bf16.vlgmr.msra.gmra.mrb[8].mxu1 %v986_v42  ;;  %1785 = vmatprep.subr.bf16.mxu0 %v7025_v57 }
 0x1fe   : > { %1225 = vmatpush1.bf16.msra.mxu1 %v6957_v41  ;;  %1256 = vmatprep.mubr.bf16.mxu1 %v7828_v6 }
 0x1ff   : > { %1226 = vmatprep.subr.bf16.mxu1 %v6959_v43 }
 0x202   : > { %1227 = vmatpush1.bf16.msra.mxu1 %v6963_v44 }
 0x203   : > { %1228 = vmatprep.subr.bf16.mxu1 %v6965_v45 }
 0x206   : > { %1229 = vmatpush1.bf16.msra.mxu1 %v6970_v46 }
 0x207   : > { %1230 = vmatprep.subr.bf16.mxu1 %v6972_v47 }
 0x20a   : > { %1231 = vmatpush1.bf16.msra.mxu1 %v6977_v48 }
 0x20b   : > { %1232 = vmatprep.subr.bf16.mxu1 %v6980_v49 }
 0x20e   : > { %1233 = vmatpush1.bf16.msra.mxu1 %v6985_v50 }
 0x20f   : > { %1234 = vmatprep.subr.bf16.mxu1 %v6987_v51 }
 0x212   : > { %1235 = vmatpush1.bf16.msra.mxu1 %v6991_v52 }
 0x213   : > { %1236 = vmatprep.subr.bf16.mxu1 %v6993_v53 }
 0x216   : > { %1237 = vmatpush1.bf16.msra.mxu1 %v6997_v54 }
 0x217   : > { %1238 = vmatprep.subr.bf16.mxu1 %v6999_v55 }
 0x21a   : > { %1239 = vmatpush1.bf16.msra.mxu1 %v7003_v56 }
 0x21b   : > { %1335 = vmatprep.subr.bf16.mxu1 %v6953_v40 }
 0x21d   : > { %1257 = vmatmul.mubr.bf16.vlgmr.msra.gmra.mrb[12].mxu1 %v986_v42 }
 0x21e   : > { %1336 = vmatpush1.bf16.msra.mxu1 %v6957_v41  ;;  %1367 = vmatprep.mubr.bf16.mxu1 %v7828_v6  ;;  %v7154_v6 = vld [vmem:[#allocation18 + $0xec] ss:$16 sps:$4 sm:$0xff]  }
 0x21f   : > { %1337 = vmatprep.subr.bf16.mxu1 %v6959_v43  ;;  %7963 = vst [vmem:[#allocation57_spill] sm:$0xff] %v7154_v6 }
 0x222   : > { %1338 = vmatpush1.bf16.msra.mxu1 %v6963_v44 }
 0x223   : > { %1339 = vmatprep.subr.bf16.mxu1 %v6965_v45 }
 0x226   : > { %1340 = vmatpush1.bf16.msra.mxu1 %v6970_v46 }
 0x227   : > { %1341 = vmatprep.subr.bf16.mxu1 %v6972_v47 }
 0x22a   : > { %1342 = vmatpush1.bf16.msra.mxu1 %v6977_v48 }
 0x22b   : > { %1343 = vmatprep.subr.bf16.mxu1 %v6980_v49 }
 0x22e   : > { %1344 = vmatpush1.bf16.msra.mxu1 %v6985_v50 }
 0x22f   : > { %1345 = vmatprep.subr.bf16.mxu1 %v6987_v51 }
 0x232   : > { %1346 = vmatpush1.bf16.msra.mxu1 %v6991_v52 }
 0x233   : > { %1347 = vmatprep.subr.bf16.mxu1 %v6993_v53 }
 0x236   : > { %1348 = vmatpush1.bf16.msra.mxu1 %v6997_v54 }
 0x237   : > { %1349 = vmatprep.subr.bf16.mxu1 %v6999_v55 }
 0x23a   : > { %1350 = vmatpush1.bf16.msra.mxu1 %v7003_v56 }
 0x23b   : > { %1826 = vmatprep.subr.bf16.mxu1 %v7027_v58 }
 0x2b0   : > { %v923_v1 = vpop.f32.mrb[0].mxu1 }
 0x2b1   : > { %v925_v2 = vpop.f32.mrb[1].mxu1 }
 0x2b2   : > { %v927_v4 = vpop.f32.mrb[2].mxu1  ;;  %v870_v19 = vpop.f32.mrb[0].mxu0 }
 0x2b3   : > { %v7039_v5 = vadd.f32 %v927_v4, %v730_v0  ;;  %v929_v7 = vpop.f32.mrb[3].mxu1  ;;  %v872_v21 = vpop.f32.mrb[1].mxu0  ;;  %v871_v27 = vadd.f32 %v870_v19, %v722_v20 }
 0x2b4   : > { %v7041_v8 = vadd.f32 %v929_v7, %v734_v3  ;;  %v874_v23 = vpop.f32.mrb[2].mxu0  ;;  %v873_v28 = vadd.f32 %v872_v21, %v726_v22 }
 0x2b5   : > { %v7057_v24 = vadd.f32 %v874_v23, %v722_v20  ;;  %v876_v25 = vpop.f32.mrb[3].mxu0 }
 0x2b6   : > { %v7059_v26 = vadd.f32 %v876_v25, %v726_v22  ;;  %v924_v25 = vadd.f32 %v923_v1, %v730_v0 }
 0x2b8   : > { %v933_v9 = vpop.f32.mrb[4].mxu1 }
 0x2b9   : > { %v7043_v10 = vadd.f32 %v933_v9, %v730_v0  ;;  %v935_v11 = vpop.f32.mrb[5].mxu1 }
 0x2ba   : > { %v7046_v13 = vadd.f32 %v935_v11, %v734_v3  ;;  %v937_v14 = vpop.f32.mrb[6].mxu1  ;;  %v880_v34 = vpop.f32.mrb[4].mxu0 }
 0x2bb   : > { %7955 = vst [vmem:[#allocation49_spill] sm:$0xff] %v7043_v10  ;;  %v7049_v16 = vadd.f32 %v937_v14, %v730_v0  ;;  %v939_v17 = vpop.f32.mrb[7].mxu1  ;;  %v7061_v39 = vadd.f32 %v880_v34, %v722_v20  ;;  %v882_v42 = vpop.f32.mrb[5].mxu0  ;;  %v7176_v10 = vld [vmem:[#allocation18 + $0x124] ss:$16 sps:$4 sm:$0xff]  }
 0x2bc   : > { %7956 = vst [vmem:[#allocation50_spill] sm:$0xff] %v7046_v13  ;;  %v7051_v18 = vadd.f32 %v939_v17, %v734_v3  ;;  %v7063_v59 = vadd.f32 %v882_v42, %v726_v22  ;;  %v884_v62 = vpop.f32.mrb[6].mxu0  ;;  %v7170_v13 = vld [vmem:[#allocation18 + $0x100] ss:$16 sps:$4 sm:$0xff]   ;;  %7970 = vst [vmem:[#allocation64_spill] sm:$0xff] %v7176_v10 }
 0x2bd   : > { %7957 = vst [vmem:[#allocation51_spill] sm:$0xff] %v7049_v16  ;;  %7959 = vst [vmem:[#allocation53_spill] sm:$0xff] %v7061_v39  ;;  %v7065_v4 = vadd.f32 %v884_v62, %v722_v20  ;;  %v886_v7 = vpop.f32.mrb[7].mxu0  ;;  %v7164_v16 = vld [vmem:[#allocation18 + $0x104] ss:$16 sps:$4 sm:$0xff]  }
 0x2be   : > { %7958 = vst [vmem:[#allocation52_spill] sm:$0xff] %v7051_v18  ;;  %7960 = vst [vmem:[#allocation54_spill] sm:$0xff] %v7063_v59  ;;  %v7067_v9 = vadd.f32 %v886_v7, %v726_v22  ;;  %v7158_v18 = vld [vmem:[#allocation18 + $0xe0] ss:$16 sps:$4 sm:$0xff]   ;;  %v7172_v59 = vld [vmem:[#allocation18 + $0x108] ss:$16 sps:$4 sm:$0xff]  }
 0x2bf   : > { %7961 = vst [vmem:[#allocation55_spill] sm:$0xff] %v7065_v4  ;;  %7964 = vst [vmem:[#allocation58_spill] sm:$0xff] %v7158_v18  ;;  %v7166_v4 = vld [vmem:[#allocation18 + $0x10c] ss:$16 sps:$4 sm:$0xff]  }
 0x2c0   : > { %7962 = vst [vmem:[#allocation56_spill] sm:$0xff] %v7067_v9  ;;  %v7160_v9 = vld [vmem:[#allocation18 + $0xe8] ss:$16 sps:$4 sm:$0xff]   ;;  %7966 = vst [vmem:[#allocation60_spill] sm:$0xff] %v7164_v16  ;;  %v7178_v39 = vld [vmem:[#allocation18 + $0x12c] ss:$16 sps:$4 sm:$0xff]  }
 0x2c1   : > { %7965 = vst [vmem:[#allocation59_spill] sm:$0xff] %v7160_v9  ;;  %7967 = vst [vmem:[#allocation61_spill] sm:$0xff] %v7166_v4 }
 0x2c2   : > { %7968 = vst [vmem:[#allocation62_spill] sm:$0xff] %v7170_v13  ;;  %7969 = vst [vmem:[#allocation63_spill] sm:$0xff] %v7172_v59 }
 0x2c3   : > { %7971 = vst [vmem:[#allocation65_spill] sm:$0xff] %v7178_v39 }
 0x2d0   : > { %v1217_v29 = vpop.f32.mrb[8].mxu1 }
 0x2d1   : > { %v1218_v30 = vadd.f32 %v1217_v29, %v871_v27  ;;  %v1219_v31 = vpop.f32.mrb[9].mxu1  ;;  %v926_v27 = vadd.f32 %v925_v2, %v734_v3 }
 0x2d2   : > { %v1220_v32 = vadd.f32 %v1219_v31, %v873_v28  ;;  %v1221_v33 = vpop.f32.mrb[10].mxu1 }
 0x2d3   : > { %v1222_v35 = vpop.f32.mrb[11].mxu1  ;;  %v4636_v14 = vmul.f32 -1.442695, %v1218_v30 }
 0x2d4   : > { %v4637_v11 = vmul.f32 -1.442695, %v1220_v32  ;;  %v959_v32 = vld [vmem:[#allocation5] sm:$0xff] }
 0x2d6   : > { %5610 = vpow2.f32 %v4637_v11 }
 0x2d7   : > { %5612 = vpow2.f32 %v4636_v14 }
 0x2e0   : > { %v5611_v17 = vpop.eup %5610 }
 0x2e1   : > { %v5613_v19 = vpop.eup %5612  ;;  %v1274_v21 = vadd.f32 1.0, %v5611_v17  ;;  %v961_v17 = vld [vmem:[#allocation4 + $0x8] sm:$0xff] }
 0x2e2   : > { %v1268_v23 = vadd.f32 1.0, %v5613_v19  ;;  %v7072_v19 = vld [vmem:[#allocation18] ss:$16 sps:$4 sm:$0xff]  }
 0x2e3   : > { %5614 = vrcp.f32 %v1274_v21  ;;  %v7074_v21 = vld [vmem:[#allocation18 + $0x8] ss:$16 sps:$4 sm:$0xff]  }
 0x2e4   : > { %5616 = vrcp.f32 %v1268_v23 }
 0x2ed   : > { %v5615_v30 = vpop.eup %5614 }
 0x2ee   : > { %v5617_v35 = vpop.eup %5616  ;;  %v1284_v62 = vmul.f32 %v5615_v30, %v959_v32  ;;  %v7104_v30 = vld [vmem:[#allocation18 + $0x64] ss:$16 sps:$4 sm:$0xff]   ;;  %v7106_v32 = vld [vmem:[#allocation18 + $0x6c] ss:$16 sps:$4 sm:$0xff]  }
 0x2f0   : > { %v1258_v28 = vpop.f32.mrb[12].mxu1 }
 0x2f1   : > { %v1259_v29 = vadd.f32 %v1258_v28, %v924_v25  ;;  %v1260_v31 = vpop.f32.mrb[13].mxu1  ;;  %v7078_v25 = vld [vmem:[#allocation18 + $0x24] ss:$16 sps:$4 sm:$0xff]   ;;  %v1400_v28 = vpack.c.bf16 %v961_v17, %v961_v17  ;;  %v7136_v17 = vld [vmem:[#allocation18 + $0xa8] ss:$16 sps:$4 sm:$0xff]  }
 0x2f2   : > { %v1261_v20 = vadd.f32 %v1260_v31, %v926_v27  ;;  %v1262_v33 = vpop.f32.mrb[14].mxu1  ;;  %v7080_v27 = vld [vmem:[#allocation18 + $0x2c] ss:$16 sps:$4 sm:$0xff]   ;;  %v7088_v31 = vld [vmem:[#allocation18 + $0x28] ss:$16 sps:$4 sm:$0xff]  }
 0x2f3   : > { %5618 = vtanh.f32 %v1259_v29  ;;  %v1263_v22 = vpop.f32.mrb[15].mxu1  ;;  %v7086_v29 = vld [vmem:[#allocation18 + $0x20] ss:$16 sps:$4 sm:$0xff]   ;;  %v7094_v33 = vld [vmem:[#allocation18 + $0x4c] ss:$16 sps:$4 sm:$0xff]  }
 0x2f4   : > { %v4638_v34 = vmul.f32 -1.442695, %v1261_v20  ;;  %v7092_v20 = vld [vmem:[#allocation18 + $0x44] ss:$16 sps:$4 sm:$0xff]   ;;  %v7098_v22 = vld [vmem:[#allocation18 + $0x40] ss:$16 sps:$4 sm:$0xff]  }
 0x2f6   : > { %5620 = vpow2.f32 %v4638_v34  ;;  %v7100_v34 = vld [vmem:[#allocation18 + $0x48] ss:$16 sps:$4 sm:$0xff]  }
 0x2fd   : > { %v5619_v42 = vpop.eup %5618 }
 0x2fe   : > { %v1285_v7 = vmul.f32 %v5619_v42, %v5617_v35  ;;  %v7110_v35 = vld [vmem:[#allocation18 + $0x60] ss:$16 sps:$4 sm:$0xff]   ;;  %v7112_v42 = vld [vmem:[#allocation18 + $0x68] ss:$16 sps:$4 sm:$0xff]  }
 0x300   : > { %v5621_v11 = vpop.eup %5620  ;;  %v7069_v0 = vadd.f32 %v1285_v7, %v1284_v62  ;;  %v7116_v62 = vld [vmem:[#allocation18 + $0x84] ss:$16 sps:$4 sm:$0xff]   ;;  %v7118_v7 = vld [vmem:[#allocation18 + $0x8c] ss:$16 sps:$4 sm:$0xff]  }
 0x301   : > { %v1281_v1 = vadd.f32 1.0, %v5621_v11  ;;  %v7122_v11 = vld [vmem:[#allocation18 + $0x80] ss:$16 sps:$4 sm:$0xff]  }
 0x302   : > { %5622 = vtanh.f32 %v7069_v0 }
 0x303   : > { %5624 = vrcp.f32 %v1281_v1  ;;  %v7124_v1 = vld [vmem:[#allocation18 + $0x88] ss:$16 sps:$4 sm:$0xff]  }
 0x30c   : > { %v5623_v2 = vpop.eup %5622 }
 0x30d   : > { %v5625_v3 = vpop.eup %5624 }
 0x30e   : > { %v1288_v14 = vmul.f32 %v5625_v3, %v5623_v2  ;;  %v7128_v2 = vld [vmem:[#allocation18 + $0xa4] ss:$16 sps:$4 sm:$0xff]   ;;  %v7130_v3 = vld [vmem:[#allocation18 + $0xac] ss:$16 sps:$4 sm:$0xff]  }
 0x310   : > { %v7076_v23 = vpack.c.bf16 %v1288_v14, %v1288_v14  ;;  %v7134_v14 = vld [vmem:[#allocation18 + $0xa0] ss:$16 sps:$4 sm:$0xff]  }
 0x312   : > { %1327 = vmatmul.mubr.bf16.vlgmr.msra.gmra.mrb[8].mxu0 %v7076_v23  ;;  %1368 = vmatmul.mubr.bf16.vlgmr.msra.gmra.mrb[16].mxu1 %v7076_v23 }
 0x313   : > { %1786 = vmatpush1.bf16.msra.mxu0 %v7072_v19  ;;  %1827 = vmatpush1.bf16.msra.mxu1 %v7074_v21 }
 0x314   : > { %1787 = vmatprep.subr.bf16.mxu0 %v7078_v25  ;;  %1828 = vmatprep.subr.bf16.mxu1 %v7080_v27 }
 0x315   : > { %1817 = vmatprep.mubr.bf16.mxu0 %v1400_v28  ;;  %1858 = vmatprep.mubr.bf16.mxu1 %v1400_v28  ;;  %v7140_v28 = vld [vmem:[#allocation18 + $0xc4] ss:$16 sps:$4 sm:$0xff]  }
 0x317   : > { %1788 = vmatpush1.bf16.msra.mxu0 %v7086_v29  ;;  %1829 = vmatpush1.bf16.msra.mxu1 %v7088_v31 }
 0x318   : > { %1789 = vmatprep.subr.bf16.mxu0 %v7092_v20  ;;  %1830 = vmatprep.subr.bf16.mxu1 %v7094_v33 }
 0x31b   : > { %1790 = vmatpush1.bf16.msra.mxu0 %v7098_v22  ;;  %1831 = vmatpush1.bf16.msra.mxu1 %v7100_v34 }
 0x31c   : > { %1791 = vmatprep.subr.bf16.mxu0 %v7104_v30  ;;  %1832 = vmatprep.subr.bf16.mxu1 %v7106_v32 }
 0x31f   : > { %1792 = vmatpush1.bf16.msra.mxu0 %v7110_v35  ;;  %1833 = vmatpush1.bf16.msra.mxu1 %v7112_v42 }
 0x320   : > { %1793 = vmatprep.subr.bf16.mxu0 %v7116_v62  ;;  %1834 = vmatprep.subr.bf16.mxu1 %v7118_v7 }
 0x323   : > { %1794 = vmatpush1.bf16.msra.mxu0 %v7122_v11  ;;  %1835 = vmatpush1.bf16.msra.mxu1 %v7124_v1 }
 0x324   : > { %1795 = vmatprep.subr.bf16.mxu0 %v7128_v2  ;;  %1836 = vmatprep.subr.bf16.mxu1 %v7130_v3 }
 0x327   : > { %1796 = vmatpush1.bf16.msra.mxu0 %v7134_v14  ;;  %1837 = vmatpush1.bf16.msra.mxu1 %v7136_v17 }
 0x328   : > { %1797 = vmatprep.subr.bf16.mxu0 %v7140_v28  ;;  %1838 = vmatprep.subr.bf16.mxu1 %v7142_v61 }
 0x32b   : > { %1798 = vmatpush1.bf16.msra.mxu0 %v7146_v63  ;;  %1839 = vmatpush1.bf16.msra.mxu1 %v7148_v15 }
 0x32c   : > { %1799 = vmatprep.subr.bf16.mxu0 %v7152_v12  ;;  %1840 = vmatprep.subr.bf16.mxu1 %v7154_v6  ;;  %v7182_v6 = vld [vmem:[#allocation18 + $0x120] ss:$16 sps:$4 sm:$0xff]  }
 0x32d   : > { %7972 = vst [vmem:[#allocation66_spill] sm:$0xff] %v7182_v6 }
 0x32f   : > { %1800 = vmatpush1.bf16.msra.mxu0 %v7158_v18  ;;  %1841 = vmatpush1.bf16.msra.mxu1 %v7160_v9  ;;  %v7184_v18 = vld [vmem:[#allocation18 + $0x128] ss:$16 sps:$4 sm:$0xff]   ;;  %v7188_v9 = vld [vmem:[#allocation18 + $0x144] ss:$16 sps:$4 sm:$0xff]  }
 0x330   : > { %1801 = vmatprep.subr.bf16.mxu0 %v7164_v16  ;;  %1842 = vmatprep.subr.bf16.mxu1 %v7166_v4  ;;  %7973 = vst [vmem:[#allocation67_spill] sm:$0xff] %v7184_v18  ;;  %7974 = vst [vmem:[#allocation68_spill] sm:$0xff] %v7188_v9  ;;  %v7190_v16 = vld [vmem:[#allocation18 + $0x14c] ss:$16 sps:$4 sm:$0xff]   ;;  %v7194_v4 = vld [vmem:[#allocation18 + $0x140] ss:$16 sps:$4 sm:$0xff]  }
 0x331   : > { %7975 = vst [vmem:[#allocation69_spill] sm:$0xff] %v7190_v16  ;;  %7976 = vst [vmem:[#allocation70_spill] sm:$0xff] %v7194_v4 }
 0x333   : > { %1802 = vmatpush1.bf16.msra.mxu0 %v7170_v13  ;;  %1843 = vmatpush1.bf16.msra.mxu1 %v7172_v59  ;;  %v7196_v13 = vld [vmem:[#allocation18 + $0x148] ss:$16 sps:$4 sm:$0xff]   ;;  %v7200_v59 = vld [vmem:[#allocation18 + $0x164] ss:$16 sps:$4 sm:$0xff]  }
 0x334   : > { %1803 = vmatprep.subr.bf16.mxu0 %v7176_v10  ;;  %1844 = vmatprep.subr.bf16.mxu1 %v7178_v39  ;;  %7977 = vst [vmem:[#allocation71_spill] sm:$0xff] %v7196_v13  ;;  %7978 = vst [vmem:[#allocation72_spill] sm:$0xff] %v7200_v59  ;;  %v7202_v10 = vld [vmem:[#allocation18 + $0x16c] ss:$16 sps:$4 sm:$0xff]   ;;  %v7206_v39 = vld [vmem:[#allocation18 + $0x160] ss:$16 sps:$4 sm:$0xff]  }
 0x335   : > { %7979 = vst [vmem:[#allocation73_spill] sm:$0xff] %v7202_v10  ;;  %7980 = vst [vmem:[#allocation74_spill] sm:$0xff] %v7206_v39 }
 0x337   : > { %1804 = vmatpush1.bf16.msra.mxu0 %v7182_v6  ;;  %1845 = vmatpush1.bf16.msra.mxu1 %v7184_v18  ;;  %v7208_v6 = vld [vmem:[#allocation18 + $0x168] ss:$16 sps:$4 sm:$0xff]   ;;  %v7212_v18 = vld [vmem:[#allocation18 + $0x184] ss:$16 sps:$4 sm:$0xff]  }
 0x338   : > { %1805 = vmatprep.subr.bf16.mxu0 %v7188_v9  ;;  %1846 = vmatprep.subr.bf16.mxu1 %v7190_v16  ;;  %7981 = vst [vmem:[#allocation75_spill] sm:$0xff] %v7208_v6  ;;  %7982 = vst [vmem:[#allocation76_spill] sm:$0xff] %v7212_v18  ;;  %v7214_v9 = vld [vmem:[#allocation18 + $0x18c] ss:$16 sps:$4 sm:$0xff]   ;;  %v7218_v16 = vld [vmem:[#allocation18 + $0x180] ss:$16 sps:$4 sm:$0xff]  }
 0x339   : > { %7983 = vst [vmem:[#allocation77_spill] sm:$0xff] %v7214_v9  ;;  %7984 = vst [vmem:[#allocation78_spill] sm:$0xff] %v7218_v16 }
 0x33b   : > { %1806 = vmatpush1.bf16.msra.mxu0 %v7194_v4  ;;  %1847 = vmatpush1.bf16.msra.mxu1 %v7196_v13  ;;  %v7220_v4 = vld [vmem:[#allocation18 + $0x188] ss:$16 sps:$4 sm:$0xff]   ;;  %v7224_v13 = vld [vmem:[#allocation18 + $0x1a4] ss:$16 sps:$4 sm:$0xff]  }
 0x33c   : > { %1807 = vmatprep.subr.bf16.mxu0 %v7200_v59  ;;  %1848 = vmatprep.subr.bf16.mxu1 %v7202_v10  ;;  %7985 = vst [vmem:[#allocation79_spill] sm:$0xff] %v7220_v4  ;;  %7986 = vst [vmem:[#allocation80_spill] sm:$0xff] %v7224_v13  ;;  %v7226_v59 = vld [vmem:[#allocation18 + $0x1ac] ss:$16 sps:$4 sm:$0xff]   ;;  %v7230_v10 = vld [vmem:[#allocation18 + $0x1a0] ss:$16 sps:$4 sm:$0xff]  }
 0x33d   : > { %7987 = vst [vmem:[#allocation81_spill] sm:$0xff] %v7226_v59  ;;  %7988 = vst [vmem:[#allocation82_spill] sm:$0xff] %v7230_v10 }
 0x33f   : > { %1808 = vmatpush1.bf16.msra.mxu0 %v7206_v39  ;;  %1849 = vmatpush1.bf16.msra.mxu1 %v7208_v6  ;;  %v7232_v39 = vld [vmem:[#allocation18 + $0x1a8] ss:$16 sps:$4 sm:$0xff]   ;;  %v7236_v6 = vld [vmem:[#allocation18 + $0x1c4] ss:$16 sps:$4 sm:$0xff]  }
 0x340   : > { %1809 = vmatprep.subr.bf16.mxu0 %v7212_v18  ;;  %1850 = vmatprep.subr.bf16.mxu1 %v7214_v9  ;;  %v7238_v18 = vld [vmem:[#allocation18 + $0x1cc] ss:$16 sps:$4 sm:$0xff]   ;;  %v7242_v9 = vld [vmem:[#allocation18 + $0x1c0] ss:$16 sps:$4 sm:$0xff]  }
 0x341   : > { %7989 = vst [vmem:[#allocation83_spill] sm:$0xff] %v7238_v18  ;;  %7990 = vst [vmem:[#allocation84_spill] sm:$0xff] %v7242_v9 }
 0x343   : > { %1810 = vmatpush1.bf16.msra.mxu0 %v7218_v16  ;;  %1851 = vmatpush1.bf16.msra.mxu1 %v7220_v4  ;;  %v7244_v16 = vld [vmem:[#allocation18 + $0x1c8] ss:$16 sps:$4 sm:$0xff]   ;;  %v7248_v4 = vld [vmem:[#allocation18 + $0x1e4] ss:$16 sps:$4 sm:$0xff]  }
 0x344   : > { %1811 = vmatprep.subr.bf16.mxu0 %v7224_v13  ;;  %1852 = vmatprep.subr.bf16.mxu1 %v7226_v59  ;;  %7991 = vst [vmem:[#allocation85_spill] sm:$0xff] %v7244_v16  ;;  %v7250_v13 = vld [vmem:[#allocation18 + $0x1ec] ss:$16 sps:$4 sm:$0xff]   ;;  %v7254_v59 = vld [vmem:[#allocation18 + $0x1e0] ss:$16 sps:$4 sm:$0xff]  }
 0x345   : > { %7992 = vst [vmem:[#allocation86_spill] sm:$0xff] %v7250_v13 }
 0x347   : > { %1812 = vmatpush1.bf16.msra.mxu0 %v7230_v10  ;;  %1853 = vmatpush1.bf16.msra.mxu1 %v7232_v39  ;;  %v7256_v10 = vld [vmem:[#allocation18 + $0x1e8] ss:$16 sps:$4 sm:$0xff]  }
 0x348   : > { %1813 = vmatprep.subr.bf16.mxu0 %v7236_v6  ;;  %1854 = vmatprep.subr.bf16.mxu1 %v7238_v18  ;;  %7993 = vst [vmem:[#allocation87_spill] sm:$0xff] %v7256_v10  ;;  %v5754_v18 = vld [vmem:[#allocation15 + $0x4] ss:$16 sps:$4 sm:$0xff]  }
 0x34b   : > { %1814 = vmatpush1.bf16.msra.mxu0 %v7242_v9  ;;  %1855 = vmatpush1.bf16.msra.mxu1 %v7244_v16  ;;  %v5755_v16 = vld [vmem:[#allocation15] ss:$16 sps:$4 sm:$0xff]   ;;  %v5756_v9 = vld [vmem:[#allocation15 + $0x24] ss:$16 sps:$4 sm:$0xff]  }
 0x34c   : > { %1815 = vmatprep.subr.bf16.mxu0 %v7248_v4  ;;  %1856 = vmatprep.subr.bf16.mxu1 %v7250_v13  ;;  %v7994_v13 = vmov 0  }
 0x34f   : > { %1816 = vmatpush1.bf16.msra.mxu0 %v7254_v59  ;;  %1857 = vmatpush1.bf16.msra.mxu1 %v7256_v10  ;;  %v5757_v10 = vld [vmem:[#allocation15 + $0x20] ss:$16 sps:$4 sm:$0xff]  }
 0x350   : > { %2089 = vmatprep.subr.bf16.mxu0 %v5754_v18  ;;  %2130 = vmatprep.subr.bf16.mxu1 %v6953_v40  ;;  %v5758_v40 = vld [vmem:[#allocation15 + $0x44] ss:$16 sps:$4 sm:$0xff]   ;;  %v5759_v18 = vld [vmem:[#allocation15 + $0x40] ss:$16 sps:$4 sm:$0xff]  }
 0x352   : > { %1818 = vmatmul.mubr.bf16.vlgmr.msra.gmra.mrb[12].mxu0 %v7076_v23  ;;  %1859 = vmatmul.mubr.bf16.vlgmr.msra.gmra.mrb[20].mxu1 %v7076_v23 }
 0x353   : > { %2090 = vmatpush1.bf16.msra.mxu0 %v5755_v16  ;;  %2131 = vmatpush1.bf16.msra.mxu1 %v6957_v41  ;;  %v5760_v41 = vld [vmem:[#allocation15 + $0x64] ss:$16 sps:$4 sm:$0xff]  }
 0x354   : > { %2091 = vmatprep.subr.bf16.mxu0 %v5756_v9  ;;  %2132 = vmatprep.subr.bf16.mxu1 %v6959_v43  ;;  %v5761_v43 = vld [vmem:[#allocation15 + $0x60] ss:$16 sps:$4 sm:$0xff]   ;;  %v5762_v16 = vld [vmem:[#allocation15 + $0x84] ss:$16 sps:$4 sm:$0xff]  }
 0x355   : > { %2121 = vmatprep.mubr.bf16.mxu0 %v7994_v13  ;;  %2162 = vmatprep.mubr.bf16.mxu1 %v7994_v13 }
 0x357   : > { %2092 = vmatpush1.bf16.msra.mxu0 %v5757_v10  ;;  %2133 = vmatpush1.bf16.msra.mxu1 %v6963_v44  ;;  %v5763_v44 = vld [vmem:[#allocation15 + $0x80] ss:$16 sps:$4 sm:$0xff]  }
 0x358   : > { %2093 = vmatprep.subr.bf16.mxu0 %v5758_v40  ;;  %2134 = vmatprep.subr.bf16.mxu1 %v6965_v45  ;;  %v5764_v45 = vld [vmem:[#allocation15 + $0xa4] ss:$16 sps:$4 sm:$0xff]  }
 0x35b   : > { %2094 = vmatpush1.bf16.msra.mxu0 %v5759_v18  ;;  %2135 = vmatpush1.bf16.msra.mxu1 %v6970_v46  ;;  %v5765_v46 = vld [vmem:[#allocation15 + $0xa0] ss:$16 sps:$4 sm:$0xff]  }
 0x35c   : > { %2095 = vmatprep.subr.bf16.mxu0 %v5760_v41  ;;  %2136 = vmatprep.subr.bf16.mxu1 %v6972_v47  ;;  %v5766_v47 = vld [vmem:[#allocation15 + $0xc4] ss:$16 sps:$4 sm:$0xff]  }
 0x35f   : > { %2096 = vmatpush1.bf16.msra.mxu0 %v5761_v43  ;;  %2137 = vmatpush1.bf16.msra.mxu1 %v6977_v48 }
 0x360   : > { %2097 = vmatprep.subr.bf16.mxu0 %v5762_v16  ;;  %2138 = vmatprep.subr.bf16.mxu1 %v6980_v49 }
 0x363   : > { %2098 = vmatpush1.bf16.msra.mxu0 %v5763_v44  ;;  %2139 = vmatpush1.bf16.msra.mxu1 %v6985_v50 }
 0x364   : > { %2099 = vmatprep.subr.bf16.mxu0 %v5764_v45  ;;  %2140 = vmatprep.subr.bf16.mxu1 %v6987_v51 }
 0x367   : > { %2100 = vmatpush1.bf16.msra.mxu0 %v5765_v46  ;;  %2141 = vmatpush1.bf16.msra.mxu1 %v6991_v52 }
 0x368   : > { %2101 = vmatprep.subr.bf16.mxu0 %v5766_v47  ;;  %2142 = vmatprep.subr.bf16.mxu1 %v6993_v53 }
 0x36b   : > { %2102 = vmatpush1.bf16.msra.mxu0 %v6945_v36  ;;  %2143 = vmatpush1.bf16.msra.mxu1 %v6997_v54 }
 0x36c   : > { %2103 = vmatprep.subr.bf16.mxu0 %v6947_v37  ;;  %2144 = vmatprep.subr.bf16.mxu1 %v6999_v55 }
 0x36f   : > { %2104 = vmatpush1.bf16.msra.mxu0 %v6950_v38  ;;  %2145 = vmatpush1.bf16.msra.mxu1 %v7003_v56 }
 0x370   : > { %2580 = vmatprep.subr.bf16.mxu0 %v7025_v57  ;;  %2621 = vmatprep.subr.bf16.mxu1 %v7027_v58 }
 0x3e5   : > { %v1328_v48 = vpop.f32.mrb[8].mxu0  ;;  %v1369_v49 = vpop.f32.mrb[16].mxu1 }
 0x3e6   : > { %v1329_v50 = vadd.f32 %v1328_v48, %v7057_v24  ;;  %v1370_v36 = vadd.f32 %v1369_v49, %v7039_v5  ;;  %v1330_v51 = vpop.f32.mrb[9].mxu0  ;;  %v1371_v52 = vpop.f32.mrb[17].mxu1 }
 0x3e7   : > { %v1331_v37 = vadd.f32 %v1330_v51, %v7059_v26  ;;  %v1372_v53 = vadd.f32 %v1371_v52, %v7041_v8  ;;  %v1332_v54 = vpop.f32.mrb[10].mxu0  ;;  %v1373_v38 = vpop.f32.mrb[18].mxu1  ;;  %v8006_v51 = vld [vmem:[#allocation60_spill] sm:$0xff] }
 0x3e8   : > { %v4639_v55 = vmul.f32 -1.442695, %v1329_v50  ;;  %v1333_v56 = vpop.f32.mrb[11].mxu0  ;;  %v1374_v10 = vpop.f32.mrb[19].mxu1  ;;  %v8011_v54 = vld [vmem:[#allocation65_spill] sm:$0xff]  ;;  %v8012_v38 = vld [vmem:[#allocation66_spill] sm:$0xff] }
 0x3e9   : > { %v4640_v57 = vmul.f32 -1.442695, %v1331_v37  ;;  %v4641_v58 = vmul.f32 -1.442695, %v1372_v53  ;;  %v8009_v37 = vld [vmem:[#allocation63_spill] sm:$0xff]  ;;  %v8010_v53 = vld [vmem:[#allocation64_spill] sm:$0xff] }
 0x3ea   : > { %5626 = vpow2.f32 %v4639_v55  ;;  %v8013_v55 = vld [vmem:[#allocation67_spill] sm:$0xff]  ;;  %v8014_v56 = vld [vmem:[#allocation68_spill] sm:$0xff]  ;;  %v8015_v10 = vld [vmem:[#allocation69_spill] sm:$0xff] }
 0x3eb   : > { %5628 = vpow2.f32 %v4640_v57 }
 0x3ec   : > { %5630 = vpow2.f32 %v4641_v58  ;;  %v8016_v58 = vld [vmem:[#allocation70_spill] sm:$0xff] }
 0x3ed   : > { %5632 = vtanh.f32 %v1370_v36 }
 0x3f4   : > { %v5627_v9 = vpop.eup %5626 }
 0x3f5   : > { %v5629_v23 = vpop.eup %5628  ;;  %v1379_v24 = vadd.f32 1.0, %v5627_v9  ;;  %v8017_v9 = vld [vmem:[#allocation71_spill] sm:$0xff] }
 0x3f6   : > { %v1385_v5 = vadd.f32 1.0, %v5629_v23  ;;  %v5631_v26 = vpop.eup %5630 }
 0x3f7   : > { %5634 = vrcp.f32 %v1379_v24  ;;  %v5633_v40 = vpop.eup %5632  ;;  %v1392_v43 = vadd.f32 1.0, %v5631_v26  ;;  %v963_v24 = vld [vmem:[#allocation5 + $0x8] sm:$0xff]  ;;  %v8019_v26 = vld [vmem:[#allocation73_spill] sm:$0xff] }
 0x3f8   : > { %5636 = vrcp.f32 %v1385_v5  ;;  %v8018_v5 = vld [vmem:[#allocation72_spill] sm:$0xff] }
 0x3f9   : > { %5638 = vrcp.f32 %v1392_v43 }
 0x401   : > { %v5635_v8 = vpop.eup %5634 }
 0x402   : > { %v5637_v18 = vpop.eup %5636  ;;  %v1396_v41 = vmul.f32 %v5635_v8, %v5633_v40 }
 0x403   : > { %v1395_v16 = vmul.f32 %v5637_v18, %v7069_v0  ;;  %v5639_v45 = vpop.eup %5638  ;;  %v964_v0 = vld [vmem:[#allocation20] sm:$0xf] }
 0x405   : > { %v7292_v44 = vadd.f32 %v1396_v41, %v1395_v16  ;;  %v8020_v16 = vld [vmem:[#allocation74_spill] sm:$0xff] }
 0x407   : > { %5640 = vtanh.f32 %v7292_v44 }
 0x411   : > { %v5641_v46 = vpop.eup %5640 }
 0x412   : > { %v1399_v47 = vmul.f32 %v5641_v46, %v5639_v45  ;;  %v8021_v45 = vld [vmem:[#allocation75_spill] sm:$0xff]  ;;  %v8022_v46 = vld [vmem:[#allocation76_spill] sm:$0xff] }
 0x414   : > { %v7295_v48 = vpack.c.bf16 %v1399_v47, %v1399_v47  ;;  %v8023_v47 = vld [vmem:[#allocation77_spill] sm:$0xff] }
 0x416   : > { %2122 = vmatmul.mubr.bf16.vlgmr.msra.gmra.mrb[16].mxu0 %v7295_v48  ;;  %2163 = vmatmul.mubr.bf16.vlgmr.msra.gmra.mrb[24].mxu1 %v7295_v48 }
 0x417   : > { %2581 = vmatpush1.bf16.msra.mxu0 %v7072_v19  ;;  %2622 = vmatpush1.bf16.msra.mxu1 %v7074_v21  ;;  %v7995_v19 = vsub.s32 0, %v7031_v60 }
 0x418   : > { %2582 = vmatprep.subr.bf16.mxu0 %v7078_v25  ;;  %2623 = vmatprep.subr.bf16.mxu1 %v7080_v27  ;;  %v7997_v25 = vsub.s32 1, %v7031_v60 }
 0x419   : > { %v7313_v21 = vrot.slane %v964_v0, %v7995_v19  ;;  %v8024_v19 = vld [vmem:[#allocation78_spill] sm:$0xff] }
 0x41a   : > { %v7319_v27 = vrot.slane %v964_v0, %v7997_v25  ;;  %v8025_v25 = vld [vmem:[#allocation79_spill] sm:$0xff] }
 0x41b   : > { %2583 = vmatpush1.bf16.msra.mxu0 %v7086_v29  ;;  %2624 = vmatpush1.bf16.msra.mxu1 %v7088_v31  ;;  %7996 = vst [vmem:[#allocation88_spill] sm:$0xff] %v7313_v21 }
 0x41c   : > { %2584 = vmatprep.subr.bf16.mxu0 %v7092_v20  ;;  %2625 = vmatprep.subr.bf16.mxu1 %v7094_v33  ;;  %7998 = vst [vmem:[#allocation89_spill] sm:$0xff] %v7319_v27 }
 0x41f   : > { %2585 = vmatpush1.bf16.msra.mxu0 %v7098_v22  ;;  %2626 = vmatpush1.bf16.msra.mxu1 %v7100_v34 }
 0x420   : > { %2586 = vmatprep.subr.bf16.mxu0 %v7104_v30  ;;  %2627 = vmatprep.subr.bf16.mxu1 %v7106_v32 }
 0x423   : > { %2587 = vmatpush1.bf16.msra.mxu0 %v7110_v35  ;;  %2628 = vmatpush1.bf16.msra.mxu1 %v7112_v42 }
 0x424   : > { %2588 = vmatprep.subr.bf16.mxu0 %v7116_v62  ;;  %2629 = vmatprep.subr.bf16.mxu1 %v7118_v7  ;;  %v7999_v7 = vsub.s32 3, %v7031_v60 }
 0x425   : > { %v1819_v29 = vpop.f32.mrb[12].mxu0  ;;  %v1860_v31 = vpop.f32.mrb[20].mxu1 }
 0x426   : > { %v1820_v20 = vadd.f32 %v1819_v29, %v7313_v21  ;;  %v1821_v33 = vpop.f32.mrb[13].mxu0  ;;  %v1862_v22 = vpop.f32.mrb[21].mxu1  ;;  %v7331_v50 = vrot.slane %v964_v0, %v7999_v7  ;;  %v8026_v29 = vld [vmem:[#allocation80_spill] sm:$0xff] }
 0x427   : > { %v1822_v34 = vadd.f32 %v1821_v33, %v7319_v27  ;;  %v1823_v30 = vpop.f32.mrb[14].mxu0  ;;  %v1864_v32 = vpop.f32.mrb[22].mxu1  ;;  %2589 = vmatpush1.bf16.msra.mxu0 %v7122_v11  ;;  %2630 = vmatpush1.bf16.msra.mxu1 %v7124_v1  ;;  %v8001_v1 = vsub.s32 2, %v7031_v60  ;;  %v8007_v60 = vld [vmem:[#allocation61_spill] sm:$0xff]  ;;  %v8029_v33 = vld [vmem:[#allocation83_spill] sm:$0xff] }
 0x428   : > { %v4706_v35 = vmul.f32 -1.442695, %v1820_v20  ;;  %v1824_v42 = vpop.f32.mrb[15].mxu0  ;;  %v1865_v49 = vpop.f32.mrb[23].mxu1  ;;  %2590 = vmatprep.subr.bf16.mxu0 %v7128_v2  ;;  %2631 = vmatprep.subr.bf16.mxu1 %v7130_v3  ;;  %8000 = vst [vmem:[#allocation90_spill] sm:$0xff] %v7331_v50  ;;  %v1863_v11 = vadd.f32 %v1862_v22, %v7331_v50  ;;  %v8003_v3 = vld [vmem:[#allocation57_spill] sm:$0xff] }
 0x429   : > { %v4707_v62 = vmul.f32 -1.442695, %v1822_v34  ;;  %v7340_v2 = vrot.slane %v964_v0, %v8001_v1  ;;  %v8028_v20 = vld [vmem:[#allocation82_spill] sm:$0xff]  ;;  %v8030_v22 = vld [vmem:[#allocation84_spill] sm:$0xff]  ;;  %v8031_v34 = vld [vmem:[#allocation85_spill] sm:$0xff] }
 0x42a   : > { %5642 = vpow2.f32 %v4706_v35  ;;  %v8032_v32 = vld [vmem:[#allocation86_spill] sm:$0xff]  ;;  %v8034_v49 = vld [vmem:[#allocation87_spill] sm:$0xff] }
 0x42b   : > { %5644 = vpow2.f32 %v4707_v62  ;;  %2591 = vmatpush1.bf16.msra.mxu0 %v7134_v14  ;;  %2632 = vmatpush1.bf16.msra.mxu1 %v7136_v17  ;;  %8002 = vst [vmem:[#allocation91_spill] sm:$0xff] %v7340_v2  ;;  %v4708_v14 = vmul.f32 -1.442695, %v1863_v11  ;;  %v1861_v17 = vadd.f32 %v1860_v31, %v7340_v2  ;;  %v8027_v31 = vld [vmem:[#allocation81_spill] sm:$0xff] }
 0x42c   : > { %2592 = vmatprep.subr.bf16.mxu0 %v7140_v28  ;;  %2633 = vmatprep.subr.bf16.mxu1 %v7142_v61  ;;  %v8004_v28 = vld [vmem:[#allocation58_spill] sm:$0xff]  ;;  %v8005_v61 = vld [vmem:[#allocation59_spill] sm:$0xff] }
 0x42d   : > { %5646 = vpow2.f32 %v4708_v14  ;;  %v5448_v62 = vld [vmem:[#allocation15] ss:$16 sps:$4 sm:$0xff]   ;;  %v5451_v7 = vld [vmem:[#allocation15 + $0x8] ss:$16 sps:$4 sm:$0xff]   ;;  %v5459_v11 = vld [vmem:[#allocation15 + $0x2c] ss:$16 sps:$4 sm:$0xff]  }
 0x42e   : > { %5648 = vtanh.f32 %v1861_v17  ;;  %v5454_v1 = vld [vmem:[#allocation15 + $0x20] ss:$16 sps:$4 sm:$0xff]   ;;  %v5465_v14 = vld [vmem:[#allocation15 + $0x4c] ss:$16 sps:$4 sm:$0xff]  }
 0x42f   : > { %2593 = vmatpush1.bf16.msra.mxu0 %v7146_v63  ;;  %2634 = vmatpush1.bf16.msra.mxu1 %v7148_v15  ;;  %v5460_v17 = vld [vmem:[#allocation15 + $0x40] ss:$16 sps:$4 sm:$0xff]  }
 0x430   : > { %2594 = vmatprep.subr.bf16.mxu0 %v7152_v12  ;;  %2635 = vmatprep.subr.bf16.mxu1 %v8003_v3  ;;  %v8008_v12 = vld [vmem:[#allocation62_spill] sm:$0xff] }
 0x431   : > { %v5457_v3 = vld [vmem:[#allocation15 + $0x28] ss:$16 sps:$4 sm:$0xff]  }
 0x433   : > { %2595 = vmatpush1.bf16.msra.mxu0 %v8004_v28  ;;  %2636 = vmatpush1.bf16.msra.mxu1 %v8005_v61  ;;  %v5468_v28 = vld [vmem:[#allocation15 + $0x64] ss:$16 sps:$4 sm:$0xff]   ;;  %v5471_v61 = vld [vmem:[#allocation15 + $0x6c] ss:$16 sps:$4 sm:$0xff]  }
 0x434   : > { %v5643_v36 = vpop.eup %5642  ;;  %2596 = vmatprep.subr.bf16.mxu0 %v8006_v51  ;;  %2637 = vmatprep.subr.bf16.mxu1 %v8007_v60  ;;  %v5469_v51 = vld [vmem:[#allocation15 + $0x68] ss:$16 sps:$4 sm:$0xff]   ;;  %v5472_v60 = vld [vmem:[#allocation15 + $0x80] ss:$16 sps:$4 sm:$0xff]  }
 0x435   : > { %v5645_v52 = vpop.eup %5644  ;;  %v1870_v63 = vadd.f32 1.0, %v5643_v36  ;;  %v5466_v36 = vld [vmem:[#allocation15 + $0x60] ss:$16 sps:$4 sm:$0xff]  }
 0x436   : > { %v1876_v15 = vadd.f32 1.0, %v5645_v52  ;;  %v5474_v52 = vld [vmem:[#allocation15 + $0x84] ss:$16 sps:$4 sm:$0xff]  }
 0x437   : > { %5650 = vrcp.f32 %v1870_v63  ;;  %2597 = vmatpush1.bf16.msra.mxu0 %v8008_v12  ;;  %2638 = vmatpush1.bf16.msra.mxu1 %v8009_v37  ;;  %v5647_v57 = vpop.eup %5646  ;;  %v5475_v63 = vld [vmem:[#allocation15 + $0x88] ss:$16 sps:$4 sm:$0xff]   ;;  %v5480_v12 = vld [vmem:[#allocation15 + $0xa4] ss:$16 sps:$4 sm:$0xff]   ;;  %v5483_v37 = vld [vmem:[#allocation15 + $0xac] ss:$16 sps:$4 sm:$0xff]  }
 0x438   : > { %5652 = vrcp.f32 %v1876_v15  ;;  %2598 = vmatprep.subr.bf16.mxu0 %v8010_v53  ;;  %2639 = vmatprep.subr.bf16.mxu1 %v8011_v54  ;;  %v5649_v23 = vpop.eup %5648  ;;  %v1883_v41 = vadd.f32 1.0, %v5647_v57  ;;  %v5477_v15 = vld [vmem:[#allocation15 + $0x8c] ss:$16 sps:$4 sm:$0xff]   ;;  %v5478_v53 = vld [vmem:[#allocation15 + $0xa0] ss:$16 sps:$4 sm:$0xff]  }
 0x439   : > { %v5481_v54 = vld [vmem:[#allocation15 + $0xa8] ss:$16 sps:$4 sm:$0xff]   ;;  %v5492_v57 = vld [vmem:[#allocation15 + $0xe4] ss:$16 sps:$4 sm:$0xff]  }
 0x43a   : > { %5654 = vrcp.f32 %v1883_v41  ;;  %v8036_v41 = vld [vmem:[#allocation49_spill] sm:$0xff] }
 0x43b   : > { %2599 = vmatpush1.bf16.msra.mxu0 %v8012_v38  ;;  %2640 = vmatpush1.bf16.msra.mxu1 %v8013_v55  ;;  %v5486_v38 = vld [vmem:[#allocation15 + $0xc4] ss:$16 sps:$4 sm:$0xff]   ;;  %v5489_v55 = vld [vmem:[#allocation15 + $0xcc] ss:$16 sps:$4 sm:$0xff]  }
 0x43c   : > { %2600 = vmatprep.subr.bf16.mxu0 %v8014_v56  ;;  %2641 = vmatprep.subr.bf16.mxu1 %v8015_v10  ;;  %v5484_v56 = vld [vmem:[#allocation15 + $0xc0] ss:$16 sps:$4 sm:$0xff]   ;;  %v5487_v10 = vld [vmem:[#allocation15 + $0xc8] ss:$16 sps:$4 sm:$0xff]  }
 0x43f   : > { %2601 = vmatpush1.bf16.msra.mxu0 %v8016_v58  ;;  %2642 = vmatpush1.bf16.msra.mxu1 %v8017_v9  ;;  %v5495_v58 = vld [vmem:[#allocation15 + $0xec] ss:$16 sps:$4 sm:$0xff]   ;;  %v5490_v9 = vld [vmem:[#allocation15 + $0xe0] ss:$16 sps:$4 sm:$0xff]  }
 0x440   : > { %2602 = vmatprep.subr.bf16.mxu0 %v8018_v5  ;;  %2643 = vmatprep.subr.bf16.mxu1 %v8019_v26  ;;  %v7394_v5 = vld [vmem:[#allocation18 + $0xc] ss:$16 sps:$4 sm:$0xff]  }
 0x441   : > { %v5651_v40 = vpop.eup %5650 }
 0x442   : > { %v5653_v8 = vpop.eup %5652  ;;  %v1887_v18 = vmul.f32 %v5651_v40, %v5649_v23  ;;  %v5493_v23 = vld [vmem:[#allocation15 + $0xe8] ss:$16 sps:$4 sm:$0xff]  }
 0x443   : > { %v1886_v43 = vmul.f32 %v5653_v8, %v963_v24  ;;  %2603 = vmatpush1.bf16.msra.mxu0 %v8020_v16  ;;  %2644 = vmatpush1.bf16.msra.mxu1 %v8021_v45  ;;  %v7392_v24 = vld [vmem:[#allocation18 + $0x4] ss:$16 sps:$4 sm:$0xff]  }
 0x444   : > { %2604 = vmatprep.subr.bf16.mxu0 %v8022_v46  ;;  %2645 = vmatprep.subr.bf16.mxu1 %v8023_v47  ;;  %v5655_v30 = vpop.eup %5654  ;;  %v8035_v8 = vld [vmem:[#allocation53_spill] sm:$0xff]  ;;  %v8037_v46 = vld [vmem:[#allocation54_spill] sm:$0xff] }
 0x445   : > { %v7367_v0 = vadd.f32 %v1887_v18, %v1886_v43 }
 0x447   : > { %2605 = vmatpush1.bf16.msra.mxu0 %v8024_v19  ;;  %2646 = vmatpush1.bf16.msra.mxu1 %v8025_v25  ;;  %5656 = vtanh.f32 %v7367_v0  ;;  %v8038_v19 = vld [vmem:[#allocation50_spill] sm:$0xff] }
 0x448   : > { %2606 = vmatprep.subr.bf16.mxu0 %v8026_v29  ;;  %2647 = vmatprep.subr.bf16.mxu1 %v8027_v31 }
 0x44b   : > { %2607 = vmatpush1.bf16.msra.mxu0 %v8028_v20  ;;  %2648 = vmatpush1.bf16.msra.mxu1 %v7232_v39  ;;  %v5450_v39 = vld [vmem:[#allocation15 + $0x4] ss:$16 sps:$4 sm:$0xff]  }
 0x44c   : > { %2608 = vmatprep.subr.bf16.mxu0 %v7236_v6  ;;  %2649 = vmatprep.subr.bf16.mxu1 %v8029_v33 }
 0x44f   : > { %2609 = vmatpush1.bf16.msra.mxu0 %v8030_v22  ;;  %2650 = vmatpush1.bf16.msra.mxu1 %v8031_v34 }
 0x450   : > { %2610 = vmatprep.subr.bf16.mxu0 %v7248_v4  ;;  %2651 = vmatprep.subr.bf16.mxu1 %v8032_v32  ;;  %v5453_v4 = vld [vmem:[#allocation15 + $0xc] ss:$16 sps:$4 sm:$0xff]  }
 0x451   : > { %v5657_v35 = vpop.eup %5656 }
 0x452   : > { %v7382_v42 = vmul.f32 %v5657_v35, %v5655_v30 }
 0x453   : > { %2611 = vmatpush1.bf16.msra.mxu0 %v7254_v59  ;;  %2652 = vmatpush1.bf16.msra.mxu1 %v8034_v49  ;;  %v5456_v59 = vld [vmem:[#allocation15 + $0x24] ss:$16 sps:$4 sm:$0xff]  }
 0x454   : > { %8033 = vst [vmem:[#allocation57_spill] sm:$0xff] %v7382_v42  ;;  %v2195_v6 = vpack.c.bf16 %v7382_v42, %v7382_v42  ;;  %2884 = vmatprep.subr.bf16.mxu0 %v5450_v39  ;;  %2925 = vmatprep.subr.bf16.mxu1 %v5453_v4  ;;  %v7556_v42 = vld [vmem:[#allocation18 + $0x180] ss:$16 sps:$4 sm:$0xff]  }
 0x456   : > { %2612 = vmatprep.mubr.bf16.mxu0 %v2195_v6  ;;  %2653 = vmatprep.mubr.bf16.mxu1 %v2195_v6 }
 0x457   : > { %2613 = vmatmul.mubr.bf16.vlgmr.msra.gmra.mrb[20].mxu0 %v7295_v48  ;;  %2654 = vmatmul.mubr.bf16.vlgmr.msra.gmra.mrb[28].mxu1 %v7295_v48  ;;  %v5462_v48 = vld [vmem:[#allocation15 + $0x44] ss:$16 sps:$4 sm:$0xff]  }
 0x458   : > { %2916 = vmatprep.mubr.bf16.mxu0 %v7994_v13  ;;  %2957 = vmatprep.mubr.bf16.mxu1 %v7994_v13  ;;  %v5463_v13 = vld [vmem:[#allocation15 + $0x48] ss:$16 sps:$4 sm:$0xff]  }
 0x459   : > { %2885 = vmatpush1.bf16.msra.mxu0 %v5448_v62  ;;  %2926 = vmatpush1.bf16.msra.mxu1 %v5451_v7 }
 0x45a   : > { %2886 = vmatprep.subr.bf16.mxu0 %v5456_v59  ;;  %2927 = vmatprep.subr.bf16.mxu1 %v5459_v11 }
 0x45d   : > { %2887 = vmatpush1.bf16.msra.mxu0 %v5454_v1  ;;  %2928 = vmatpush1.bf16.msra.mxu1 %v5457_v3 }
 0x45e   : > { %2888 = vmatprep.subr.bf16.mxu0 %v5462_v48  ;;  %2929 = vmatprep.subr.bf16.mxu1 %v5465_v14 }
 0x461   : > { %2889 = vmatpush1.bf16.msra.mxu0 %v5460_v17  ;;  %2930 = vmatpush1.bf16.msra.mxu1 %v5463_v13  ;;  %v7406_v13 = vld [vmem:[#allocation18] ss:$16 sps:$4 sm:$0xff]  }
 0x462   : > { %2890 = vmatprep.subr.bf16.mxu0 %v5468_v28  ;;  %2931 = vmatprep.subr.bf16.mxu1 %v5471_v61  ;;  %v7408_v28 = vld [vmem:[#allocation18 + $0x8] ss:$16 sps:$4 sm:$0xff]  }
 0x465   : > { %2891 = vmatpush1.bf16.msra.mxu0 %v5466_v36  ;;  %2932 = vmatpush1.bf16.msra.mxu1 %v5469_v51  ;;  %v7412_v36 = vld [vmem:[#allocation18 + $0x24] ss:$16 sps:$4 sm:$0xff]   ;;  %v7414_v51 = vld [vmem:[#allocation18 + $0x2c] ss:$16 sps:$4 sm:$0xff]  }
 0x466   : > { %2892 = vmatprep.subr.bf16.mxu0 %v5474_v52  ;;  %2933 = vmatprep.subr.bf16.mxu1 %v5477_v15  ;;  %v7426_v52 = vld [vmem:[#allocation18 + $0x44] ss:$16 sps:$4 sm:$0xff]   ;;  %v7432_v15 = vld [vmem:[#allocation18 + $0x40] ss:$16 sps:$4 sm:$0xff]  }
 0x469   : > { %2893 = vmatpush1.bf16.msra.mxu0 %v5472_v60  ;;  %2934 = vmatpush1.bf16.msra.mxu1 %v5475_v63  ;;  %v7422_v60 = vld [vmem:[#allocation18 + $0x28] ss:$16 sps:$4 sm:$0xff]   ;;  %v7428_v63 = vld [vmem:[#allocation18 + $0x4c] ss:$16 sps:$4 sm:$0xff]  }
 0x46a   : > { %2894 = vmatprep.subr.bf16.mxu0 %v5480_v12  ;;  %2935 = vmatprep.subr.bf16.mxu1 %v5483_v37  ;;  %v7434_v12 = vld [vmem:[#allocation18 + $0x48] ss:$16 sps:$4 sm:$0xff]   ;;  %v7438_v37 = vld [vmem:[#allocation18 + $0x64] ss:$16 sps:$4 sm:$0xff]  }
 0x46d   : > { %2895 = vmatpush1.bf16.msra.mxu0 %v5478_v53  ;;  %2936 = vmatpush1.bf16.msra.mxu1 %v5481_v54  ;;  %v7440_v53 = vld [vmem:[#allocation18 + $0x6c] ss:$16 sps:$4 sm:$0xff]   ;;  %v7444_v54 = vld [vmem:[#allocation18 + $0x60] ss:$16 sps:$4 sm:$0xff]  }
 0x46e   : > { %2896 = vmatprep.subr.bf16.mxu0 %v5486_v38  ;;  %2937 = vmatprep.subr.bf16.mxu1 %v5489_v55  ;;  %v7446_v38 = vld [vmem:[#allocation18 + $0x68] ss:$16 sps:$4 sm:$0xff]   ;;  %v7450_v55 = vld [vmem:[#allocation18 + $0x84] ss:$16 sps:$4 sm:$0xff]  }
 0x471   : > { %2897 = vmatpush1.bf16.msra.mxu0 %v5484_v56  ;;  %2938 = vmatpush1.bf16.msra.mxu1 %v5487_v10  ;;  %v7452_v56 = vld [vmem:[#allocation18 + $0x8c] ss:$16 sps:$4 sm:$0xff]   ;;  %v7456_v10 = vld [vmem:[#allocation18 + $0x80] ss:$16 sps:$4 sm:$0xff]  }
 0x472   : > { %2898 = vmatprep.subr.bf16.mxu0 %v5492_v57  ;;  %2939 = vmatprep.subr.bf16.mxu1 %v5495_v58  ;;  %v7458_v57 = vld [vmem:[#allocation18 + $0x88] ss:$16 sps:$4 sm:$0xff]   ;;  %v7462_v58 = vld [vmem:[#allocation18 + $0xa4] ss:$16 sps:$4 sm:$0xff]  }
 0x475   : > { %2899 = vmatpush1.bf16.msra.mxu0 %v5490_v9  ;;  %2940 = vmatpush1.bf16.msra.mxu1 %v5493_v23  ;;  %v7464_v9 = vld [vmem:[#allocation18 + $0xac] ss:$16 sps:$4 sm:$0xff]  }
 0x476   : > { %3375 = vmatprep.subr.bf16.mxu0 %v7392_v24  ;;  %3416 = vmatprep.subr.bf16.mxu1 %v7394_v5 }
 0x4e9   : > { %v2123_v26 = vpop.f32.mrb[16].mxu0  ;;  %v2164_v40 = vpop.f32.mrb[24].mxu1 }
 0x4ea   : > { %v2124_v18 = vadd.f32 %v2123_v26, %v8035_v8  ;;  %v2165_v43 = vadd.f32 %v2164_v40, %v8036_v41  ;;  %v2125_v16 = vpop.f32.mrb[17].mxu0  ;;  %v2166_v45 = vpop.f32.mrb[25].mxu1  ;;  %v7469_v41 = vld [vmem:[#allocation18 + $0xa0] ss:$16 sps:$4 sm:$0xff]  }
 0x4eb   : > { %v2126_v47 = vadd.f32 %v2125_v16, %v8037_v46  ;;  %v2167_v25 = vadd.f32 %v2166_v45, %v8038_v19  ;;  %v2127_v29 = vpop.f32.mrb[18].mxu0  ;;  %v2168_v31 = vpop.f32.mrb[26].mxu1  ;;  %v7478_v19 = vld [vmem:[#allocation18 + $0xcc] ss:$16 sps:$4 sm:$0xff]  }
 0x4ec   : > { %v4741_v20 = vmul.f32 -1.442695, %v2124_v18  ;;  %v2128_v33 = vpop.f32.mrb[19].mxu0  ;;  %v2169_v22 = vpop.f32.mrb[27].mxu1 }
 0x4ed   : > { %v4742_v34 = vmul.f32 -1.442695, %v2126_v47  ;;  %v4743_v30 = vmul.f32 -1.442695, %v2167_v25  ;;  %v7476_v47 = vld [vmem:[#allocation18 + $0xc4] ss:$16 sps:$4 sm:$0xff]  }
 0x4ee   : > { %5658 = vpow2.f32 %v4741_v20  ;;  %v7482_v33 = vld [vmem:[#allocation18 + $0xc0] ss:$16 sps:$4 sm:$0xff]   ;;  %v7484_v22 = vld [vmem:[#allocation18 + $0xc8] ss:$16 sps:$4 sm:$0xff]  }
 0x4ef   : > { %5660 = vpow2.f32 %v4742_v34  ;;  %v7488_v34 = vld [vmem:[#allocation18 + $0xe4] ss:$16 sps:$4 sm:$0xff]  }
 0x4f0   : > { %5662 = vpow2.f32 %v4743_v30  ;;  %v7490_v30 = vld [vmem:[#allocation18 + $0xec] ss:$16 sps:$4 sm:$0xff]  }
 0x4f1   : > { %5664 = vtanh.f32 %v2165_v43  ;;  %v7471_v43 = vld [vmem:[#allocation18 + $0xa8] ss:$16 sps:$4 sm:$0xff]  }
 0x4f8   : > { %v5659_v32 = vpop.eup %5658 }
 0x4f9   : > { %v5661_v35 = vpop.eup %5660  ;;  %v2174_v49 = vadd.f32 1.0, %v5659_v32 }
 0x4fa   : > { %v2180_v6 = vadd.f32 1.0, %v5661_v35  ;;  %v5663_v39 = vpop.eup %5662  ;;  %v7495_v35 = vld [vmem:[#allocation18 + $0xe0] ss:$16 sps:$4 sm:$0xff]  }
 0x4fb   : > { %5666 = vrcp.f32 %v2174_v49  ;;  %v5665_v4 = vpop.eup %5664  ;;  %v2187_v11 = vadd.f32 1.0, %v5663_v39  ;;  %v7497_v49 = vld [vmem:[#allocation18 + $0xe8] ss:$16 sps:$4 sm:$0xff]   ;;  %v7503_v39 = vld [vmem:[#allocation18 + $0x10c] ss:$16 sps:$4 sm:$0xff]  }
 0x4fc   : > { %5668 = vrcp.f32 %v2180_v6  ;;  %v7501_v6 = vld [vmem:[#allocation18 + $0x104] ss:$16 sps:$4 sm:$0xff]  }
 0x4fd   : > { %5670 = vrcp.f32 %v2187_v11  ;;  %v7514_v11 = vld [vmem:[#allocation18 + $0x124] ss:$16 sps:$4 sm:$0xff]  }
 0x505   : > { %v5667_v62 = vpop.eup %5666 }
 0x506   : > { %v5669_v7 = vpop.eup %5668  ;;  %v2191_v59 = vmul.f32 %v5667_v62, %v5665_v4 }
 0x507   : > { %v2190_v1 = vmul.f32 %v5669_v7, %v7292_v44  ;;  %v5671_v48 = vpop.eup %5670  ;;  %v7420_v44 = vld [vmem:[#allocation18 + $0x20] ss:$16 sps:$4 sm:$0xff]  }
 0x508   : > { %v7508_v7 = vld [vmem:[#allocation18 + $0x100] ss:$16 sps:$4 sm:$0xff]  }
 0x509   : > { %v7403_v3 = vadd.f32 %v2191_v59, %v2190_v1  ;;  %v7510_v59 = vld [vmem:[#allocation18 + $0x108] ss:$16 sps:$4 sm:$0xff]   ;;  %v7516_v1 = vld [vmem:[#allocation18 + $0x12c] ss:$16 sps:$4 sm:$0xff]  }
 0x50b   : > { %8039 = vst [vmem:[#allocation58_spill] sm:$0xff] %v7403_v3  ;;  %5672 = vtanh.f32 %v7403_v3  ;;  %v7592_v3 = vld [vmem:[#allocation18 + $0x1ec] ss:$16 sps:$4 sm:$0xff]  }
 0x515   : > { %v5673_v14 = vpop.eup %5672 }
 0x516   : > { %v2194_v17 = vmul.f32 %v5673_v14, %v5671_v48 }
 0x518   : > { %v7410_v61 = vpack.c.bf16 %v2194_v17, %v2194_v17 }
 0x51a   : > { %2917 = vmatmul.mubr.bf16.vlgmr.msra.gmra.mrb[24].mxu0 %v7410_v61  ;;  %2958 = vmatmul.mubr.bf16.vlgmr.msra.gmra.mrb[32].mxu1 %v7410_v61 }
 0x51b   : > { %3376 = vmatpush1.bf16.msra.mxu0 %v7406_v13  ;;  %3417 = vmatpush1.bf16.msra.mxu1 %v7408_v28 }
 0x51c   : > { %3377 = vmatprep.subr.bf16.mxu0 %v7412_v36  ;;  %3418 = vmatprep.subr.bf16.mxu1 %v7414_v51 }
 0x51f   : > { %3378 = vmatpush1.bf16.msra.mxu0 %v7420_v44  ;;  %3419 = vmatpush1.bf16.msra.mxu1 %v7422_v60 }
 0x520   : > { %3379 = vmatprep.subr.bf16.mxu0 %v7426_v52  ;;  %3420 = vmatprep.subr.bf16.mxu1 %v7428_v63 }
 0x523   : > { %3380 = vmatpush1.bf16.msra.mxu0 %v7432_v15  ;;  %3421 = vmatpush1.bf16.msra.mxu1 %v7434_v12 }
 0x524   : > { %3381 = vmatprep.subr.bf16.mxu0 %v7438_v37  ;;  %3422 = vmatprep.subr.bf16.mxu1 %v7440_v53 }
 0x527   : > { %3382 = vmatpush1.bf16.msra.mxu0 %v7444_v54  ;;  %3423 = vmatpush1.bf16.msra.mxu1 %v7446_v38 }
 0x528   : > { %3383 = vmatprep.subr.bf16.mxu0 %v7450_v55  ;;  %3424 = vmatprep.subr.bf16.mxu1 %v7452_v56 }
 0x52a   : > { %v2614_v23 = vpop.f32.mrb[20].mxu0  ;;  %v2655_v26 = vpop.f32.mrb[28].mxu1 }
 0x52b   : > { %v2615_v40 = vadd.f32 %v2614_v23, %v7313_v21  ;;  %v2616_v8 = vpop.f32.mrb[21].mxu0  ;;  %v2657_v18 = vpop.f32.mrb[29].mxu1  ;;  %3384 = vmatpush1.bf16.msra.mxu0 %v7456_v10  ;;  %3425 = vmatpush1.bf16.msra.mxu1 %v7458_v57  ;;  %v2656_v62 = vadd.f32 %v2655_v26, %v7340_v2  ;;  %v7520_v26 = vld [vmem:[#allocation18 + $0x120] ss:$16 sps:$4 sm:$0xff]   ;;  %v7558_v2 = vld [vmem:[#allocation18 + $0x188] ss:$16 sps:$4 sm:$0xff]  }
 0x52c   : > { %v2617_v16 = vadd.f32 %v2616_v8, %v7319_v27  ;;  %v2618_v45 = vpop.f32.mrb[22].mxu0  ;;  %v2659_v46 = vpop.f32.mrb[30].mxu1  ;;  %3385 = vmatprep.subr.bf16.mxu0 %v7462_v58  ;;  %3426 = vmatprep.subr.bf16.mxu1 %v7464_v9  ;;  %v2658_v32 = vadd.f32 %v2657_v18, %v7331_v50  ;;  %v7526_v8 = vld [vmem:[#allocation18 + $0x144] ss:$16 sps:$4 sm:$0xff]   ;;  %v7528_v18 = vld [vmem:[#allocation18 + $0x14c] ss:$16 sps:$4 sm:$0xff]  }
 0x52d   : > { %v4808_v25 = vmul.f32 -1.442695, %v2615_v40  ;;  %v2619_v29 = vpop.f32.mrb[23].mxu0  ;;  %v2660_v31 = vpop.f32.mrb[31].mxu1  ;;  %v7522_v40 = vld [vmem:[#allocation18 + $0x128] ss:$16 sps:$4 sm:$0xff]  }
 0x52e   : > { %v4809_v20 = vmul.f32 -1.442695, %v2617_v16  ;;  %v4810_v4 = vmul.f32 -1.442695, %v2658_v32  ;;  %v7532_v16 = vld [vmem:[#allocation18 + $0x140] ss:$16 sps:$4 sm:$0xff]  }
 0x52f   : > { %5674 = vpow2.f32 %v4808_v25  ;;  %3386 = vmatpush1.bf16.msra.mxu0 %v7469_v41  ;;  %3427 = vmatpush1.bf16.msra.mxu1 %v7471_v43  ;;  %v7534_v45 = vld [vmem:[#allocation18 + $0x148] ss:$16 sps:$4 sm:$0xff]   ;;  %v7538_v46 = vld [vmem:[#allocation18 + $0x164] ss:$16 sps:$4 sm:$0xff]   ;;  %v7540_v25 = vld [vmem:[#allocation18 + $0x16c] ss:$16 sps:$4 sm:$0xff]  }
 0x530   : > { %5676 = vpow2.f32 %v4809_v20  ;;  %3387 = vmatprep.subr.bf16.mxu0 %v7476_v47  ;;  %3428 = vmatprep.subr.bf16.mxu1 %v7478_v19  ;;  %v7544_v29 = vld [vmem:[#allocation18 + $0x160] ss:$16 sps:$4 sm:$0xff]   ;;  %v7546_v31 = vld [vmem:[#allocation18 + $0x168] ss:$16 sps:$4 sm:$0xff]   ;;  %v7550_v32 = vld [vmem:[#allocation18 + $0x184] ss:$16 sps:$4 sm:$0xff]  }
 0x531   : > { %5678 = vpow2.f32 %v4810_v4  ;;  %v7552_v4 = vld [vmem:[#allocation18 + $0x18c] ss:$16 sps:$4 sm:$0xff]   ;;  %v7563_v27 = vld [vmem:[#allocation18 + $0x1a4] ss:$16 sps:$4 sm:$0xff]  }
 0x532   : > { %5680 = vtanh.f32 %v2656_v62  ;;  %v7565_v21 = vld [vmem:[#allocation18 + $0x1ac] ss:$16 sps:$4 sm:$0xff]  }
 0x533   : > { %3388 = vmatpush1.bf16.msra.mxu0 %v7482_v33  ;;  %3429 = vmatpush1.bf16.msra.mxu1 %v7484_v22 }
 0x534   : > { %3389 = vmatprep.subr.bf16.mxu0 %v7488_v34  ;;  %3430 = vmatprep.subr.bf16.mxu1 %v7490_v30 }
 0x537   : > { %3390 = vmatpush1.bf16.msra.mxu0 %v7495_v35  ;;  %3431 = vmatpush1.bf16.msra.mxu1 %v7497_v49 }
 0x538   : > { %3391 = vmatprep.subr.bf16.mxu0 %v7501_v6  ;;  %3432 = vmatprep.subr.bf16.mxu1 %v7503_v39 }
 0x539   : > { %v5675_v48 = vpop.eup %5674 }
 0x53a   : > { %v5677_v14 = vpop.eup %5676  ;;  %v2665_v17 = vadd.f32 1.0, %v5675_v48 }
 0x53b   : > { %v2671_v23 = vadd.f32 1.0, %v5677_v14  ;;  %3392 = vmatpush1.bf16.msra.mxu0 %v7508_v7  ;;  %3433 = vmatpush1.bf16.msra.mxu1 %v7510_v59  ;;  %v5679_v20 = vpop.eup %5678 }
 0x53c   : > { %5682 = vrcp.f32 %v2665_v17  ;;  %3393 = vmatprep.subr.bf16.mxu0 %v7514_v11  ;;  %3434 = vmatprep.subr.bf16.mxu1 %v7516_v1  ;;  %v5681_v62 = vpop.eup %5680 }
 0x53d   : > { %5684 = vrcp.f32 %v2671_v23  ;;  %v2678_v23 = vadd.f32 1.0, %v5679_v20  ;;  %v7571_v20 = vld [vmem:[#allocation18 + $0x1a0] ss:$16 sps:$4 sm:$0xff]  }
 0x53e   : > { %8041 = vst [vmem:[#allocation60_spill] sm:$0xff] %v7571_v20 }
 0x53f   : > { %3394 = vmatpush1.bf16.msra.mxu0 %v7520_v26  ;;  %3435 = vmatpush1.bf16.msra.mxu1 %v7522_v40  ;;  %5686 = vrcp.f32 %v2678_v23  ;;  %v7590_v23 = vld [vmem:[#allocation18 + $0x1e4] ss:$16 sps:$4 sm:$0xff]  }
 0x540   : > { %3395 = vmatprep.subr.bf16.mxu0 %v7526_v8  ;;  %3436 = vmatprep.subr.bf16.mxu1 %v7528_v18 }
 0x543   : > { %3396 = vmatpush1.bf16.msra.mxu0 %v7532_v16  ;;  %3437 = vmatpush1.bf16.msra.mxu1 %v7534_v45 }
 0x544   : > { %3397 = vmatprep.subr.bf16.mxu0 %v7538_v46  ;;  %3438 = vmatprep.subr.bf16.mxu1 %v7540_v25 }
 0x546   : > { %v5683_v48 = vpop.eup %5682 }
 0x547   : > { %v5685_v14 = vpop.eup %5684  ;;  %v2682_v17 = vmul.f32 %v5683_v48, %v5681_v62  ;;  %3398 = vmatpush1.bf16.msra.mxu0 %v7544_v29  ;;  %3439 = vmatpush1.bf16.msra.mxu1 %v7546_v31  ;;  %v7573_v48 = vld [vmem:[#allocation18 + $0x1a8] ss:$16 sps:$4 sm:$0xff]  }
 0x548   : > { %v2681_v50 = vmul.f32 %v5685_v14, %v7367_v0  ;;  %3399 = vmatprep.subr.bf16.mxu0 %v7550_v32  ;;  %3440 = vmatprep.subr.bf16.mxu1 %v7552_v4  ;;  %8042 = vst [vmem:[#allocation61_spill] sm:$0xff] %v7573_v48  ;;  %v7577_v0 = vld [vmem:[#allocation18 + $0x1c4] ss:$16 sps:$4 sm:$0xff]   ;;  %v7579_v14 = vld [vmem:[#allocation18 + $0x1cc] ss:$16 sps:$4 sm:$0xff]  }
 0x549   : > { %8043 = vst [vmem:[#allocation62_spill] sm:$0xff] %v7577_v0  ;;  %8044 = vst [vmem:[#allocation63_spill] sm:$0xff] %v7579_v14 }
 0x54a   : > { %v7567_v62 = vadd.f32 %v2682_v17, %v2681_v50  ;;  %v7584_v50 = vld [vmem:[#allocation18 + $0x1c0] ss:$16 sps:$4 sm:$0xff]   ;;  %v7586_v17 = vld [vmem:[#allocation18 + $0x1c8] ss:$16 sps:$4 sm:$0xff]  }
 0x54b   : > { %3400 = vmatpush1.bf16.msra.mxu0 %v7556_v42  ;;  %3441 = vmatpush1.bf16.msra.mxu1 %v7558_v2  ;;  %8045 = vst [vmem:[#allocation64_spill] sm:$0xff] %v7586_v17 }
 0x54c   : > { %8040 = vst [vmem:[#allocation59_spill] sm:$0xff] %v7567_v62  ;;  %3401 = vmatprep.subr.bf16.mxu0 %v7563_v27  ;;  %3442 = vmatprep.subr.bf16.mxu1 %v7565_v21  ;;  %5688 = vtanh.f32 %v7567_v62  ;;  %v7596_v62 = vld [vmem:[#allocation18 + $0x1e0] ss:$16 sps:$4 sm:$0xff]  }
 0x54f   : > { %3402 = vmatpush1.bf16.msra.mxu0 %v7571_v20  ;;  %3443 = vmatpush1.bf16.msra.mxu1 %v7573_v48  ;;  %v7598_v20 = vld [vmem:[#allocation18 + $0x1e8] ss:$16 sps:$4 sm:$0xff]   ;;  %v5687_v48 = vpop.eup %5686 }
 0x550   : > { %3403 = vmatprep.subr.bf16.mxu0 %v7577_v0  ;;  %3444 = vmatprep.subr.bf16.mxu1 %v7579_v14 }
 0x553   : > { %3404 = vmatpush1.bf16.msra.mxu0 %v7584_v50  ;;  %3445 = vmatpush1.bf16.msra.mxu1 %v7586_v17 }
 0x554   : > { %3405 = vmatprep.subr.bf16.mxu0 %v7590_v23  ;;  %3446 = vmatprep.subr.bf16.mxu1 %v7592_v3 }
 0x556   : > { %v5689_v0 = vpop.eup %5688 }
 0x557   : > { %3406 = vmatpush1.bf16.msra.mxu0 %v7596_v62  ;;  %3447 = vmatpush1.bf16.msra.mxu1 %v7598_v20  ;;  %v7604_v14 = vmul.f32 %v5689_v0, %v5687_v48  ;;  %v8059_v48 = vld [vmem:[#allocation91_spill] sm:$0xff] }
 0x558   : > { %3868 = vmatprep.subr.bf16.mxu0 %v7392_v24  ;;  %3909 = vmatprep.subr.bf16.mxu1 %v7394_v5  ;;  %v8046_v24 = vld [vmem:[#allocation60_spill] sm:$0xff]  ;;  %v8047_v5 = vld [vmem:[#allocation61_spill] sm:$0xff] }
 0x559   : > { %v2990_v17 = vpack.c.bf16 %v7604_v14, %v7604_v14 }
 0x55b   : > { %3407 = vmatprep.mubr.bf16.mxu0 %v2990_v17  ;;  %3448 = vmatprep.mubr.bf16.mxu1 %v2990_v17 }
 0x55c   : > { %3408 = vmatmul.mubr.bf16.vlgmr.msra.gmra.mrb[28].mxu0 %v7410_v61  ;;  %3449 = vmatmul.mubr.bf16.vlgmr.msra.gmra.mrb[36].mxu1 %v7410_v61  ;;  %v8050_v61 = vld [vmem:[#allocation64_spill] sm:$0xff] }
 0x55d   : > { %3869 = vmatpush1.bf16.msra.mxu0 %v7406_v13  ;;  %3910 = vmatpush1.bf16.msra.mxu1 %v7408_v28  ;;  %v8048_v13 = vld [vmem:[#allocation62_spill] sm:$0xff]  ;;  %v8049_v28 = vld [vmem:[#allocation63_spill] sm:$0xff] }
 0x55e   : > { %3870 = vmatprep.subr.bf16.mxu0 %v7412_v36  ;;  %3911 = vmatprep.subr.bf16.mxu1 %v7414_v51  ;;  %v8052_v51 = vld [vmem:[#allocation51_spill] sm:$0xff] }
 0x561   : > { %3871 = vmatpush1.bf16.msra.mxu0 %v7420_v44  ;;  %3912 = vmatpush1.bf16.msra.mxu1 %v7422_v60 }
 0x562   : > { %3872 = vmatprep.subr.bf16.mxu0 %v7426_v52  ;;  %3913 = vmatprep.subr.bf16.mxu1 %v7428_v63  ;;  %v8053_v63 = vld [vmem:[#allocation56_spill] sm:$0xff] }
 0x565   : > { %3873 = vmatpush1.bf16.msra.mxu0 %v7432_v15  ;;  %3914 = vmatpush1.bf16.msra.mxu1 %v7434_v12  ;;  %v8054_v12 = vld [vmem:[#allocation52_spill] sm:$0xff] }
 0x566   : > { %3874 = vmatprep.subr.bf16.mxu0 %v7438_v37  ;;  %3915 = vmatprep.subr.bf16.mxu1 %v7440_v53 }
 0x569   : > { %3875 = vmatpush1.bf16.msra.mxu0 %v7444_v54  ;;  %3916 = vmatpush1.bf16.msra.mxu1 %v7446_v38 }
 0x56a   : > { %3876 = vmatprep.subr.bf16.mxu0 %v7450_v55  ;;  %3917 = vmatprep.subr.bf16.mxu1 %v7452_v56 }
 0x56d   : > { %3877 = vmatpush1.bf16.msra.mxu0 %v7456_v10  ;;  %3918 = vmatpush1.bf16.msra.mxu1 %v7458_v57 }
 0x56e   : > { %3878 = vmatprep.subr.bf16.mxu0 %v7462_v58  ;;  %3919 = vmatprep.subr.bf16.mxu1 %v7464_v9 }
 0x571   : > { %3879 = vmatpush1.bf16.msra.mxu0 %v7469_v41  ;;  %3920 = vmatpush1.bf16.msra.mxu1 %v7471_v43 }
 0x572   : > { %3880 = vmatprep.subr.bf16.mxu0 %v7476_v47  ;;  %3921 = vmatprep.subr.bf16.mxu1 %v7478_v19 }
 0x575   : > { %3881 = vmatpush1.bf16.msra.mxu0 %v7482_v33  ;;  %3922 = vmatpush1.bf16.msra.mxu1 %v7484_v22 }
 0x576   : > { %3882 = vmatprep.subr.bf16.mxu0 %v7488_v34  ;;  %3923 = vmatprep.subr.bf16.mxu1 %v7490_v30  ;;  %v8055_v30 = vld [vmem:[#allocation58_spill] sm:$0xff] }
 0x579   : > { %3883 = vmatpush1.bf16.msra.mxu0 %v7495_v35  ;;  %3924 = vmatpush1.bf16.msra.mxu1 %v7497_v49 }
 0x57a   : > { %3884 = vmatprep.subr.bf16.mxu0 %v7501_v6  ;;  %3925 = vmatprep.subr.bf16.mxu1 %v7503_v39 }
 0x57d   : > { %3885 = vmatpush1.bf16.msra.mxu0 %v7508_v7  ;;  %3926 = vmatpush1.bf16.msra.mxu1 %v7510_v59 }
 0x57e   : > { %3886 = vmatprep.subr.bf16.mxu0 %v7514_v11  ;;  %3927 = vmatprep.subr.bf16.mxu1 %v7516_v1  ;;  %v8056_v1 = vld [vmem:[#allocation88_spill] sm:$0xff] }
 0x581   : > { %3887 = vmatpush1.bf16.msra.mxu0 %v7520_v26  ;;  %3928 = vmatpush1.bf16.msra.mxu1 %v7522_v40 }
 0x582   : > { %3888 = vmatprep.subr.bf16.mxu0 %v7526_v8  ;;  %3929 = vmatprep.subr.bf16.mxu1 %v7528_v18  ;;  %v8057_v18 = vld [vmem:[#allocation89_spill] sm:$0xff] }
 0x585   : > { %3889 = vmatpush1.bf16.msra.mxu0 %v7532_v16  ;;  %3930 = vmatpush1.bf16.msra.mxu1 %v7534_v45 }
 0x586   : > { %3890 = vmatprep.subr.bf16.mxu0 %v7538_v46  ;;  %3931 = vmatprep.subr.bf16.mxu1 %v7540_v25 }
 0x589   : > { %3891 = vmatpush1.bf16.msra.mxu0 %v7544_v29  ;;  %3932 = vmatpush1.bf16.msra.mxu1 %v7546_v31 }
 0x58a   : > { %3892 = vmatprep.subr.bf16.mxu0 %v7550_v32  ;;  %3933 = vmatprep.subr.bf16.mxu1 %v7552_v4  ;;  %v8058_v4 = vld [vmem:[#allocation90_spill] sm:$0xff] }
 0x58d   : > { %3893 = vmatpush1.bf16.msra.mxu0 %v7556_v42  ;;  %3934 = vmatpush1.bf16.msra.mxu1 %v7558_v2  ;;  %v8051_v42 = vld [vmem:[#allocation55_spill] sm:$0xff] }
 0x58e   : > { %3894 = vmatprep.subr.bf16.mxu0 %v7563_v27  ;;  %3935 = vmatprep.subr.bf16.mxu1 %v7565_v21  ;;  %v7674_v21 = vld [vmem:[#allocation23] sm:$0xff]  }
 0x591   : > { %3895 = vmatpush1.bf16.msra.mxu0 %v8046_v24  ;;  %3936 = vmatpush1.bf16.msra.mxu1 %v8047_v5 }
 0x592   : > { %3896 = vmatprep.subr.bf16.mxu0 %v8048_v13  ;;  %3937 = vmatprep.subr.bf16.mxu1 %v8049_v28 }
 0x595   : > { %3897 = vmatpush1.bf16.msra.mxu0 %v7584_v50  ;;  %3938 = vmatpush1.bf16.msra.mxu1 %v8050_v61 }
 0x596   : > { %3898 = vmatprep.subr.bf16.mxu0 %v7590_v23  ;;  %3939 = vmatprep.subr.bf16.mxu1 %v7592_v3 }
 0x599   : > { %3899 = vmatpush1.bf16.msra.mxu0 %v7596_v62  ;;  %3940 = vmatpush1.bf16.msra.mxu1 %v7598_v20 }
 0x59a   : > { %5027 = vmatprep.subr.bf16.mxu0 %v7674_v21 }
 0x5ed   : > { %v2918_v27 = vpop.f32.mrb[24].mxu0  ;;  %v2959_v2 = vpop.f32.mrb[32].mxu1 }
 0x5ee   : > { %v2919_v36 = vadd.f32 %v2918_v27, %v8051_v42  ;;  %v2960_v44 = vadd.f32 %v2959_v2, %v8052_v51  ;;  %v2920_v60 = vpop.f32.mrb[25].mxu0  ;;  %v2961_v52 = vpop.f32.mrb[33].mxu1  ;;  %v8060_v42 = vld [vmem:[#allocation59_spill] sm:$0xff] }
 0x5ef   : > { %v2921_v15 = vadd.f32 %v2920_v60, %v8053_v63  ;;  %v2962_v3 = vadd.f32 %v2961_v52, %v8054_v12  ;;  %v2922_v37 = vpop.f32.mrb[26].mxu0  ;;  %v2963_v53 = vpop.f32.mrb[34].mxu1 }
 0x5f0   : > { %v4843_v54 = vmul.f32 -1.442695, %v2919_v36  ;;  %v2923_v38 = vpop.f32.mrb[27].mxu0  ;;  %v2964_v55 = vpop.f32.mrb[35].mxu1  ;;  %v5594_v37 = vld [vmem:[#allocation23 + $0x10] sm:$0xff]   ;;  %v5595_v53 = vld [vmem:[#allocation23 + $0x18] sm:$0xff]  }
 0x5f1   : > { %v4844_v56 = vmul.f32 -1.442695, %v2921_v15  ;;  %v4845_v10 = vmul.f32 -1.442695, %v2962_v3  ;;  %v5600_v15 = vld [vmem:[%s6896_s0] sm:$0xff]   ;;  %v5598_v55 = vld [vmem:[#allocation23 + $0x30] sm:$0xff]  }
 0x5f2   : > { %5690 = vpow2.f32 %v4843_v54  ;;  %v5593_v3 = vld [vmem:[#allocation23 + $0x8] sm:$0xff]   ;;  %v5596_v54 = vld [vmem:[#allocation23 + $0x20] sm:$0xff]  }
 0x5f3   : > { %5692 = vpow2.f32 %v4844_v56  ;;  %v5597_v38 = vld [vmem:[#allocation23 + $0x28] sm:$0xff]   ;;  %v5599_v56 = vld [vmem:[#allocation23 + $0x38] sm:$0xff]  }
 0x5f4   : > { %5694 = vpow2.f32 %v4845_v10  ;;  %v8061_v10 = vld [vmem:[#allocation57_spill] sm:$0xff] }
 0x5f5   : > { %5696 = vtanh.f32 %v2960_v44 }
 0x5fc   : > { %v5691_v57 = vpop.eup %5690 }
 0x5fd   : > { %v5693_v58 = vpop.eup %5692  ;;  %v2969_v9 = vadd.f32 1.0, %v5691_v57  ;;  %v3983_v57 = vpack.c.bf16 %v7604_v14, %v8061_v10  ;;  %v5608_v14 = vld [vmem:[#allocation21 + $0x30] sm:$0xff]  }
 0x5fe   : > { %v2975_v41 = vadd.f32 1.0, %v5693_v58  ;;  %v5695_v43 = vpop.eup %5694  ;;  %v5602_v58 = vld [vmem:[#allocation21] sm:$0xff]  }
 0x5ff   : > { %5698 = vrcp.f32 %v2969_v9  ;;  %v5697_v47 = vpop.eup %5696  ;;  %v2982_v34 = vadd.f32 1.0, %v5695_v43  ;;  %v5603_v9 = vld [vmem:[#allocation21 + $0x8] sm:$0xff]   ;;  %v5605_v43 = vld [vmem:[#allocation21 + $0x18] sm:$0xff]  }
 0x600   : > { %5700 = vrcp.f32 %v2975_v41  ;;  %v5604_v41 = vld [vmem:[#allocation21 + $0x10] sm:$0xff]  }
 0x601   : > { %5702 = vrcp.f32 %v2982_v34 }
 0x609   : > { %v5699_v19 = vpop.eup %5698 }
 0x60a   : > { %v5701_v33 = vpop.eup %5700  ;;  %v2986_v22 = vmul.f32 %v5699_v19, %v5697_v47  ;;  %v5606_v47 = vld [vmem:[#allocation21 + $0x20] sm:$0xff]   ;;  %v5607_v19 = vld [vmem:[#allocation21 + $0x28] sm:$0xff]  }
 0x60b   : > { %v2985_v35 = vmul.f32 %v5701_v33, %v8055_v30  ;;  %v5703_v6 = vpop.eup %5702  ;;  %v5609_v33 = vld [vmem:[#allocation21 + $0x38] sm:$0xff]  }
 0x60d   : > { %v2987_v49 = vadd.f32 %v2986_v22, %v2985_v35 }
 0x60f   : > { %5704 = vtanh.f32 %v2987_v49  ;;  %3976 = vst [vmem:[#allocation5] sm:$0xff] %v2987_v49 }
 0x619   : > { %v5705_v39 = vpop.eup %5704 }
 0x61a   : > { %v2989_v7 = vmul.f32 %v5705_v39, %v5703_v6 }
 0x61c   : > { %3975 = vst [vmem:[#allocation4] sm:$0xff] %v2989_v7  ;;  %v3482_v12 = vpack.c.bf16 %v2989_v7, %v2989_v7 }
 0x62f   : > { %v3409_v59 = vpop.f32.mrb[28].mxu0  ;;  %v3450_v11 = vpop.f32.mrb[36].mxu1 }
 0x630   : > { %v3410_v26 = vadd.f32 %v3409_v59, %v8056_v1  ;;  %v3411_v40 = vpop.f32.mrb[29].mxu0  ;;  %v3452_v8 = vpop.f32.mrb[37].mxu1  ;;  %v3451_v0 = vadd.f32 %v3450_v11, %v8059_v48 }
 0x631   : > { %v3412_v16 = vadd.f32 %v3411_v40, %v8057_v18  ;;  %v3413_v45 = vpop.f32.mrb[30].mxu0  ;;  %v3454_v46 = vpop.f32.mrb[38].mxu1  ;;  %v3453_v62 = vadd.f32 %v3452_v8, %v8058_v4 }
 0x632   : > { %v4910_v25 = vmul.f32 -1.442695, %v3410_v26  ;;  %v3414_v29 = vpop.f32.mrb[31].mxu0  ;;  %v3455_v31 = vpop.f32.mrb[39].mxu1 }
 0x633   : > { %v4911_v32 = vmul.f32 -1.442695, %v3412_v16  ;;  %v4912_v20 = vmul.f32 -1.442695, %v3453_v62 }
 0x634   : > { %5706 = vpow2.f32 %v4910_v25 }
 0x635   : > { %5708 = vpow2.f32 %v4911_v32 }
 0x636   : > { %5710 = vpow2.f32 %v4912_v20 }
 0x637   : > { %5712 = vtanh.f32 %v3451_v0 }
 0x63e   : > { %v5707_v50 = vpop.eup %5706 }
 0x63f   : > { %v5709_v17 = vpop.eup %5708  ;;  %v3460_v23 = vadd.f32 1.0, %v5707_v50 }
 0x640   : > { %v3466_v24 = vadd.f32 1.0, %v5709_v17  ;;  %v5711_v5 = vpop.eup %5710 }
 0x641   : > { %5714 = vrcp.f32 %v3460_v23  ;;  %v5713_v13 = vpop.eup %5712  ;;  %v3473_v2 = vadd.f32 1.0, %v5711_v5  ;;  %v4998_v5 = vld [vmem:[#allocation24] ss:$0 sm:$0xff] }
 0x642   : > { %5716 = vrcp.f32 %v3466_v24 }
 0x643   : > { %5718 = vrcp.f32 %v3473_v2 }
 0x64b   : > { %v5715_v28 = vpop.eup %5714 }
 0x64c   : > { %v5717_v61 = vpop.eup %5716  ;;  %v3477_v27 = vmul.f32 %v5715_v28, %v5713_v13 }
 0x64d   : > { %v3476_v36 = vmul.f32 %v5717_v61, %v8060_v42  ;;  %v5719_v44 = vpop.eup %5718 }
 0x64f   : > { %v7687_v51 = vadd.f32 %v3477_v27, %v3476_v36 }
 0x651   : > { %5720 = vtanh.f32 %v7687_v51 }
 0x65b   : > { %v5721_v60 = vpop.eup %5720 }
 0x65c   : > { %v7690_v52 = vmul.f32 %v5721_v60, %v5719_v44 }
 0x65e   : > { %v3483_v63 = vpack.c.bf16 %v7690_v52, %v7690_v52 }
 0x660   : > { %3900 = vmatprep.mubr.bf16.mxu0 %v3483_v63  ;;  %3941 = vmatprep.mubr.bf16.mxu1 %v3483_v63 }
 0x661   : > { %3901 = vmatmul.mubr.bf16.vlgmr.msra.gmra.mrb[32].mxu0 %v3482_v12  ;;  %3942 = vmatmul.mubr.bf16.vlgmr.msra.gmra.mrb[40].mxu1 %v3482_v12 }
 0x662   : > { %5028 = vmatpush3.bf16.msra.mxu0 %v7674_v21  ;;  %5043 = vmatprep.mubr.bf16.mxu0 %v5600_v15  ;;  %v5601_v21 = vld [vmem:[%s6896_s0 + $0x8] sm:$0xff]  }
 0x663   : > { %5029 = vmatprep.subr.bf16.mxu0 %v5593_v3 }
 0x666   : > { %5030 = vmatpush3.bf16.msra.mxu0 %v5593_v3 }
 0x667   : > { %5031 = vmatprep.subr.bf16.mxu0 %v5594_v37 }
 0x66a   : > { %5032 = vmatpush3.bf16.msra.mxu0 %v5594_v37 }
 0x66b   : > { %5033 = vmatprep.subr.bf16.mxu0 %v5595_v53 }
 0x66e   : > { %5034 = vmatpush3.bf16.msra.mxu0 %v5595_v53 }
 0x66f   : > { %5035 = vmatprep.subr.bf16.mxu0 %v5596_v54 }
 0x672   : > { %5036 = vmatpush3.bf16.msra.mxu0 %v5596_v54 }
 0x673   : > { %5037 = vmatprep.subr.bf16.mxu0 %v5597_v38 }
 0x676   : > { %5038 = vmatpush3.bf16.msra.mxu0 %v5597_v38 }
 0x677   : > { %5039 = vmatprep.subr.bf16.mxu0 %v5598_v55 }
 0x67a   : > { %5040 = vmatpush3.bf16.msra.mxu0 %v5598_v55 }
 0x67b   : > { %5041 = vmatprep.subr.bf16.mxu0 %v5599_v56 }
 0x67e   : > { %5042 = vmatpush3.bf16.msra.mxu0 %v5599_v56 }
 0x67f   : > { %5047 = vmatprep.subr.bf16.mxu0 %v5602_v58 }
 0x681   : > { %5044 = vmatmul.mubr.bf16.vlgmr.msra.gmra.mrb[36].mxu0 %v5601_v21 }
 0x682   : > { %5063 = vmatprep.mubr.bf16.mxu0 %v3983_v57  ;;  %5048 = vmatpush3.bf16.msra.mxu0 %v5602_v58 }
 0x683   : > { %5049 = vmatprep.subr.bf16.mxu0 %v5603_v9 }
 0x686   : > { %5050 = vmatpush3.bf16.msra.mxu0 %v5603_v9 }
 0x687   : > { %5051 = vmatprep.subr.bf16.mxu0 %v5604_v41 }
 0x68a   : > { %5052 = vmatpush3.bf16.msra.mxu0 %v5604_v41 }
 0x68b   : > { %5053 = vmatprep.subr.bf16.mxu0 %v5605_v43 }
 0x68e   : > { %5054 = vmatpush3.bf16.msra.mxu0 %v5605_v43 }
 0x68f   : > { %5055 = vmatprep.subr.bf16.mxu0 %v5606_v47 }
 0x692   : > { %5056 = vmatpush3.bf16.msra.mxu0 %v5606_v47 }
 0x693   : > { %5057 = vmatprep.subr.bf16.mxu0 %v5607_v19 }
 0x696   : > { %5058 = vmatpush3.bf16.msra.mxu0 %v5607_v19 }
 0x697   : > { %5059 = vmatprep.subr.bf16.mxu0 %v5608_v14 }
 0x69a   : > { %5060 = vmatpush3.bf16.msra.mxu0 %v5608_v14 }
 0x69b   : > { %5061 = vmatprep.subr.bf16.mxu0 %v5609_v33 }
 0x69e   : > { %5062 = vmatpush3.bf16.msra.mxu0 %v5609_v33 }
 0x734   : > { %v3902_v22 = vpop.f32.mrb[32].mxu0  ;;  %v3943_v34 = vpop.f32.mrb[40].mxu1 }
 0x735   : > { %v3903_v30 = vadd.f32 %v3902_v22, %v8056_v1  ;;  %v3904_v35 = vpop.f32.mrb[33].mxu0  ;;  %v3945_v49 = vpop.f32.mrb[41].mxu1  ;;  %v3944_v45 = vadd.f32 %v3943_v34, %v8059_v48 }
 0x736   : > { %v3905_v6 = vadd.f32 %v3904_v35, %v8057_v18  ;;  %v3906_v39 = vpop.f32.mrb[34].mxu0  ;;  %v3947_v7 = vpop.f32.mrb[42].mxu1  ;;  %v3946_v8 = vadd.f32 %v3945_v49, %v8058_v4 }
 0x737   : > { %v4977_v59 = vmul.f32 -1.442695, %v3903_v30  ;;  %v3907_v11 = vpop.f32.mrb[35].mxu0  ;;  %v3948_v26 = vpop.f32.mrb[43].mxu1 }
 0x738   : > { %v4978_v40 = vmul.f32 -1.442695, %v3905_v6  ;;  %v4979_v16 = vmul.f32 -1.442695, %v3946_v8 }
 0x739   : > { %5722 = vpow2.f32 %v4977_v59 }
 0x73a   : > { %5724 = vpow2.f32 %v4978_v40 }
 0x73b   : > { %5726 = vpow2.f32 %v4979_v16 }
 0x73c   : > { %5728 = vtanh.f32 %v3944_v45 }
 0x743   : > { %v5723_v46 = vpop.eup %5722 }
 0x744   : > { %v5725_v25 = vpop.eup %5724  ;;  %v3953_v1 = vadd.f32 1.0, %v5723_v46 }
 0x745   : > { %v3959_v29 = vadd.f32 1.0, %v5725_v25  ;;  %v5727_v18 = vpop.eup %5726 }
 0x746   : > { %5730 = vrcp.f32 %v3953_v1  ;;  %v5729_v31 = vpop.eup %5728  ;;  %v3966_v0 = vadd.f32 1.0, %v5727_v18 }
 0x747   : > { %5732 = vrcp.f32 %v3959_v29 }
 0x748   : > { %5734 = vrcp.f32 %v3966_v0 }
 0x750   : > { %v5731_v32 = vpop.eup %5730 }
 0x751   : > { %v5733_v62 = vpop.eup %5732  ;;  %v3970_v20 = vmul.f32 %v5731_v32, %v5729_v31 }
 0x752   : > { %v3969_v50 = vmul.f32 %v5733_v62, %v7687_v51  ;;  %v5735_v48 = vpop.eup %5734 }
 0x754   : > { %v3971_v4 = vadd.f32 %v3970_v20, %v3969_v50 }
 0x756   : > { %5736 = vtanh.f32 %v3971_v4  ;;  %3978 = vst [vmem:[#allocation5 + $0x8] sm:$0xff] %v3971_v4 }
 0x760   : > { %v5737_v17 = vpop.eup %5736 }
 0x761   : > { %v3973_v23 = vmul.f32 %v5737_v17, %v5735_v48 }
 0x763   : > { %3977 = vst [vmem:[#allocation4 + $0x8] sm:$0xff] %v3973_v23  ;;  %v3984_v24 = vpack.c.bf16 %v3973_v23, %v7690_v52 }
 0x765   : > { %5064 = vmatmul.mubr.bf16.vlgmr.msra.gmra.mrb[36].mxu0 %v3984_v24 }
 0x838   : > { %v5065_v13 = vpop.f32.mrb[36].mxu0 }
 0x839   : > { %v4236_v28 = vadd.f32 %v5065_v13, %v4998_v5  ;;  %v4212_v61 = vpop.f32.mrb[37].mxu0 }
 0x83a   : > { %v4234_v27 = vadd.f32 %v4998_v5, %v4212_v61  ;;  %v5066_v2 = vpop.f32.mrb[38].mxu0 }
 0x83b   : > { %4242 = vmax.xlane.f32.xlu1 %v4236_v28  ;;  %v4215_v42 = vpop.f32.mrb[39].mxu0  ;;  %v4237_v36 = vadd.f32 %v5066_v2, %v4998_v5 }
 0x83c   : > { %4238 = vmax.xlane.f32.xlu0 %v4234_v27  ;;  %v4235_v51 = vadd.f32 %v4998_v5, %v4215_v42 }
 0x83f   : > { %4244 = vmax.xlane.f32.xlu1 %v4237_v36 }
 0x840   : > { %4240 = vmax.xlane.f32.xlu0 %v4235_v51 }
 0x8c8   : > { %v4243_v44 = vpop.xlane.xlu1 %4242 }
 0x8c9   : > { %v4248_v60 = vsub.f32 %v4236_v28, %v4243_v44  ;;  %v4239_v63 = vpop.xlane.xlu0 %4238 }
 0x8ca   : > { %v4246_v15 = vsub.f32 %v4234_v27, %v4239_v63 }
 0x8cb   : > { %v4254_v3 = vmul.f32 1.442695, %v4248_v60 }
 0x8cc   : > { %v4250_v12 = vmul.f32 1.442695, %v4246_v15  ;;  %v4245_v52 = vpop.xlane.xlu1 %4244 }
 0x8cd   : > { %v4241_v37 = vpop.xlane.xlu0 %4240  ;;  %v4249_v53 = vsub.f32 %v4237_v36, %v4245_v52 }
 0x8ce   : > { %5738 = vpow2.f32 %v4250_v12  ;;  %v4247_v54 = vsub.f32 %v4235_v51, %v4241_v37 }
 0x8cf   : > { %5740 = vpow2.f32 %v4254_v3  ;;  %v4256_v55 = vmul.f32 1.442695, %v4249_v53 }
 0x8d0   : > { %v4252_v38 = vmul.f32 1.442695, %v4247_v54 }
 0x8d2   : > { %5742 = vpow2.f32 %v4252_v38 }
 0x8d3   : > { %5744 = vpow2.f32 %v4256_v55 }
 0x8d8   : > { %v5739_v56 = vpop.eup %5738 }
 0x8d9   : > { %4258 = vadd.xlane.f32.xlu0 %v5739_v56  ;;  %v5741_v21 = vpop.eup %5740 }
 0x8dc   : > { %v5743_v10 = vpop.eup %5742 }
 0x8dd   : > { %4262 = vadd.xlane.f32.xlu0 %v5741_v21  ;;  %4260 = vadd.xlane.f32.xlu1 %v5743_v10  ;;  %v5745_v57 = vpop.eup %5744 }
 0x8e1   : > { %4264 = vadd.xlane.f32.xlu1 %v5745_v57 }
 0x966   : > { %v4259_v58 = vpop.xlane.xlu0 %4258 }
 0x967   : > { %5746 = vrcp.f32 %v4259_v58 }
 0x96a   : > { %v4261_v9 = vpop.xlane.xlu1 %4260  ;;  %v4263_v41 = vpop.xlane.xlu0 %4262 }
 0x96b   : > { %5748 = vrcp.f32 %v4261_v9 }
 0x96c   : > { %5750 = vrcp.f32 %v4263_v41 }
 0x96e   : > { %v4265_v43 = vpop.xlane.xlu1 %4264 }
 0x96f   : > { %5752 = vrcp.f32 %v4265_v43 }
 0x971   : > { %v5747_v47 = vpop.eup %5746 }
 0x972   : > { %v4270_v19 = vmul.f32 %v5747_v47, %v4259_v58 }
 0x974   : > { %v4274_v14 = vsub.f32 2.0, %v4270_v19 }
 0x975   : > { %v5749_v33 = vpop.eup %5748 }
 0x976   : > { %v5751_v22 = vpop.eup %5750  ;;  %v4278_v34 = vmul.f32 %v5747_v47, %v4274_v14  ;;  %v4271_v30 = vmul.f32 %v5749_v33, %v4261_v9 }
 0x977   : > { %v4272_v35 = vmul.f32 %v5751_v22, %v4263_v41 }
 0x978   : > { %v4282_v49 = vmul.f32 %v5739_v56, %v4278_v34  ;;  %v4275_v6 = vsub.f32 2.0, %v4271_v30 }
 0x979   : > { %v5753_v39 = vpop.eup %5752  ;;  %v4276_v7 = vsub.f32 2.0, %v4272_v35 }
 0x97a   : > { %4286 = vst [vmem:[%s6932_s5] sm:$0xff] %v4282_v49  ;;  %v4279_v59 = vmul.f32 %v5749_v33, %v4275_v6  ;;  %v4273_v11 = vmul.f32 %v5753_v39, %v4265_v43 }
 0x97b   : > { %v4280_v26 = vmul.f32 %v5751_v22, %v4276_v7 }
 0x97c   : > { %v4283_v40 = vmul.f32 %v5743_v10, %v4279_v59  ;;  %v4277_v8 = vsub.f32 2.0, %v4273_v11 }
 0x97d   : > { %v4284_v16 = vmul.f32 %v5741_v21, %v4280_v26 }
 0x97e   : > { %4287 = vst [vmem:[%s6932_s5 + $0x8] sm:$0xff] %v4283_v40  ;;  %v4281_v45 = vmul.f32 %v5753_v39, %v4277_v8 }
 0x97f   : > { %4288 = vst [vmem:[%s6932_s5 + $0x10] sm:$0xff] %v4284_v16 }
 0x980   : > { %v4285_v46 = vmul.f32 %v5745_v57, %v4281_v45 }
 0x982   : > { %4289 = vst [vmem:[%s6932_s5 + $0x18] sm:$0xff] %v4285_v46 }
 0x983   : > { %6124 = shalt.err (!%p6121_p10)
}
 0x984   : > { %s6125_s5 = scalar_lea.hbm %s7714_s7, 512  ;;  %s6129_s27 = scalar_lea.hbm %s8064_s20, 2048 }
 0x985   : > { %p6126_p9 = scmp.ne.s32.totalorder %s7714_s7, %s6125_s5  ;;  %p6130_p13 = scmp.lt.u32.totalorder %s7714_s7, %s8064_s20 }
 0x986   : > { %p6131_p4 = scmp.lt.u32.totalorder %s6129_s27, %s6125_s5  ;;  %p6133_p5 = scmp.lt.u32.totalorder %s6125_s5, %s7714_s7 }
 0x987   : > { %p6127_p11 = pnand %p6126_p9, %p8065_p8 }
 0x988   : > { %p6132_p1 = por %p6131_p4, %p6130_p13 }
 0x989   : > { %p6128_p0 = pneg %p6127_p11 }
 0x98a   : > { %p6134_p2 = por %p6133_p5, %p6132_p1 }
 0x98c   : > { %p6135_p6 = pnand %p6134_p2, %p6128_p0 }
 0x98e   : > { %6138 = shalt.err (!%p6135_p6)
}
 0x98f   : > { %s6287_s17 = smov 128   ;;  %s6288_s22 = smov 8  }
 0x990   : > { %5111 = dma.vmem_to_hbm [thread:$0]  (%p8065_p8), %s7716_s1, 512, %s7714_s7, %s4291_s23, %s6287_s17, %s6287_s17, %s6288_s22  }
 0x991 PF: > { %s8066_s24 = sld [smem:[#allocation40_spill]]  ;;  %s8067_s0 = sld [smem:[#allocation47_spill]] }
 0x992   : > { %p5172_p7 = scmp.ge.s32.totalorder %s6265_s13, 2 }
 0x997   : > { %s4321_s29 = sand.u32 1, %s8066_s24   ;;  %p8068_p3 = scmp.ne.s32.totalorder %s8067_s0, 0 }
 0x998   : > { %s4322_s21 = scalar_lea.sflag [#allocation8], %s4321_s29 }
 0x999   : > { %p5152_p12 = pnand %p5172_p7, %p8068_p3 }
 0x99b   : > { %6220 = dma.done.wait (!%p5152_p12), %s4322_s21, 512  }
 0x99c   : > { %6222 = vsyncadd (!%p5152_p12), %s4322_s21, 4294966784  ;;  %s38_s13 = sadd.s32 1, %s6265_s13   ;;  %s8069_s21 = sld [smem:[#allocation38_spill]] }
 0x99d   : > { %p35_p10 = scmp.ge.s32.totalorder %s38_s13, 6   ;;  %s8070_s22 = sld [smem:[#allocation39_spill]] }
 0x99e   : > { %s8071_s2 = sld [smem:[#allocation48_spill]]  ;;  %s8072_s27 = sld [smem:[#allocation43_spill]] }
 0x99f   : > { %s8073_s29 = sld [smem:[#allocation45_spill]]  ;;  %s8074_s4 = sld [smem:[#allocation46_spill]] }
 0x9a0   : > { %s8075_s23 = smov %s6778_s19  ;;  %s8076_s24 = smov %s6241_s25 }
 0x9a1   : > { %s8077_s25 = smov %s6245_s26  ;;  %s8079_s28 = smov %s6261_s30 }
 0x9a2   :  { %37 = sbr.rel (!%p35_p10) target bundleno = 29 (0x1d), region = 188 }
 0x9a4   : > { %s8078_s26 = smov %s8071_s2 }
 0x9a5   : > { %s8080_s30 = smov %s8074_s4 }
 0x9a9   :  { %4327 = vsyncpa [#allocation7], 1 }
 0x9aa   :  { %4329 = vsyncpa [#allocation7 + $0x1], 1 }
 0x9ab   :  { %4330 = vsyncpa [#allocation10], 1 }
 0x9ac   :  { %4332 = vsyncpa [#allocation10 + $0x1], 1 }
 0x9ad   :  { %4333 = vsyncpa [#allocation13], 1 }
 0x9ae   :  { %4335 = vsyncpa [#allocation13 + $0x1], 1 }
 0x9af   :  { %4336 = vsyncpa [#allocation16], 1 }
 0x9b0   :  { %4337 = vsyncpa [#allocation19], 1 }
 0x9b1   :  { %4338 = vsyncpa [#allocation22], 1 }
 0x9b2   :  { %4339 = vsyncpa [#allocation25], 1 }
 0x9b3   :  { %4340 = vsyncpa [#allocation8], 1 }
 0x9b4   :  { %4342 = vsyncpa [#allocation8 + $0x1], 1 }

</bundles_post_ra>
